<compile_context>
chip_gen: v5e
topology: v5e:2x2
jax: 0.10.0
libtpu: 0.0.40
codegen_flags: <defaults>
</compile_context>

<pallas_src>
import functools
import math

import jax
import jax.numpy as jnp
from jax.experimental import pallas as pl
from jax.experimental.pallas import tpu as pltpu

_MXU_DTYPE = jnp.bfloat16  # matmul-operand dtype (accumulation stays float32)


# ----------------------------------------------------------------------------
# Hardware-aware sizing helpers.
# ----------------------------------------------------------------------------
def _vmem_capacity_bytes():
    try:
        info = pltpu.get_tpu_info()
        cap = getattr(info, "vmem_capacity_bytes", None)
        if cap:
            return int(cap)
    except Exception:
        pass
    return 64 * 1024 * 1024  # conservative default (v7x-sized VMEM)


def _pick_tile(n, target):
    """Largest tile <= target that divides n and is a multiple of 8 (or n itself)."""
    if n <= target:
        return n
    for t in range(target, 7, -1):
        if n % t == 0 and t % 8 == 0:
            return t
    return n


def _pick_seq_tile(S, H, cap_bytes):
    """Generation-aware sequence tile: 128 on 64 MiB parts, up to 512 on 128 MiB."""
    budget = int(cap_bytes * 7 // 8)
    target = 512 if cap_bytes >= 96 * 1024 * 1024 else 128
    kv_scratch = 3 * S * H * 2                    # bf16 K/V residency
    per_row = 2 * 4 * H * 4 + 16 * H * 4          # streamed blocks (2-buf) + temporaries
    while target > 128 and kv_scratch + target * per_row > budget:
        target //= 2
    return _pick_tile(S, target)


# ----------------------------------------------------------------------------
# Kernel 1: retention for ALL heads of one (batch, query-tile).
#   per head h:  Q = (X_h @ Wq_h) * Theta ; K = (Z_h @ Wk_h) * conj(Theta) ; V = Z_h @ Wv_h
#                att = (Q K^T) * D ;  Y_h = att @ V
# K/V rows for this tile are appended into VMEM scratch (incremental build); the
# attention loops only over causal k-tiles 0..q.  Theta and the decay D are built
# in-kernel (no (S,H)/(S,S) HBM tables).
# ----------------------------------------------------------------------------
def _retention_kernel(lgam_ref,                       # SMEM (heads,) log(gamma)
                      x_ref, z_ref, theta_ref,        # (1,tq,H) (1,tq,H) (1,H)
                      wq_ref, wk_ref, wv_ref,         # (heads,hs,hs) bf16
                      yr_ref, yi_ref,                 # (1,tq,H) f32 outputs
                      kr_s, ki_s, v_s,                # VMEM scratch (S,H) bf16
                      *, heads, head_size, tq):
    q = pl.program_id(1)
    qstart = pl.multiple_of(q * tq, tq)

    # Theta for rows of this tile: n = q*tq + i + 1 (1-based), angle = n * theta.
    n = (jax.lax.broadcasted_iota(jnp.int32, (tq, 1), 0) + q * tq + 1).astype(jnp.float32)
    ang = n * theta_ref[...]                           # (tq, H)
    tc = jnp.cos(ang)
    ts = jnp.sin(ang)

    # Causal decay geometry within a (tq, tq) tile (shared across heads).
    row = jax.lax.broadcasted_iota(jnp.int32, (tq, tq), 0)
    col = jax.lax.broadcasted_iota(jnp.int32, (tq, tq), 1)

    dn_t = (((1,), (1,)), ((), ()))                    # contract last dims: A @ B^T

    for h in range(heads):
        c0 = h * head_size
        cs = pl.ds(c0, head_size)
        lgam = lgam_ref[h]

        tc_h = tc[:, c0:c0 + head_size]
        ts_h = ts[:, c0:c0 + head_size]

        # --- per-head projections: (tq, hs) @ (hs, hs), no block-diagonal waste ---
        x_h = x_ref[0, :, c0:c0 + head_size].astype(_MXU_DTYPE)
        z_h = z_ref[0, :, c0:c0 + head_size].astype(_MXU_DTYPE)
        a = jnp.dot(x_h, wq_ref[h], preferred_element_type=jnp.float32)
        zk = jnp.dot(z_h, wk_ref[h], preferred_element_type=jnp.float32)
        vv = jnp.dot(z_h, wv_ref[h], preferred_element_type=jnp.float32)

        qr = a * tc_h
        qi = a * ts_h
        kr_new = zk * tc_h
        ki_new = -zk * ts_h                            # conj(Theta)

        # Incremental K/V build: append rows [q*tq, (q+1)*tq) of this batch element.
        kr_s[pl.ds(qstart, tq), cs] = kr_new.astype(kr_s.dtype)
        ki_s[pl.ds(qstart, tq), cs] = ki_new.astype(ki_s.dtype)
        v_s[pl.ds(qstart, tq), cs] = vv.astype(v_s.dtype)

        qr_b = qr.astype(_MXU_DTYPE)
        qi_b = qi.astype(_MXU_DTYPE)
        qs_b = (qr + qi).astype(_MXU_DTYPE)            # Karatsuba sum operand

        # --- causal k-tile loop (tiles 0..q), Karatsuba complex QK^T ---
        def kstep(k, carry):
            ar, ai = carry
            kst = pl.multiple_of(k * tq, tq)
            krb = kr_s[pl.ds(kst, tq), cs]
            kib = ki_s[pl.ds(kst, tq), cs]
            vb = v_s[pl.ds(kst, tq), cs]

            t1 = jax.lax.dot_general(qr_b, krb, dn_t, preferred_element_type=jnp.float32)
            t2 = jax.lax.dot_general(qi_b, kib, dn_t, preferred_element_type=jnp.float32)
            t3 = jax.lax.dot_general(qs_b, krb + kib, dn_t,
                                     preferred_element_type=jnp.float32)
            qk_r = t1 - t2
            qk_i = t3 - t1 - t2

            # decay gamma^(n-m), masked before exponentiation -> no inf/NaN.
            diff = ((q - k) * tq + row - col).astype(jnp.float32)
            d = jnp.where(diff >= 0.0, jnp.exp(lgam * jnp.maximum(diff, 0.0)), 0.0)

            ar = ar + jnp.dot((qk_r * d).astype(_MXU_DTYPE), vb,
                              preferred_element_type=jnp.float32)
            ai = ai + jnp.dot((qk_i * d).astype(_MXU_DTYPE), vb,
                              preferred_element_type=jnp.float32)
            return ar, ai

        acc0 = (jnp.zeros((tq, head_size), jnp.float32),
                jnp.zeros((tq, head_size), jnp.float32))
        ar, ai = jax.lax.fori_loop(0, q + 1, kstep, acc0)

        # Direct per-head column store (static slice); unmasked when hs % 128 == 0.
        yr_ref[0, :, c0:c0 + head_size] = ar
        yi_ref[0, :, c0:c0 + head_size] = ai


# ----------------------------------------------------------------------------
# Kernel 2: per (batch, seq-tile)  complex group-norm + swish gate + output projection.
#   Yn  = GroupNorm_heads(Y)                 (complex, identity affine)
#   out = (swish(X @ W_G) * Yn) @ W_O        (complex)
# ----------------------------------------------------------------------------
def _gate_output_kernel(yr_ref, yi_ref, x_ref,
                        wgr_ref, wgi_ref, wor_ref, woi_ref, wos_ref, msel_ref,
                        or_ref, oi_ref, *, head_size, eps):
    yr = yr_ref[0]                      # (tS, H) f32
    yi = yi_ref[0]
    xr = x_ref[0]                       # (tS, H) f32 (imag part of X is zero)
    ts_rows = yr.shape[0]
    m = msel_ref[...].astype(_MXU_DTYPE)     # (heads, H) 0/1 group membership
    dn_t = (((1,), (1,)), ((), ()))
    inv_n = 1.0 / head_size

    # ---- group statistics: fused bf16 reductions, f32 accumulation ----
    # TODO(synk): ComplexGroupNorm source not provided; GroupNorm-style stats assumed
    # (biased 1/N variance of |y - mean|^2, eps=1e-5, identity affine).
    ycat = jnp.concatenate([yr, yi], axis=0).astype(_MXU_DTYPE)           # (2tS, H)
    means = jax.lax.dot_general(ycat, m, dn_t,
                                preferred_element_type=jnp.float32) * inv_n
    means_b = jnp.dot(means.astype(_MXU_DTYPE), m,
                      preferred_element_type=jnp.float32)                 # (2tS, H)
    dev_r = yr - means_b[:ts_rows]
    dev_i = yi - means_b[ts_rows:]
    sq = dev_r * dev_r + dev_i * dev_i
    var = jax.lax.dot_general(sq.astype(_MXU_DTYPE), m, dn_t,
                              preferred_element_type=jnp.float32) * inv_n
    var_b = jnp.dot(var.astype(_MXU_DTYPE), m, preferred_element_type=jnp.float32)
    inv = jax.lax.rsqrt(var_b + eps)
    ynr = dev_r * inv
    yni = dev_i * inv

    # ---- gate: swish(X @ W_G) with complex W_G, overflow-safe complex sigmoid ----
    xb = xr.astype(_MXU_DTYPE)
    gr = jnp.dot(xb, wgr_ref[...], preferred_element_type=jnp.float32)
    gi = jnp.dot(xb, wgi_ref[...], preferred_element_type=jnp.float32)
    # sigmoid(gr + i*gi) computed from exp(-|gr|) <= 1 (no overflow for any gr):
    #   gr >= 0: 1/(1+e^{-g});  gr < 0: e^{g}/(1+e^{g});  both share the denominator.
    p = jnp.exp(-jnp.abs(gr))
    pc = p * jnp.cos(gi)
    ps = p * jnp.sin(gi)
    den = (1.0 + pc) * (1.0 + pc) + ps * ps
    inv_den = pl.reciprocal(den, approx=True)
    num_r = jnp.where(gr >= 0.0, 1.0 + pc, pc + p * p)
    sr = num_r * inv_den                # Re sigmoid(g)
    si = ps * inv_den                   # Im sigmoid(g)
    swr = gr * sr - gi * si             # swish(g) = g * sigmoid(g)
    swi = gr * si + gi * sr

    # elementwise complex multiply with normalized Y
    mr = swr * ynr - swi * yni
    mi = swr * yni + swi * ynr

    # ---- complex output projection: Karatsuba, 3 real matmuls ----
    mrb = mr.astype(_MXU_DTYPE)
    mib = mi.astype(_MXU_DTYPE)
    msb = (mr + mi).astype(_MXU_DTYPE)
    t1 = jnp.dot(mrb, wor_ref[...], preferred_element_type=jnp.float32)
    t2 = jnp.dot(mib, woi_ref[...], preferred_element_type=jnp.float32)
    t3 = jnp.dot(msb, wos_ref[...], preferred_element_type=jnp.float32)
    or_ref[0] = t1 - t2
    oi_ref[0] = t3 - t1 - t2


# ----------------------------------------------------------------------------
# Parameter init (deterministic, mirrors the shapes in __init__).
# ----------------------------------------------------------------------------
def init_params(key, hidden_size, heads):
    hs = hidden_size // heads
    k = jax.random.split(key, 8)
    return {
        "W_Q": jax.random.normal(k[0], (heads, hs, hs), jnp.float32) / hs,
        "W_K": jax.random.normal(k[1], (heads, hs, hs), jnp.float32) / hs,
        "W_V": jax.random.normal(k[2], (heads, hs, hs), jnp.float32) / hs,
        "theta": jax.random.normal(k[3], (heads, hs), jnp.float32) / hs,
        # complex params carried as (real, imag) pairs
        "W_G_r": jax.random.normal(k[4], (hidden_size, hidden_size), jnp.float32) / hidden_size,
        "W_G_i": jax.random.normal(k[5], (hidden_size, hidden_size), jnp.float32) / hidden_size,
        "W_O_r": jax.random.normal(k[6], (hidden_size, hidden_size), jnp.float32) / hidden_size,
        "W_O_i": jax.random.normal(k[7], (hidden_size, hidden_size), jnp.float32) / hidden_size,
        "gammas": 1.0 - jnp.exp(
            jnp.linspace(math.log(1.0 / 32.0), math.log(1.0 / 512.0), heads)
        ).astype(jnp.float32),
        "heads": heads,
    }


# ----------------------------------------------------------------------------
# Wrapper: two pallas_calls, no HBM transposes.  Returns (real, imag) of the
# complex output, each (B, S, H) float32.
# ----------------------------------------------------------------------------
def _forward(X, Z, params, single_buffer_consts):
    B, S, H = X.shape
    heads = int(params["heads"])
    hs = H // heads

    log_gammas = jnp.log(params["gammas"]).astype(jnp.float32)
    theta2d = params["theta"].reshape(1, H).astype(jnp.float32)

    WQ = params["W_Q"].astype(_MXU_DTYPE)
    WK = params["W_K"].astype(_MXU_DTYPE)
    WV = params["W_V"].astype(_MXU_DTYPE)

    cap = _vmem_capacity_bytes()
    hard_cap = max(32 * 1024 * 1024, int(cap * 7 // 8))   # leave headroom on-chip

    def vmem_limit(est_bytes):
        return int(min(hard_cap, max(32 * 1024 * 1024, int(est_bytes * 1.5))))

    def res(shape, index_map):
        # Resident operand (constant index_map): single-buffer it if supported.
        if single_buffer_consts:
            return pl.BlockSpec(shape, index_map, pipeline_mode=pl.Buffered(1))
        return pl.BlockSpec(shape, index_map)

    # ---------------- kernel 1: retention ----------------
    tq = _pick_seq_tile(S, H, cap)
    nq = S // tq
    kern1 = functools.partial(_retention_kernel, heads=heads, head_size=hs, tq=tq)
    head_out = jax.ShapeDtypeStruct((B, S, H), jnp.float32)
    est1 = (2 * 4 * tq * H * 4                     # streamed X/Z/Yr/Yi (2 buffers)
            + 2 * (H * 4 + 3 * heads * hs * hs * 2)
            + 3 * S * H * 2                        # K/V scratch (bf16)
            + 2 * tq * H * 4 + 8 * tq * tq * 4 + 12 * tq * hs * 4)

    Yr, Yi = pl.pallas_call(
        kern1,
        out_shape=(head_out, head_out),
        grid_spec=pltpu.PrefetchScalarGridSpec(
            num_scalar_prefetch=1,
            grid=(B, nq),
            in_specs=[
                pl.BlockSpec((1, tq, H), lambda b, q, lg: (b, q, 0)),     # X tile
                pl.BlockSpec((1, tq, H), lambda b, q, lg: (b, q, 0)),     # Z tile
                res((1, H), lambda b, q, lg: (0, 0)),                     # theta (resident)
                res((heads, hs, hs), lambda b, q, lg: (0, 0, 0)),         # W_Q (resident)
                res((heads, hs, hs), lambda b, q, lg: (0, 0, 0)),         # W_K (resident)
                res((heads, hs, hs), lambda b, q, lg: (0, 0, 0)),         # W_V (resident)
            ],
            out_specs=[
                pl.BlockSpec((1, tq, H), lambda b, q, lg: (b, q, 0)),
                pl.BlockSpec((1, tq, H), lambda b, q, lg: (b, q, 0)),
            ],
            scratch_shapes=[
                pltpu.VMEM((S, H), _MXU_DTYPE),    # K real
                pltpu.VMEM((S, H), _MXU_DTYPE),    # K imag
                pltpu.VMEM((S, H), _MXU_DTYPE),    # V
            ],
        ),
        compiler_params=pltpu.CompilerParams(
            dimension_semantics=("parallel", "arbitrary"),
            vmem_limit_bytes=vmem_limit(est1)),
    )(log_gammas, X, Z, theta2d, WQ, WK, WV)

    # ---------------- kernel 2: group-norm + gate + output projection ----------------
    msel = (jnp.arange(H)[None, :] // hs == jnp.arange(heads)[:, None]).astype(jnp.float32)
    WGr = params["W_G_r"].astype(_MXU_DTYPE)
    WGi = params["W_G_i"].astype(_MXU_DTYPE)
    WOr = params["W_O_r"].astype(_MXU_DTYPE)
    WOi = params["W_O_i"].astype(_MXU_DTYPE)
    WOs = (params["W_O_r"] + params["W_O_i"]).astype(_MXU_DTYPE)   # Karatsuba sum weight

    tS = _pick_seq_tile(S, H, cap)
    ns = S // tS
    kern2 = functools.partial(_gate_output_kernel, head_size=hs, eps=1e-5)
    out_sds = jax.ShapeDtypeStruct((B, S, H), jnp.float32)
    est2 = (2 * 5 * tS * H * 4                     # streamed activations (2 buffers)
            + 2 * (5 * H * H * 2 + heads * H * 4)  # weights + membership
            + 16 * tS * H * 4)                     # temporaries

    Or, Oi = pl.pallas_call(
        kern2,
        out_shape=(out_sds, out_sds),
        grid_spec=pltpu.PrefetchScalarGridSpec(
            num_scalar_prefetch=0,
            grid=(B, ns),
            in_specs=[
                pl.BlockSpec((1, tS, H), lambda b, s: (b, s, 0)),         # Y real
                pl.BlockSpec((1, tS, H), lambda b, s: (b, s, 0)),         # Y imag
                pl.BlockSpec((1, tS, H), lambda b, s: (b, s, 0)),         # X (gate input)
                res((H, H), lambda b, s: (0, 0)),                         # W_G real
                res((H, H), lambda b, s: (0, 0)),                         # W_G imag
                res((H, H), lambda b, s: (0, 0)),                         # W_O real
                res((H, H), lambda b, s: (0, 0)),                         # W_O imag
                res((H, H), lambda b, s: (0, 0)),                         # W_O real+imag
                res((heads, H), lambda b, s: (0, 0)),                     # group membership
            ],
            out_specs=[
                pl.BlockSpec((1, tS, H), lambda b, s: (b, s, 0)),
                pl.BlockSpec((1, tS, H), lambda b, s: (b, s, 0)),
            ],
        ),
        compiler_params=pltpu.CompilerParams(
            dimension_semantics=("parallel", "parallel"),
            vmem_limit_bytes=vmem_limit(est2)),
    )(Yr, Yi, X, WGr, WGi, WOr, WOi, WOs, msel)

    return Or, Oi


def multiscale_retention(X, Z, params):
    try:
        return _forward(X, Z, params, single_buffer_consts=True)
    except Exception:
        # pipeline_mode=pl.Buffered(1) not supported by this jax/libtpu combination:
        # fall back to default double-buffered constants.
        return _forward(X, Z, params, single_buffer_consts=False)


if __name__ == "__main__":
    B, S, H, heads = 2, 8, 32, 4
    key = jax.random.PRNGKey(0)
    kp, kx, kz = jax.random.split(key, 3)
    params = init_params(kp, H, heads)
    X = jax.random.normal(kx, (B, S, H), jnp.float32)
    Z = jax.random.normal(kz, (B, S, H), jnp.float32)

    out_r, out_i = multiscale_retention(X, Z, params)
    jax.block_until_ready((out_r, out_i))
    assert out_r.shape == (B, S, H) and out_i.shape == (B, S, H)
    assert bool(jnp.all(jnp.isfinite(out_r))) and bool(jnp.all(jnp.isfinite(out_i)))
    print("KERNEL_OK")
</pallas_src>

<mosaic_0001>
module attributes {stable_mosaic.version = 11 : i64} {
  func.func @_retention_kernel(%arg0: i32, %arg1: i32, %arg2: memref<4xf32, #tpu.memory_space<smem>>, %arg3: memref<1x8x32xf32, #tpu.memory_space<vmem>>, %arg4: memref<1x8x32xf32, #tpu.memory_space<vmem>>, %arg5: memref<1x32xf32, #tpu.memory_space<vmem>>, %arg6: memref<4x8x8xbf16, #tpu.memory_space<vmem>>, %arg7: memref<4x8x8xbf16, #tpu.memory_space<vmem>>, %arg8: memref<4x8x8xbf16, #tpu.memory_space<vmem>>, %arg9: memref<1x8x32xf32, #tpu.memory_space<vmem>>, %arg10: memref<1x8x32xf32, #tpu.memory_space<vmem>>, %arg11: memref<8x32xbf16, #tpu.memory_space<vmem>>, %arg12: memref<8x32xbf16, #tpu.memory_space<vmem>>, %arg13: memref<8x32xbf16, #tpu.memory_space<vmem>>) attributes {dimension_semantics = [#tpu.dimension_semantics<parallel>, #tpu.dimension_semantics<arbitrary>], iteration_bounds = array<i64: 2, 1>, scalar_prefetch = 1 : i64, scratch_operands = 3 : i64, tpu.core_type = #tpu.core_type<tc>, window_params = [{transform_indices = @transform_0, window_bounds = array<i64: 1, 8, 32>}, {transform_indices = @transform_1, window_bounds = array<i64: 1, 8, 32>}, {pipeline_mode = #tpu.pipeline_mode<synchronous>, transform_indices = @transform_2, window_bounds = array<i64: 1, 32>}, {pipeline_mode = #tpu.pipeline_mode<synchronous>, transform_indices = @transform_3, window_bounds = array<i64: 4, 8, 8>}, {pipeline_mode = #tpu.pipeline_mode<synchronous>, transform_indices = @transform_4, window_bounds = array<i64: 4, 8, 8>}, {pipeline_mode = #tpu.pipeline_mode<synchronous>, transform_indices = @transform_5, window_bounds = array<i64: 4, 8, 8>}, {transform_indices = @transform_6, window_bounds = array<i64: 1, 8, 32>}, {transform_indices = @transform_7, window_bounds = array<i64: 1, 8, 32>}]} {
    %c8_i32 = arith.constant 8 : i32
    %0 = arith.muli %arg1, %c8_i32 : i32
    %1 = tpu.assume_multiple %0, 8 : i32
    %2 = tpu.iota {dimensions = array<i32: 0>} : vector<8x1xi32>
    %c8_i32_0 = arith.constant 8 : i32
    %3 = arith.muli %arg1, %c8_i32_0 : i32
    %4 = vector.broadcast %3 : i32 to vector<8x1xi32>
    %5 = arith.addi %2, %4 : vector<8x1xi32>
    %c1_i32 = arith.constant 1 : i32
    %6 = vector.broadcast %c1_i32 : i32 to vector<8x1xi32>
    %7 = arith.addi %5, %6 : vector<8x1xi32>
    %8 = arith.sitofp %7 : vector<8x1xi32> to vector<8x1xf32>
    %c0 = arith.constant 0 : index
    %c0_1 = arith.constant 0 : index
    %9 = vector.load %arg5[%c0, %c0_1] : memref<1x32xf32, #tpu.memory_space<vmem>>, vector<1x32xf32>
    %10 = vector.broadcast %8 : vector<8x1xf32> to vector<8x32xf32>
    %11 = vector.broadcast %9 : vector<1x32xf32> to vector<8x32xf32>
    %12 = arith.mulf %10, %11 : vector<8x32xf32>
    %13 = math.cos %12 : vector<8x32xf32>
    %14 = math.sin %12 : vector<8x32xf32>
    %15 = tpu.iota {dimensions = array<i32: 0>} : vector<8x8xi32>
    %16 = tpu.iota {dimensions = array<i32: 1>} : vector<8x8xi32>
    %c0_2 = arith.constant 0 : index
    %17 = memref.load %arg2[%c0_2] : memref<4xf32, #tpu.memory_space<smem>>
    %18 = vector.extract_strided_slice %13 {offsets = [0, 0], sizes = [8, 8], strides = [1, 1]} : vector<8x32xf32> to vector<8x8xf32>
    %19 = vector.extract_strided_slice %14 {offsets = [0, 0], sizes = [8, 8], strides = [1, 1]} : vector<8x32xf32> to vector<8x8xf32>
    %c0_3 = arith.constant 0 : index
    %c0_4 = arith.constant 0 : index
    %c0_5 = arith.constant 0 : index
    %20 = vector.load %arg3[%c0_3, %c0_4, %c0_5] : memref<1x8x32xf32, #tpu.memory_space<vmem>>, vector<1x8x8xf32>
    %21 = vector.shape_cast %20 : vector<1x8x8xf32> to vector<8x8xf32>
    %22 = arith.truncf %21 : vector<8x8xf32> to vector<8x8xbf16>
    %c0_6 = arith.constant 0 : index
    %c0_7 = arith.constant 0 : index
    %c0_8 = arith.constant 0 : index
    %23 = vector.load %arg4[%c0_6, %c0_7, %c0_8] : memref<1x8x32xf32, #tpu.memory_space<vmem>>, vector<1x8x8xf32>
    %24 = vector.shape_cast %23 : vector<1x8x8xf32> to vector<8x8xf32>
    %25 = arith.truncf %24 : vector<8x8xf32> to vector<8x8xbf16>
    %c0_9 = arith.constant 0 : index
    %c0_10 = arith.constant 0 : index
    %c0_11 = arith.constant 0 : index
    %26 = vector.load %arg6[%c0_9, %c0_10, %c0_11] : memref<4x8x8xbf16, #tpu.memory_space<vmem>>, vector<1x8x8xbf16>
    %27 = vector.shape_cast %26 : vector<1x8x8xbf16> to vector<8x8xbf16>
    %cst = arith.constant dense<0.000000e+00> : vector<8x8xf32>
    %28 = tpu.matmul %22, %27, %cst {dimension_numbers = #tpu.dot_dimension_numbers<[1], [0], [0], [1], [0, 0, 1, 1], [], []>} : vector<8x8xbf16>, vector<8x8xbf16>, vector<8x8xf32> -> vector<8x8xf32>
    %c0_12 = arith.constant 0 : index
    %c0_13 = arith.constant 0 : index
    %c0_14 = arith.constant 0 : index
    %29 = vector.load %arg7[%c0_12, %c0_13, %c0_14] : memref<4x8x8xbf16, #tpu.memory_space<vmem>>, vector<1x8x8xbf16>
    %30 = vector.shape_cast %29 : vector<1x8x8xbf16> to vector<8x8xbf16>
    %cst_15 = arith.constant dense<0.000000e+00> : vector<8x8xf32>
    %31 = tpu.matmul %25, %30, %cst_15 {dimension_numbers = #tpu.dot_dimension_numbers<[1], [0], [0], [1], [0, 0, 1, 1], [], []>} : vector<8x8xbf16>, vector<8x8xbf16>, vector<8x8xf32> -> vector<8x8xf32>
    %c0_16 = arith.constant 0 : index
    %c0_17 = arith.constant 0 : index
    %c0_18 = arith.constant 0 : index
    %32 = vector.load %arg8[%c0_16, %c0_17, %c0_18] : memref<4x8x8xbf16, #tpu.memory_space<vmem>>, vector<1x8x8xbf16>
    %33 = vector.shape_cast %32 : vector<1x8x8xbf16> to vector<8x8xbf16>
    %cst_19 = arith.constant dense<0.000000e+00> : vector<8x8xf32>
    %34 = tpu.matmul %25, %33, %cst_19 {dimension_numbers = #tpu.dot_dimension_numbers<[1], [0], [0], [1], [0, 0, 1, 1], [], []>} : vector<8x8xbf16>, vector<8x8xbf16>, vector<8x8xf32> -> vector<8x8xf32>
    %35 = arith.mulf %28, %18 : vector<8x8xf32>
    %36 = arith.mulf %28, %19 : vector<8x8xf32>
    %37 = arith.mulf %31, %18 : vector<8x8xf32>
    %cst_20 = arith.constant 0.000000e+00 : f32
    %38 = vector.broadcast %cst_20 : f32 to vector<8x8xf32>
    %39 = arith.subf %38, %31 : vector<8x8xf32>
    %40 = arith.mulf %39, %19 : vector<8x8xf32>
    %41 = arith.truncf %37 : vector<8x8xf32> to vector<8x8xbf16>
    %42 = arith.index_cast %1 : i32 to index
    %c0_21 = arith.constant 0 : index
    %43 = vector.load %arg11[%42, %c0_21] : memref<8x32xbf16, #tpu.memory_space<vmem>>, vector<8x8xbf16>
    tpu.vector_store %arg11[%42, %c0_21], %41 {strides = array<i32>} : memref<8x32xbf16, #tpu.memory_space<vmem>>, vector<8x8xbf16>,
    %44 = arith.truncf %40 : vector<8x8xf32> to vector<8x8xbf16>
    %45 = arith.index_cast %1 : i32 to index
    %c0_22 = arith.constant 0 : index
    %46 = vector.load %arg12[%45, %c0_22] : memref<8x32xbf16, #tpu.memory_space<vmem>>, vector<8x8xbf16>
    tpu.vector_store %arg12[%45, %c0_22], %44 {strides = array<i32>} : memref<8x32xbf16, #tpu.memory_space<vmem>>, vector<8x8xbf16>,
    %47 = arith.truncf %34 : vector<8x8xf32> to vector<8x8xbf16>
    %48 = arith.index_cast %1 : i32 to index
    %c0_23 = arith.constant 0 : index
    %49 = vector.load %arg13[%48, %c0_23] : memref<8x32xbf16, #tpu.memory_space<vmem>>, vector<8x8xbf16>
    tpu.vector_store %arg13[%48, %c0_23], %47 {strides = array<i32>} : memref<8x32xbf16, #tpu.memory_space<vmem>>, vector<8x8xbf16>,
    %50 = arith.truncf %35 : vector<8x8xf32> to vector<8x8xbf16>
    %51 = arith.truncf %36 : vector<8x8xf32> to vector<8x8xbf16>
    %52 = arith.addf %35, %36 : vector<8x8xf32>
    %53 = arith.truncf %52 : vector<8x8xf32> to vector<8x8xbf16>
    %cst_24 = arith.constant 0.000000e+00 : f32
    %54 = vector.broadcast %cst_24 : f32 to vector<8x8xf32>
    %cst_25 = arith.constant 0.000000e+00 : f32
    %55 = vector.broadcast %cst_25 : f32 to vector<8x8xf32>
    %c1_i32_26 = arith.constant 1 : i32
    %56 = arith.addi %arg1, %c1_i32_26 : i32
    %c0_i32 = arith.constant 0 : i32
    %57 = arith.subi %56, %c0_i32 : i32
    %58 = arith.addi %c0_i32, %57 : i32
    %c1_i32_27 = arith.constant 1 : i32
    %59:2 = scf.for %arg14 = %c0_i32 to %58 step %c1_i32_27 iter_args(%arg15 = %54, %arg16 = %55) -> (vector<8x8xf32>, vector<8x8xf32>)  : i32 {
      %c8_i32_130 = arith.constant 8 : i32
      %213 = arith.muli %arg14, %c8_i32_130 : i32
      %214 = tpu.assume_multiple %213, 8 : i32
      %215 = arith.index_cast %214 : i32 to index
      %c0_131 = arith.constant 0 : index
      %216 = vector.load %arg11[%215, %c0_131] : memref<8x32xbf16, #tpu.memory_space<vmem>>, vector<8x8xbf16>
      %217 = arith.index_cast %214 : i32 to index
      %c0_132 = arith.constant 0 : index
      %218 = vector.load %arg12[%217, %c0_132] : memref<8x32xbf16, #tpu.memory_space<vmem>>, vector<8x8xbf16>
      %219 = arith.index_cast %214 : i32 to index
      %c0_133 = arith.constant 0 : index
      %220 = vector.load %arg13[%219, %c0_133] : memref<8x32xbf16, #tpu.memory_space<vmem>>, vector<8x8xbf16>
      %cst_134 = arith.constant dense<0.000000e+00> : vector<8x8xf32>
      %221 = tpu.matmul %50, %216, %cst_134 {dimension_numbers = #tpu.dot_dimension_numbers<[1], [1], [0], [0], [0, 0, 1, 0], [], []>} : vector<8x8xbf16>, vector<8x8xbf16>, vector<8x8xf32> -> vector<8x8xf32>
      %cst_135 = arith.constant dense<0.000000e+00> : vector<8x8xf32>
      %222 = tpu.matmul %51, %218, %cst_135 {dimension_numbers = #tpu.dot_dimension_numbers<[1], [1], [0], [0], [0, 0, 1, 0], [], []>} : vector<8x8xbf16>, vector<8x8xbf16>, vector<8x8xf32> -> vector<8x8xf32>
      %223 = arith.addf %216, %218 : vector<8x8xbf16>
      %cst_136 = arith.constant dense<0.000000e+00> : vector<8x8xf32>
      %224 = tpu.matmul %53, %223, %cst_136 {dimension_numbers = #tpu.dot_dimension_numbers<[1], [1], [0], [0], [0, 0, 1, 0], [], []>} : vector<8x8xbf16>, vector<8x8xbf16>, vector<8x8xf32> -> vector<8x8xf32>
      %225 = arith.subf %221, %222 : vector<8x8xf32>
      %226 = arith.subf %224, %221 : vector<8x8xf32>
      %227 = arith.subf %226, %222 : vector<8x8xf32>
      %228 = arith.subi %arg1, %arg14 : i32
      %c8_i32_137 = arith.constant 8 : i32
      %229 = arith.muli %228, %c8_i32_137 : i32
      %230 = vector.broadcast %229 : i32 to vector<8x8xi32>
      %231 = arith.addi %230, %15 : vector<8x8xi32>
      %232 = arith.subi %231, %16 : vector<8x8xi32>
      %233 = arith.sitofp %232 : vector<8x8xi32> to vector<8x8xf32>
      %cst_138 = arith.constant 0.000000e+00 : f32
      %234 = vector.broadcast %cst_138 : f32 to vector<8x8xf32>
      %235 = arith.cmpf oge, %233, %234 : vector<8x8xf32>
      %cst_139 = arith.constant 0.000000e+00 : f32
      %236 = vector.broadcast %cst_139 : f32 to vector<8x8xf32>
      %237 = arith.maximumf %233, %236 : vector<8x8xf32>
      %238 = vector.broadcast %17 : f32 to vector<8x8xf32>
      %239 = arith.mulf %238, %237 : vector<8x8xf32>
      %240 = math.exp %239 : vector<8x8xf32>
      %cst_140 = arith.constant 0.000000e+00 : f32
      %241 = vector.broadcast %cst_140 : f32 to vector<8x8xf32>
      %242 = arith.select %235, %240, %241 : vector<8x8xi1>, vector<8x8xf32>
      %243 = arith.mulf %225, %242 : vector<8x8xf32>
      %244 = arith.truncf %243 : vector<8x8xf32> to vector<8x8xbf16>
      %cst_141 = arith.constant dense<0.000000e+00> : vector<8x8xf32>
      %245 = tpu.matmul %244, %220, %cst_141 {dimension_numbers = #tpu.dot_dimension_numbers<[1], [0], [0], [1], [0, 0, 1, 1], [], []>} : vector<8x8xbf16>, vector<8x8xbf16>, vector<8x8xf32> -> vector<8x8xf32>
      %246 = arith.addf %arg15, %245 : vector<8x8xf32>
      %247 = arith.mulf %227, %242 : vector<8x8xf32>
      %248 = arith.truncf %247 : vector<8x8xf32> to vector<8x8xbf16>
      %cst_142 = arith.constant dense<0.000000e+00> : vector<8x8xf32>
      %249 = tpu.matmul %248, %220, %cst_142 {dimension_numbers = #tpu.dot_dimension_numbers<[1], [0], [0], [1], [0, 0, 1, 1], [], []>} : vector<8x8xbf16>, vector<8x8xbf16>, vector<8x8xf32> -> vector<8x8xf32>
      %250 = arith.addf %arg16, %249 : vector<8x8xf32>
      scf.yield %246, %250 : vector<8x8xf32>, vector<8x8xf32>
    }
    %c0_28 = arith.constant 0 : index
    %c0_29 = arith.constant 0 : index
    %c0_30 = arith.constant 0 : index
    %60 = vector.load %arg9[%c0_28, %c0_29, %c0_30] : memref<1x8x32xf32, #tpu.memory_space<vmem>>, vector<1x8x8xf32>
    %61 = vector.shape_cast %60 : vector<1x8x8xf32> to vector<8x8xf32>
    %62 = vector.shape_cast %59#0 : vector<8x8xf32> to vector<1x8x8xf32>
    tpu.vector_store %arg9[%c0_28, %c0_29, %c0_30], %62 {strides = array<i32>} : memref<1x8x32xf32, #tpu.memory_space<vmem>>, vector<1x8x8xf32>,
    %c0_31 = arith.constant 0 : index
    %c0_32 = arith.constant 0 : index
    %c0_33 = arith.constant 0 : index
    %63 = vector.load %arg10[%c0_31, %c0_32, %c0_33] : memref<1x8x32xf32, #tpu.memory_space<vmem>>, vector<1x8x8xf32>
    %64 = vector.shape_cast %63 : vector<1x8x8xf32> to vector<8x8xf32>
    %65 = vector.shape_cast %59#1 : vector<8x8xf32> to vector<1x8x8xf32>
    tpu.vector_store %arg10[%c0_31, %c0_32, %c0_33], %65 {strides = array<i32>} : memref<1x8x32xf32, #tpu.memory_space<vmem>>, vector<1x8x8xf32>,
    %c1 = arith.constant 1 : index
    %66 = memref.load %arg2[%c1] : memref<4xf32, #tpu.memory_space<smem>>
    %67 = vector.extract_strided_slice %13 {offsets = [0, 8], sizes = [8, 8], strides = [1, 1]} : vector<8x32xf32> to vector<8x8xf32>
    %68 = vector.extract_strided_slice %14 {offsets = [0, 8], sizes = [8, 8], strides = [1, 1]} : vector<8x32xf32> to vector<8x8xf32>
    %c0_34 = arith.constant 0 : index
    %c0_35 = arith.constant 0 : index
    %c8 = arith.constant 8 : index
    %69 = vector.load %arg3[%c0_34, %c0_35, %c8] : memref<1x8x32xf32, #tpu.memory_space<vmem>>, vector<1x8x8xf32>
    %70 = vector.shape_cast %69 : vector<1x8x8xf32> to vector<8x8xf32>
    %71 = arith.truncf %70 : vector<8x8xf32> to vector<8x8xbf16>
    %c0_36 = arith.constant 0 : index
    %c0_37 = arith.constant 0 : index
    %c8_38 = arith.constant 8 : index
    %72 = vector.load %arg4[%c0_36, %c0_37, %c8_38] : memref<1x8x32xf32, #tpu.memory_space<vmem>>, vector<1x8x8xf32>
    %73 = vector.shape_cast %72 : vector<1x8x8xf32> to vector<8x8xf32>
    %74 = arith.truncf %73 : vector<8x8xf32> to vector<8x8xbf16>
    %c1_39 = arith.constant 1 : index
    %c0_40 = arith.constant 0 : index
    %c0_41 = arith.constant 0 : index
    %75 = vector.load %arg6[%c1_39, %c0_40, %c0_41] : memref<4x8x8xbf16, #tpu.memory_space<vmem>>, vector<1x8x8xbf16>
    %76 = vector.shape_cast %75 : vector<1x8x8xbf16> to vector<8x8xbf16>
    %cst_42 = arith.constant dense<0.000000e+00> : vector<8x8xf32>
    %77 = tpu.matmul %71, %76, %cst_42 {dimension_numbers = #tpu.dot_dimension_numbers<[1], [0], [0], [1], [0, 0, 1, 1], [], []>} : vector<8x8xbf16>, vector<8x8xbf16>, vector<8x8xf32> -> vector<8x8xf32>
    %c1_43 = arith.constant 1 : index
    %c0_44 = arith.constant 0 : index
    %c0_45 = arith.constant 0 : index
    %78 = vector.load %arg7[%c1_43, %c0_44, %c0_45] : memref<4x8x8xbf16, #tpu.memory_space<vmem>>, vector<1x8x8xbf16>
    %79 = vector.shape_cast %78 : vector<1x8x8xbf16> to vector<8x8xbf16>
    %cst_46 = arith.constant dense<0.000000e+00> : vector<8x8xf32>
    %80 = tpu.matmul %74, %79, %cst_46 {dimension_numbers = #tpu.dot_dimension_numbers<[1], [0], [0], [1], [0, 0, 1, 1], [], []>} : vector<8x8xbf16>, vector<8x8xbf16>, vector<8x8xf32> -> vector<8x8xf32>
    %c1_47 = arith.constant 1 : index
    %c0_48 = arith.constant 0 : index
    %c0_49 = arith.constant 0 : index
    %81 = vector.load %arg8[%c1_47, %c0_48, %c0_49] : memref<4x8x8xbf16, #tpu.memory_space<vmem>>, vector<1x8x8xbf16>
    %82 = vector.shape_cast %81 : vector<1x8x8xbf16> to vector<8x8xbf16>
    %cst_50 = arith.constant dense<0.000000e+00> : vector<8x8xf32>
    %83 = tpu.matmul %74, %82, %cst_50 {dimension_numbers = #tpu.dot_dimension_numbers<[1], [0], [0], [1], [0, 0, 1, 1], [], []>} : vector<8x8xbf16>, vector<8x8xbf16>, vector<8x8xf32> -> vector<8x8xf32>
    %84 = arith.mulf %77, %67 : vector<8x8xf32>
    %85 = arith.mulf %77, %68 : vector<8x8xf32>
    %86 = arith.mulf %80, %67 : vector<8x8xf32>
    %cst_51 = arith.constant 0.000000e+00 : f32
    %87 = vector.broadcast %cst_51 : f32 to vector<8x8xf32>
    %88 = arith.subf %87, %80 : vector<8x8xf32>
    %89 = arith.mulf %88, %68 : vector<8x8xf32>
    %90 = arith.truncf %86 : vector<8x8xf32> to vector<8x8xbf16>
    %91 = arith.index_cast %1 : i32 to index
    %c8_52 = arith.constant 8 : index
    %92 = vector.load %arg11[%91, %c8_52] : memref<8x32xbf16, #tpu.memory_space<vmem>>, vector<8x8xbf16>
    tpu.vector_store %arg11[%91, %c8_52], %90 {strides = array<i32>} : memref<8x32xbf16, #tpu.memory_space<vmem>>, vector<8x8xbf16>,
    %93 = arith.truncf %89 : vector<8x8xf32> to vector<8x8xbf16>
    %94 = arith.index_cast %1 : i32 to index
    %c8_53 = arith.constant 8 : index
    %95 = vector.load %arg12[%94, %c8_53] : memref<8x32xbf16, #tpu.memory_space<vmem>>, vector<8x8xbf16>
    tpu.vector_store %arg12[%94, %c8_53], %93 {strides = array<i32>} : memref<8x32xbf16, #tpu.memory_space<vmem>>, vector<8x8xbf16>,
    %96 = arith.truncf %83 : vector<8x8xf32> to vector<8x8xbf16>
    %97 = arith.index_cast %1 : i32 to index
    %c8_54 = arith.constant 8 : index
    %98 = vector.load %arg13[%97, %c8_54] : memref<8x32xbf16, #tpu.memory_space<vmem>>, vector<8x8xbf16>
    tpu.vector_store %arg13[%97, %c8_54], %96 {strides = array<i32>} : memref<8x32xbf16, #tpu.memory_space<vmem>>, vector<8x8xbf16>,
    %99 = arith.truncf %84 : vector<8x8xf32> to vector<8x8xbf16>
    %100 = arith.truncf %85 : vector<8x8xf32> to vector<8x8xbf16>
    %101 = arith.addf %84, %85 : vector<8x8xf32>
    %102 = arith.truncf %101 : vector<8x8xf32> to vector<8x8xbf16>
    %cst_55 = arith.constant 0.000000e+00 : f32
    %103 = vector.broadcast %cst_55 : f32 to vector<8x8xf32>
    %cst_56 = arith.constant 0.000000e+00 : f32
    %104 = vector.broadcast %cst_56 : f32 to vector<8x8xf32>
    %c1_i32_57 = arith.constant 1 : i32
    %105 = arith.addi %arg1, %c1_i32_57 : i32
    %c0_i32_58 = arith.constant 0 : i32
    %106 = arith.subi %105, %c0_i32_58 : i32
    %107 = arith.addi %c0_i32_58, %106 : i32
    %c1_i32_59 = arith.constant 1 : i32
    %108:2 = scf.for %arg14 = %c0_i32_58 to %107 step %c1_i32_59 iter_args(%arg15 = %103, %arg16 = %104) -> (vector<8x8xf32>, vector<8x8xf32>)  : i32 {
      %c8_i32_130 = arith.constant 8 : i32
      %213 = arith.muli %arg14, %c8_i32_130 : i32
      %214 = tpu.assume_multiple %213, 8 : i32
      %215 = arith.index_cast %214 : i32 to index
      %c8_131 = arith.constant 8 : index
      %216 = vector.load %arg11[%215, %c8_131] : memref<8x32xbf16, #tpu.memory_space<vmem>>, vector<8x8xbf16>
      %217 = arith.index_cast %214 : i32 to index
      %c8_132 = arith.constant 8 : index
      %218 = vector.load %arg12[%217, %c8_132] : memref<8x32xbf16, #tpu.memory_space<vmem>>, vector<8x8xbf16>
      %219 = arith.index_cast %214 : i32 to index
      %c8_133 = arith.constant 8 : index
      %220 = vector.load %arg13[%219, %c8_133] : memref<8x32xbf16, #tpu.memory_space<vmem>>, vector<8x8xbf16>
      %cst_134 = arith.constant dense<0.000000e+00> : vector<8x8xf32>
      %221 = tpu.matmul %99, %216, %cst_134 {dimension_numbers = #tpu.dot_dimension_numbers<[1], [1], [0], [0], [0, 0, 1, 0], [], []>} : vector<8x8xbf16>, vector<8x8xbf16>, vector<8x8xf32> -> vector<8x8xf32>
      %cst_135 = arith.constant dense<0.000000e+00> : vector<8x8xf32>
      %222 = tpu.matmul %100, %218, %cst_135 {dimension_numbers = #tpu.dot_dimension_numbers<[1], [1], [0], [0], [0, 0, 1, 0], [], []>} : vector<8x8xbf16>, vector<8x8xbf16>, vector<8x8xf32> -> vector<8x8xf32>
      %223 = arith.addf %216, %218 : vector<8x8xbf16>
      %cst_136 = arith.constant dense<0.000000e+00> : vector<8x8xf32>
      %224 = tpu.matmul %102, %223, %cst_136 {dimension_numbers = #tpu.dot_dimension_numbers<[1], [1], [0], [0], [0, 0, 1, 0], [], []>} : vector<8x8xbf16>, vector<8x8xbf16>, vector<8x8xf32> -> vector<8x8xf32>
      %225 = arith.subf %221, %222 : vector<8x8xf32>
      %226 = arith.subf %224, %221 : vector<8x8xf32>
      %227 = arith.subf %226, %222 : vector<8x8xf32>
      %228 = arith.subi %arg1, %arg14 : i32
      %c8_i32_137 = arith.constant 8 : i32
      %229 = arith.muli %228, %c8_i32_137 : i32
      %230 = vector.broadcast %229 : i32 to vector<8x8xi32>
      %231 = arith.addi %230, %15 : vector<8x8xi32>
      %232 = arith.subi %231, %16 : vector<8x8xi32>
      %233 = arith.sitofp %232 : vector<8x8xi32> to vector<8x8xf32>
      %cst_138 = arith.constant 0.000000e+00 : f32
      %234 = vector.broadcast %cst_138 : f32 to vector<8x8xf32>
      %235 = arith.cmpf oge, %233, %234 : vector<8x8xf32>
      %cst_139 = arith.constant 0.000000e+00 : f32
      %236 = vector.broadcast %cst_139 : f32 to vector<8x8xf32>
      %237 = arith.maximumf %233, %236 : vector<8x8xf32>
      %238 = vector.broadcast %66 : f32 to vector<8x8xf32>
      %239 = arith.mulf %238, %237 : vector<8x8xf32>
      %240 = math.exp %239 : vector<8x8xf32>
      %cst_140 = arith.constant 0.000000e+00 : f32
      %241 = vector.broadcast %cst_140 : f32 to vector<8x8xf32>
      %242 = arith.select %235, %240, %241 : vector<8x8xi1>, vector<8x8xf32>
      %243 = arith.mulf %225, %242 : vector<8x8xf32>
      %244 = arith.truncf %243 : vector<8x8xf32> to vector<8x8xbf16>
      %cst_141 = arith.constant dense<0.000000e+00> : vector<8x8xf32>
      %245 = tpu.matmul %244, %220, %cst_141 {dimension_numbers = #tpu.dot_dimension_numbers<[1], [0], [0], [1], [0, 0, 1, 1], [], []>} : vector<8x8xbf16>, vector<8x8xbf16>, vector<8x8xf32> -> vector<8x8xf32>
      %246 = arith.addf %arg15, %245 : vector<8x8xf32>
      %247 = arith.mulf %227, %242 : vector<8x8xf32>
      %248 = arith.truncf %247 : vector<8x8xf32> to vector<8x8xbf16>
      %cst_142 = arith.constant dense<0.000000e+00> : vector<8x8xf32>
      %249 = tpu.matmul %248, %220, %cst_142 {dimension_numbers = #tpu.dot_dimension_numbers<[1], [0], [0], [1], [0, 0, 1, 1], [], []>} : vector<8x8xbf16>, vector<8x8xbf16>, vector<8x8xf32> -> vector<8x8xf32>
      %250 = arith.addf %arg16, %249 : vector<8x8xf32>
      scf.yield %246, %250 : vector<8x8xf32>, vector<8x8xf32>
    }
    %c0_60 = arith.constant 0 : index
    %c0_61 = arith.constant 0 : index
    %c8_62 = arith.constant 8 : index
    %109 = vector.load %arg9[%c0_60, %c0_61, %c8_62] : memref<1x8x32xf32, #tpu.memory_space<vmem>>, vector<1x8x8xf32>
    %110 = vector.shape_cast %109 : vector<1x8x8xf32> to vector<8x8xf32>
    %111 = vector.shape_cast %108#0 : vector<8x8xf32> to vector<1x8x8xf32>
    tpu.vector_store %arg9[%c0_60, %c0_61, %c8_62], %111 {strides = array<i32>} : memref<1x8x32xf32, #tpu.memory_space<vmem>>, vector<1x8x8xf32>,
    %c0_63 = arith.constant 0 : index
    %c0_64 = arith.constant 0 : index
    %c8_65 = arith.constant 8 : index
    %112 = vector.load %arg10[%c0_63, %c0_64, %c8_65] : memref<1x8x32xf32, #tpu.memory_space<vmem>>, vector<1x8x8xf32>
    %113 = vector.shape_cast %112 : vector<1x8x8xf32> to vector<8x8xf32>
    %114 = vector.shape_cast %108#1 : vector<8x8xf32> to vector<1x8x8xf32>
    tpu.vector_store %arg10[%c0_63, %c0_64, %c8_65], %114 {strides = array<i32>} : memref<1x8x32xf32, #tpu.memory_space<vmem>>, vector<1x8x8xf32>,
    %c2 = arith.constant 2 : index
    %115 = memref.load %arg2[%c2] : memref<4xf32, #tpu.memory_space<smem>>
    %116 = vector.extract_strided_slice %13 {offsets = [0, 16], sizes = [8, 8], strides = [1, 1]} : vector<8x32xf32> to vector<8x8xf32>
    %117 = vector.extract_strided_slice %14 {offsets = [0, 16], sizes = [8, 8], strides = [1, 1]} : vector<8x32xf32> to vector<8x8xf32>
    %c0_66 = arith.constant 0 : index
    %c0_67 = arith.constant 0 : index
    %c16 = arith.constant 16 : index
    %118 = vector.load %arg3[%c0_66, %c0_67, %c16] : memref<1x8x32xf32, #tpu.memory_space<vmem>>, vector<1x8x8xf32>
    %119 = vector.shape_cast %118 : vector<1x8x8xf32> to vector<8x8xf32>
    %120 = arith.truncf %119 : vector<8x8xf32> to vector<8x8xbf16>
    %c0_68 = arith.constant 0 : index
    %c0_69 = arith.constant 0 : index
    %c16_70 = arith.constant 16 : index
    %121 = vector.load %arg4[%c0_68, %c0_69, %c16_70] : memref<1x8x32xf32, #tpu.memory_space<vmem>>, vector<1x8x8xf32>
    %122 = vector.shape_cast %121 : vector<1x8x8xf32> to vector<8x8xf32>
    %123 = arith.truncf %122 : vector<8x8xf32> to vector<8x8xbf16>
    %c2_71 = arith.constant 2 : index
    %c0_72 = arith.constant 0 : index
    %c0_73 = arith.constant 0 : index
    %124 = vector.load %arg6[%c2_71, %c0_72, %c0_73] : memref<4x8x8xbf16, #tpu.memory_space<vmem>>, vector<1x8x8xbf16>
    %125 = vector.shape_cast %124 : vector<1x8x8xbf16> to vector<8x8xbf16>
    %cst_74 = arith.constant dense<0.000000e+00> : vector<8x8xf32>
    %126 = tpu.matmul %120, %125, %cst_74 {dimension_numbers = #tpu.dot_dimension_numbers<[1], [0], [0], [1], [0, 0, 1, 1], [], []>} : vector<8x8xbf16>, vector<8x8xbf16>, vector<8x8xf32> -> vector<8x8xf32>
    %c2_75 = arith.constant 2 : index
    %c0_76 = arith.constant 0 : index
    %c0_77 = arith.constant 0 : index
    %127 = vector.load %arg7[%c2_75, %c0_76, %c0_77] : memref<4x8x8xbf16, #tpu.memory_space<vmem>>, vector<1x8x8xbf16>
    %128 = vector.shape_cast %127 : vector<1x8x8xbf16> to vector<8x8xbf16>
    %cst_78 = arith.constant dense<0.000000e+00> : vector<8x8xf32>
    %129 = tpu.matmul %123, %128, %cst_78 {dimension_numbers = #tpu.dot_dimension_numbers<[1], [0], [0], [1], [0, 0, 1, 1], [], []>} : vector<8x8xbf16>, vector<8x8xbf16>, vector<8x8xf32> -> vector<8x8xf32>
    %c2_79 = arith.constant 2 : index
    %c0_80 = arith.constant 0 : index
    %c0_81 = arith.constant 0 : index
    %130 = vector.load %arg8[%c2_79, %c0_80, %c0_81] : memref<4x8x8xbf16, #tpu.memory_space<vmem>>, vector<1x8x8xbf16>
    %131 = vector.shape_cast %130 : vector<1x8x8xbf16> to vector<8x8xbf16>
    %cst_82 = arith.constant dense<0.000000e+00> : vector<8x8xf32>
    %132 = tpu.matmul %123, %131, %cst_82 {dimension_numbers = #tpu.dot_dimension_numbers<[1], [0], [0], [1], [0, 0, 1, 1], [], []>} : vector<8x8xbf16>, vector<8x8xbf16>, vector<8x8xf32> -> vector<8x8xf32>
    %133 = arith.mulf %126, %116 : vector<8x8xf32>
    %134 = arith.mulf %126, %117 : vector<8x8xf32>
    %135 = arith.mulf %129, %116 : vector<8x8xf32>
    %cst_83 = arith.constant 0.000000e+00 : f32
    %136 = vector.broadcast %cst_83 : f32 to vector<8x8xf32>
    %137 = arith.subf %136, %129 : vector<8x8xf32>
    %138 = arith.mulf %137, %117 : vector<8x8xf32>
    %139 = arith.truncf %135 : vector<8x8xf32> to vector<8x8xbf16>
    %140 = arith.index_cast %1 : i32 to index
    %c16_84 = arith.constant 16 : index
    %141 = vector.load %arg11[%140, %c16_84] : memref<8x32xbf16, #tpu.memory_space<vmem>>, vector<8x8xbf16>
    tpu.vector_store %arg11[%140, %c16_84], %139 {strides = array<i32>} : memref<8x32xbf16, #tpu.memory_space<vmem>>, vector<8x8xbf16>,
    %142 = arith.truncf %138 : vector<8x8xf32> to vector<8x8xbf16>
    %143 = arith.index_cast %1 : i32 to index
    %c16_85 = arith.constant 16 : index
    %144 = vector.load %arg12[%143, %c16_85] : memref<8x32xbf16, #tpu.memory_space<vmem>>, vector<8x8xbf16>
    tpu.vector_store %arg12[%143, %c16_85], %142 {strides = array<i32>} : memref<8x32xbf16, #tpu.memory_space<vmem>>, vector<8x8xbf16>,
    %145 = arith.truncf %132 : vector<8x8xf32> to vector<8x8xbf16>
    %146 = arith.index_cast %1 : i32 to index
    %c16_86 = arith.constant 16 : index
    %147 = vector.load %arg13[%146, %c16_86] : memref<8x32xbf16, #tpu.memory_space<vmem>>, vector<8x8xbf16>
    tpu.vector_store %arg13[%146, %c16_86], %145 {strides = array<i32>} : memref<8x32xbf16, #tpu.memory_space<vmem>>, vector<8x8xbf16>,
    %148 = arith.truncf %133 : vector<8x8xf32> to vector<8x8xbf16>
    %149 = arith.truncf %134 : vector<8x8xf32> to vector<8x8xbf16>
    %150 = arith.addf %133, %134 : vector<8x8xf32>
    %151 = arith.truncf %150 : vector<8x8xf32> to vector<8x8xbf16>
    %cst_87 = arith.constant 0.000000e+00 : f32
    %152 = vector.broadcast %cst_87 : f32 to vector<8x8xf32>
    %cst_88 = arith.constant 0.000000e+00 : f32
    %153 = vector.broadcast %cst_88 : f32 to vector<8x8xf32>
    %c1_i32_89 = arith.constant 1 : i32
    %154 = arith.addi %arg1, %c1_i32_89 : i32
    %c0_i32_90 = arith.constant 0 : i32
    %155 = arith.subi %154, %c0_i32_90 : i32
    %156 = arith.addi %c0_i32_90, %155 : i32
    %c1_i32_91 = arith.constant 1 : i32
    %157:2 = scf.for %arg14 = %c0_i32_90 to %156 step %c1_i32_91 iter_args(%arg15 = %152, %arg16 = %153) -> (vector<8x8xf32>, vector<8x8xf32>)  : i32 {
      %c8_i32_130 = arith.constant 8 : i32
      %213 = arith.muli %arg14, %c8_i32_130 : i32
      %214 = tpu.assume_multiple %213, 8 : i32
      %215 = arith.index_cast %214 : i32 to index
      %c16_131 = arith.constant 16 : index
      %216 = vector.load %arg11[%215, %c16_131] : memref<8x32xbf16, #tpu.memory_space<vmem>>, vector<8x8xbf16>
      %217 = arith.index_cast %214 : i32 to index
      %c16_132 = arith.constant 16 : index
      %218 = vector.load %arg12[%217, %c16_132] : memref<8x32xbf16, #tpu.memory_space<vmem>>, vector<8x8xbf16>
      %219 = arith.index_cast %214 : i32 to index
      %c16_133 = arith.constant 16 : index
      %220 = vector.load %arg13[%219, %c16_133] : memref<8x32xbf16, #tpu.memory_space<vmem>>, vector<8x8xbf16>
      %cst_134 = arith.constant dense<0.000000e+00> : vector<8x8xf32>
      %221 = tpu.matmul %148, %216, %cst_134 {dimension_numbers = #tpu.dot_dimension_numbers<[1], [1], [0], [0], [0, 0, 1, 0], [], []>} : vector<8x8xbf16>, vector<8x8xbf16>, vector<8x8xf32> -> vector<8x8xf32>
      %cst_135 = arith.constant dense<0.000000e+00> : vector<8x8xf32>
      %222 = tpu.matmul %149, %218, %cst_135 {dimension_numbers = #tpu.dot_dimension_numbers<[1], [1], [0], [0], [0, 0, 1, 0], [], []>} : vector<8x8xbf16>, vector<8x8xbf16>, vector<8x8xf32> -> vector<8x8xf32>
      %223 = arith.addf %216, %218 : vector<8x8xbf16>
      %cst_136 = arith.constant dense<0.000000e+00> : vector<8x8xf32>
      %224 = tpu.matmul %151, %223, %cst_136 {dimension_numbers = #tpu.dot_dimension_numbers<[1], [1], [0], [0], [0, 0, 1, 0], [], []>} : vector<8x8xbf16>, vector<8x8xbf16>, vector<8x8xf32> -> vector<8x8xf32>
      %225 = arith.subf %221, %222 : vector<8x8xf32>
      %226 = arith.subf %224, %221 : vector<8x8xf32>
      %227 = arith.subf %226, %222 : vector<8x8xf32>
      %228 = arith.subi %arg1, %arg14 : i32
      %c8_i32_137 = arith.constant 8 : i32
      %229 = arith.muli %228, %c8_i32_137 : i32
      %230 = vector.broadcast %229 : i32 to vector<8x8xi32>
      %231 = arith.addi %230, %15 : vector<8x8xi32>
      %232 = arith.subi %231, %16 : vector<8x8xi32>
      %233 = arith.sitofp %232 : vector<8x8xi32> to vector<8x8xf32>
      %cst_138 = arith.constant 0.000000e+00 : f32
      %234 = vector.broadcast %cst_138 : f32 to vector<8x8xf32>
      %235 = arith.cmpf oge, %233, %234 : vector<8x8xf32>
      %cst_139 = arith.constant 0.000000e+00 : f32
      %236 = vector.broadcast %cst_139 : f32 to vector<8x8xf32>
      %237 = arith.maximumf %233, %236 : vector<8x8xf32>
      %238 = vector.broadcast %115 : f32 to vector<8x8xf32>
      %239 = arith.mulf %238, %237 : vector<8x8xf32>
      %240 = math.exp %239 : vector<8x8xf32>
      %cst_140 = arith.constant 0.000000e+00 : f32
      %241 = vector.broadcast %cst_140 : f32 to vector<8x8xf32>
      %242 = arith.select %235, %240, %241 : vector<8x8xi1>, vector<8x8xf32>
      %243 = arith.mulf %225, %242 : vector<8x8xf32>
      %244 = arith.truncf %243 : vector<8x8xf32> to vector<8x8xbf16>
      %cst_141 = arith.constant dense<0.000000e+00> : vector<8x8xf32>
      %245 = tpu.matmul %244, %220, %cst_141 {dimension_numbers = #tpu.dot_dimension_numbers<[1], [0], [0], [1], [0, 0, 1, 1], [], []>} : vector<8x8xbf16>, vector<8x8xbf16>, vector<8x8xf32> -> vector<8x8xf32>
      %246 = arith.addf %arg15, %245 : vector<8x8xf32>
      %247 = arith.mulf %227, %242 : vector<8x8xf32>
      %248 = arith.truncf %247 : vector<8x8xf32> to vector<8x8xbf16>
      %cst_142 = arith.constant dense<0.000000e+00> : vector<8x8xf32>
      %249 = tpu.matmul %248, %220, %cst_142 {dimension_numbers = #tpu.dot_dimension_numbers<[1], [0], [0], [1], [0, 0, 1, 1], [], []>} : vector<8x8xbf16>, vector<8x8xbf16>, vector<8x8xf32> -> vector<8x8xf32>
      %250 = arith.addf %arg16, %249 : vector<8x8xf32>
      scf.yield %246, %250 : vector<8x8xf32>, vector<8x8xf32>
    }
    %c0_92 = arith.constant 0 : index
    %c0_93 = arith.constant 0 : index
    %c16_94 = arith.constant 16 : index
    %158 = vector.load %arg9[%c0_92, %c0_93, %c16_94] : memref<1x8x32xf32, #tpu.memory_space<vmem>>, vector<1x8x8xf32>
    %159 = vector.shape_cast %158 : vector<1x8x8xf32> to vector<8x8xf32>
    %160 = vector.shape_cast %157#0 : vector<8x8xf32> to vector<1x8x8xf32>
    tpu.vector_store %arg9[%c0_92, %c0_93, %c16_94], %160 {strides = array<i32>} : memref<1x8x32xf32, #tpu.memory_space<vmem>>, vector<1x8x8xf32>,
    %c0_95 = arith.constant 0 : index
    %c0_96 = arith.constant 0 : index
    %c16_97 = arith.constant 16 : index
    %161 = vector.load %arg10[%c0_95, %c0_96, %c16_97] : memref<1x8x32xf32, #tpu.memory_space<vmem>>, vector<1x8x8xf32>
    %162 = vector.shape_cast %161 : vector<1x8x8xf32> to vector<8x8xf32>
    %163 = vector.shape_cast %157#1 : vector<8x8xf32> to vector<1x8x8xf32>
    tpu.vector_store %arg10[%c0_95, %c0_96, %c16_97], %163 {strides = array<i32>} : memref<1x8x32xf32, #tpu.memory_space<vmem>>, vector<1x8x8xf32>,
    %c3 = arith.constant 3 : index
    %164 = memref.load %arg2[%c3] : memref<4xf32, #tpu.memory_space<smem>>
    %165 = vector.extract_strided_slice %13 {offsets = [0, 24], sizes = [8, 8], strides = [1, 1]} : vector<8x32xf32> to vector<8x8xf32>
    %166 = vector.extract_strided_slice %14 {offsets = [0, 24], sizes = [8, 8], strides = [1, 1]} : vector<8x32xf32> to vector<8x8xf32>
    %c0_98 = arith.constant 0 : index
    %c0_99 = arith.constant 0 : index
    %c24 = arith.constant 24 : index
    %167 = vector.load %arg3[%c0_98, %c0_99, %c24] : memref<1x8x32xf32, #tpu.memory_space<vmem>>, vector<1x8x8xf32>
    %168 = vector.shape_cast %167 : vector<1x8x8xf32> to vector<8x8xf32>
    %169 = arith.truncf %168 : vector<8x8xf32> to vector<8x8xbf16>
    %c0_100 = arith.constant 0 : index
    %c0_101 = arith.constant 0 : index
    %c24_102 = arith.constant 24 : index
    %170 = vector.load %arg4[%c0_100, %c0_101, %c24_102] : memref<1x8x32xf32, #tpu.memory_space<vmem>>, vector<1x8x8xf32>
    %171 = vector.shape_cast %170 : vector<1x8x8xf32> to vector<8x8xf32>
    %172 = arith.truncf %171 : vector<8x8xf32> to vector<8x8xbf16>
    %c3_103 = arith.constant 3 : index
    %c0_104 = arith.constant 0 : index
    %c0_105 = arith.constant 0 : index
    %173 = vector.load %arg6[%c3_103, %c0_104, %c0_105] : memref<4x8x8xbf16, #tpu.memory_space<vmem>>, vector<1x8x8xbf16>
    %174 = vector.shape_cast %173 : vector<1x8x8xbf16> to vector<8x8xbf16>
    %cst_106 = arith.constant dense<0.000000e+00> : vector<8x8xf32>
    %175 = tpu.matmul %169, %174, %cst_106 {dimension_numbers = #tpu.dot_dimension_numbers<[1], [0], [0], [1], [0, 0, 1, 1], [], []>} : vector<8x8xbf16>, vector<8x8xbf16>, vector<8x8xf32> -> vector<8x8xf32>
    %c3_107 = arith.constant 3 : index
    %c0_108 = arith.constant 0 : index
    %c0_109 = arith.constant 0 : index
    %176 = vector.load %arg7[%c3_107, %c0_108, %c0_109] : memref<4x8x8xbf16, #tpu.memory_space<vmem>>, vector<1x8x8xbf16>
    %177 = vector.shape_cast %176 : vector<1x8x8xbf16> to vector<8x8xbf16>
    %cst_110 = arith.constant dense<0.000000e+00> : vector<8x8xf32>
    %178 = tpu.matmul %172, %177, %cst_110 {dimension_numbers = #tpu.dot_dimension_numbers<[1], [0], [0], [1], [0, 0, 1, 1], [], []>} : vector<8x8xbf16>, vector<8x8xbf16>, vector<8x8xf32> -> vector<8x8xf32>
    %c3_111 = arith.constant 3 : index
    %c0_112 = arith.constant 0 : index
    %c0_113 = arith.constant 0 : index
    %179 = vector.load %arg8[%c3_111, %c0_112, %c0_113] : memref<4x8x8xbf16, #tpu.memory_space<vmem>>, vector<1x8x8xbf16>
    %180 = vector.shape_cast %179 : vector<1x8x8xbf16> to vector<8x8xbf16>
    %cst_114 = arith.constant dense<0.000000e+00> : vector<8x8xf32>
    %181 = tpu.matmul %172, %180, %cst_114 {dimension_numbers = #tpu.dot_dimension_numbers<[1], [0], [0], [1], [0, 0, 1, 1], [], []>} : vector<8x8xbf16>, vector<8x8xbf16>, vector<8x8xf32> -> vector<8x8xf32>
    %182 = arith.mulf %175, %165 : vector<8x8xf32>
    %183 = arith.mulf %175, %166 : vector<8x8xf32>
    %184 = arith.mulf %178, %165 : vector<8x8xf32>
    %cst_115 = arith.constant 0.000000e+00 : f32
    %185 = vector.broadcast %cst_115 : f32 to vector<8x8xf32>
    %186 = arith.subf %185, %178 : vector<8x8xf32>
    %187 = arith.mulf %186, %166 : vector<8x8xf32>
    %188 = arith.truncf %184 : vector<8x8xf32> to vector<8x8xbf16>
    %189 = arith.index_cast %1 : i32 to index
    %c24_116 = arith.constant 24 : index
    %190 = vector.load %arg11[%189, %c24_116] : memref<8x32xbf16, #tpu.memory_space<vmem>>, vector<8x8xbf16>
    tpu.vector_store %arg11[%189, %c24_116], %188 {strides = array<i32>} : memref<8x32xbf16, #tpu.memory_space<vmem>>, vector<8x8xbf16>,
    %191 = arith.truncf %187 : vector<8x8xf32> to vector<8x8xbf16>
    %192 = arith.index_cast %1 : i32 to index
    %c24_117 = arith.constant 24 : index
    %193 = vector.load %arg12[%192, %c24_117] : memref<8x32xbf16, #tpu.memory_space<vmem>>, vector<8x8xbf16>
    tpu.vector_store %arg12[%192, %c24_117], %191 {strides = array<i32>} : memref<8x32xbf16, #tpu.memory_space<vmem>>, vector<8x8xbf16>,
    %194 = arith.truncf %181 : vector<8x8xf32> to vector<8x8xbf16>
    %195 = arith.index_cast %1 : i32 to index
    %c24_118 = arith.constant 24 : index
    %196 = vector.load %arg13[%195, %c24_118] : memref<8x32xbf16, #tpu.memory_space<vmem>>, vector<8x8xbf16>
    tpu.vector_store %arg13[%195, %c24_118], %194 {strides = array<i32>} : memref<8x32xbf16, #tpu.memory_space<vmem>>, vector<8x8xbf16>,
    %197 = arith.truncf %182 : vector<8x8xf32> to vector<8x8xbf16>
    %198 = arith.truncf %183 : vector<8x8xf32> to vector<8x8xbf16>
    %199 = arith.addf %182, %183 : vector<8x8xf32>
    %200 = arith.truncf %199 : vector<8x8xf32> to vector<8x8xbf16>
    %cst_119 = arith.constant 0.000000e+00 : f32
    %201 = vector.broadcast %cst_119 : f32 to vector<8x8xf32>
    %cst_120 = arith.constant 0.000000e+00 : f32
    %202 = vector.broadcast %cst_120 : f32 to vector<8x8xf32>
    %c1_i32_121 = arith.constant 1 : i32
    %203 = arith.addi %arg1, %c1_i32_121 : i32
    %c0_i32_122 = arith.constant 0 : i32
    %204 = arith.subi %203, %c0_i32_122 : i32
    %205 = arith.addi %c0_i32_122, %204 : i32
    %c1_i32_123 = arith.constant 1 : i32
    %206:2 = scf.for %arg14 = %c0_i32_122 to %205 step %c1_i32_123 iter_args(%arg15 = %201, %arg16 = %202) -> (vector<8x8xf32>, vector<8x8xf32>)  : i32 {
      %c8_i32_130 = arith.constant 8 : i32
      %213 = arith.muli %arg14, %c8_i32_130 : i32
      %214 = tpu.assume_multiple %213, 8 : i32
      %215 = arith.index_cast %214 : i32 to index
      %c24_131 = arith.constant 24 : index
      %216 = vector.load %arg11[%215, %c24_131] : memref<8x32xbf16, #tpu.memory_space<vmem>>, vector<8x8xbf16>
      %217 = arith.index_cast %214 : i32 to index
      %c24_132 = arith.constant 24 : index
      %218 = vector.load %arg12[%217, %c24_132] : memref<8x32xbf16, #tpu.memory_space<vmem>>, vector<8x8xbf16>
      %219 = arith.index_cast %214 : i32 to index
      %c24_133 = arith.constant 24 : index
      %220 = vector.load %arg13[%219, %c24_133] : memref<8x32xbf16, #tpu.memory_space<vmem>>, vector<8x8xbf16>
      %cst_134 = arith.constant dense<0.000000e+00> : vector<8x8xf32>
      %221 = tpu.matmul %197, %216, %cst_134 {dimension_numbers = #tpu.dot_dimension_numbers<[1], [1], [0], [0], [0, 0, 1, 0], [], []>} : vector<8x8xbf16>, vector<8x8xbf16>, vector<8x8xf32> -> vector<8x8xf32>
      %cst_135 = arith.constant dense<0.000000e+00> : vector<8x8xf32>
      %222 = tpu.matmul %198, %218, %cst_135 {dimension_numbers = #tpu.dot_dimension_numbers<[1], [1], [0], [0], [0, 0, 1, 0], [], []>} : vector<8x8xbf16>, vector<8x8xbf16>, vector<8x8xf32> -> vector<8x8xf32>
      %223 = arith.addf %216, %218 : vector<8x8xbf16>
      %cst_136 = arith.constant dense<0.000000e+00> : vector<8x8xf32>
      %224 = tpu.matmul %200, %223, %cst_136 {dimension_numbers = #tpu.dot_dimension_numbers<[1], [1], [0], [0], [0, 0, 1, 0], [], []>} : vector<8x8xbf16>, vector<8x8xbf16>, vector<8x8xf32> -> vector<8x8xf32>
      %225 = arith.subf %221, %222 : vector<8x8xf32>
      %226 = arith.subf %224, %221 : vector<8x8xf32>
      %227 = arith.subf %226, %222 : vector<8x8xf32>
      %228 = arith.subi %arg1, %arg14 : i32
      %c8_i32_137 = arith.constant 8 : i32
      %229 = arith.muli %228, %c8_i32_137 : i32
      %230 = vector.broadcast %229 : i32 to vector<8x8xi32>
      %231 = arith.addi %230, %15 : vector<8x8xi32>
      %232 = arith.subi %231, %16 : vector<8x8xi32>
      %233 = arith.sitofp %232 : vector<8x8xi32> to vector<8x8xf32>
      %cst_138 = arith.constant 0.000000e+00 : f32
      %234 = vector.broadcast %cst_138 : f32 to vector<8x8xf32>
      %235 = arith.cmpf oge, %233, %234 : vector<8x8xf32>
      %cst_139 = arith.constant 0.000000e+00 : f32
      %236 = vector.broadcast %cst_139 : f32 to vector<8x8xf32>
      %237 = arith.maximumf %233, %236 : vector<8x8xf32>
      %238 = vector.broadcast %164 : f32 to vector<8x8xf32>
      %239 = arith.mulf %238, %237 : vector<8x8xf32>
      %240 = math.exp %239 : vector<8x8xf32>
      %cst_140 = arith.constant 0.000000e+00 : f32
      %241 = vector.broadcast %cst_140 : f32 to vector<8x8xf32>
      %242 = arith.select %235, %240, %241 : vector<8x8xi1>, vector<8x8xf32>
      %243 = arith.mulf %225, %242 : vector<8x8xf32>
      %244 = arith.truncf %243 : vector<8x8xf32> to vector<8x8xbf16>
      %cst_141 = arith.constant dense<0.000000e+00> : vector<8x8xf32>
      %245 = tpu.matmul %244, %220, %cst_141 {dimension_numbers = #tpu.dot_dimension_numbers<[1], [0], [0], [1], [0, 0, 1, 1], [], []>} : vector<8x8xbf16>, vector<8x8xbf16>, vector<8x8xf32> -> vector<8x8xf32>
      %246 = arith.addf %arg15, %245 : vector<8x8xf32>
      %247 = arith.mulf %227, %242 : vector<8x8xf32>
      %248 = arith.truncf %247 : vector<8x8xf32> to vector<8x8xbf16>
      %cst_142 = arith.constant dense<0.000000e+00> : vector<8x8xf32>
      %249 = tpu.matmul %248, %220, %cst_142 {dimension_numbers = #tpu.dot_dimension_numbers<[1], [0], [0], [1], [0, 0, 1, 1], [], []>} : vector<8x8xbf16>, vector<8x8xbf16>, vector<8x8xf32> -> vector<8x8xf32>
      %250 = arith.addf %arg16, %249 : vector<8x8xf32>
      scf.yield %246, %250 : vector<8x8xf32>, vector<8x8xf32>
    }
    %c0_124 = arith.constant 0 : index
    %c0_125 = arith.constant 0 : index
    %c24_126 = arith.constant 24 : index
    %207 = vector.load %arg9[%c0_124, %c0_125, %c24_126] : memref<1x8x32xf32, #tpu.memory_space<vmem>>, vector<1x8x8xf32>
    %208 = vector.shape_cast %207 : vector<1x8x8xf32> to vector<8x8xf32>
    %209 = vector.shape_cast %206#0 : vector<8x8xf32> to vector<1x8x8xf32>
    tpu.vector_store %arg9[%c0_124, %c0_125, %c24_126], %209 {strides = array<i32>} : memref<1x8x32xf32, #tpu.memory_space<vmem>>, vector<1x8x8xf32>,
    %c0_127 = arith.constant 0 : index
    %c0_128 = arith.constant 0 : index
    %c24_129 = arith.constant 24 : index
    %210 = vector.load %arg10[%c0_127, %c0_128, %c24_129] : memref<1x8x32xf32, #tpu.memory_space<vmem>>, vector<1x8x8xf32>
    %211 = vector.shape_cast %210 : vector<1x8x8xf32> to vector<8x8xf32>
    %212 = vector.shape_cast %206#1 : vector<8x8xf32> to vector<1x8x8xf32>
    tpu.vector_store %arg10[%c0_127, %c0_128, %c24_129], %212 {strides = array<i32>} : memref<1x8x32xf32, #tpu.memory_space<vmem>>, vector<1x8x8xf32>,
    return
  }
  func.func @transform_0(%arg0: i32, %arg1: i32, %arg2: memref<4xf32, #tpu.memory_space<smem>>) -> (i32, i32, i32) {
    %c0_i32 = arith.constant 0 : i32
    %c0_i32_0 = arith.constant 0 : i32
    return %arg0, %arg1, %c0_i32 : i32, i32, i32
  }
  func.func @transform_1(%arg0: i32, %arg1: i32, %arg2: memref<4xf32, #tpu.memory_space<smem>>) -> (i32, i32, i32) {
    %c0_i32 = arith.constant 0 : i32
    %c0_i32_0 = arith.constant 0 : i32
    return %arg0, %arg1, %c0_i32 : i32, i32, i32
  }
  func.func @transform_2(%arg0: i32, %arg1: i32, %arg2: memref<4xf32, #tpu.memory_space<smem>>) -> (i32, i32) {
    %c0_i32 = arith.constant 0 : i32
    %c0_i32_0 = arith.constant 0 : i32
    %c0_i32_1 = arith.constant 0 : i32
    return %c0_i32, %c0_i32_0 : i32, i32
  }
  func.func @transform_3(%arg0: i32, %arg1: i32, %arg2: memref<4xf32, #tpu.memory_space<smem>>) -> (i32, i32, i32) {
    %c0_i32 = arith.constant 0 : i32
    %c0_i32_0 = arith.constant 0 : i32
    %c0_i32_1 = arith.constant 0 : i32
    %c0_i32_2 = arith.constant 0 : i32
    return %c0_i32, %c0_i32_0, %c0_i32_1 : i32, i32, i32
  }
  func.func @transform_4(%arg0: i32, %arg1: i32, %arg2: memref<4xf32, #tpu.memory_space<smem>>) -> (i32, i32, i32) {
    %c0_i32 = arith.constant 0 : i32
    %c0_i32_0 = arith.constant 0 : i32
    %c0_i32_1 = arith.constant 0 : i32
    %c0_i32_2 = arith.constant 0 : i32
    return %c0_i32, %c0_i32_0, %c0_i32_1 : i32, i32, i32
  }
  func.func @transform_5(%arg0: i32, %arg1: i32, %arg2: memref<4xf32, #tpu.memory_space<smem>>) -> (i32, i32, i32) {
    %c0_i32 = arith.constant 0 : i32
    %c0_i32_0 = arith.constant 0 : i32
    %c0_i32_1 = arith.constant 0 : i32
    %c0_i32_2 = arith.constant 0 : i32
    return %c0_i32, %c0_i32_0, %c0_i32_1 : i32, i32, i32
  }
  func.func @transform_6(%arg0: i32, %arg1: i32, %arg2: memref<4xf32, #tpu.memory_space<smem>>) -> (i32, i32, i32) {
    %c0_i32 = arith.constant 0 : i32
    %c0_i32_0 = arith.constant 0 : i32
    return %arg0, %arg1, %c0_i32 : i32, i32, i32
  }
  func.func @transform_7(%arg0: i32, %arg1: i32, %arg2: memref<4xf32, #tpu.memory_space<smem>>) -> (i32, i32, i32) {
    %c0_i32 = arith.constant 0 : i32
    %c0_i32_0 = arith.constant 0 : i32
    return %arg0, %arg1, %c0_i32 : i32, i32, i32
  }
}

module attributes {stable_mosaic.version = 11 : i64} {
  func.func @_retention_kernel(%arg0: i32, %arg1: i32, %arg2: memref<4xf32, #tpu.memory_space<smem>>, %arg3: memref<1x8x32xf32, #tpu.memory_space<vmem>>, %arg4: memref<1x8x32xf32, #tpu.memory_space<vmem>>, %arg5: memref<1x32xf32, #tpu.memory_space<vmem>>, %arg6: memref<4x8x8xbf16, #tpu.memory_space<vmem>>, %arg7: memref<4x8x8xbf16, #tpu.memory_space<vmem>>, %arg8: memref<4x8x8xbf16, #tpu.memory_space<vmem>>, %arg9: memref<1x8x32xf32, #tpu.memory_space<vmem>>, %arg10: memref<1x8x32xf32, #tpu.memory_space<vmem>>, %arg11: memref<8x32xbf16, #tpu.memory_space<vmem>>, %arg12: memref<8x32xbf16, #tpu.memory_space<vmem>>, %arg13: memref<8x32xbf16, #tpu.memory_space<vmem>>) attributes {dimension_semantics = [#tpu.dimension_semantics<parallel>, #tpu.dimension_semantics<arbitrary>], iteration_bounds = array<i64: 2, 1>, scalar_prefetch = 1 : i64, scratch_operands = 3 : i64, tpu.core_type = #tpu.core_type<tc>, window_params = [{transform_indices = @transform_0, window_bounds = array<i64: 1, 8, 32>}, {transform_indices = @transform_1, window_bounds = array<i64: 1, 8, 32>}, {pipeline_mode = #tpu.pipeline_mode<synchronous>, transform_indices = @transform_2, window_bounds = array<i64: 1, 32>}, {pipeline_mode = #tpu.pipeline_mode<synchronous>, transform_indices = @transform_3, window_bounds = array<i64: 4, 8, 8>}, {pipeline_mode = #tpu.pipeline_mode<synchronous>, transform_indices = @transform_4, window_bounds = array<i64: 4, 8, 8>}, {pipeline_mode = #tpu.pipeline_mode<synchronous>, transform_indices = @transform_5, window_bounds = array<i64: 4, 8, 8>}, {transform_indices = @transform_6, window_bounds = array<i64: 1, 8, 32>}, {transform_indices = @transform_7, window_bounds = array<i64: 1, 8, 32>}]} {
    %c8_i32 = arith.constant 8 : i32
    %0 = arith.muli %arg1, %c8_i32 : i32
    %1 = tpu.assume_multiple %0, 8 : i32
    %2 = tpu.iota {dimensions = array<i32: 0>} : vector<8x1xi32>
    %c8_i32_0 = arith.constant 8 : i32
    %3 = arith.muli %arg1, %c8_i32_0 : i32
    %4 = vector.broadcast %3 : i32 to vector<8x1xi32>
    %5 = arith.addi %2, %4 : vector<8x1xi32>
    %c1_i32 = arith.constant 1 : i32
    %6 = vector.broadcast %c1_i32 : i32 to vector<8x1xi32>
    %7 = arith.addi %5, %6 : vector<8x1xi32>
    %8 = arith.sitofp %7 : vector<8x1xi32> to vector<8x1xf32>
    %c0 = arith.constant 0 : index
    %c0_1 = arith.constant 0 : index
    %9 = vector.load %arg5[%c0, %c0_1] : memref<1x32xf32, #tpu.memory_space<vmem>>, vector<1x32xf32>
    %10 = vector.broadcast %8 : vector<8x1xf32> to vector<8x32xf32>
    %11 = vector.broadcast %9 : vector<1x32xf32> to vector<8x32xf32>
    %12 = arith.mulf %10, %11 : vector<8x32xf32>
    %13 = math.cos %12 : vector<8x32xf32>
    %14 = math.sin %12 : vector<8x32xf32>
    %15 = tpu.iota {dimensions = array<i32: 0>} : vector<8x8xi32>
    %16 = tpu.iota {dimensions = array<i32: 1>} : vector<8x8xi32>
    %c0_2 = arith.constant 0 : index
    %17 = memref.load %arg2[%c0_2] : memref<4xf32, #tpu.memory_space<smem>>
    %18 = vector.extract_strided_slice %13 {offsets = [0, 0], sizes = [8, 8], strides = [1, 1]} : vector<8x32xf32> to vector<8x8xf32>
    %19 = vector.extract_strided_slice %14 {offsets = [0, 0], sizes = [8, 8], strides = [1, 1]} : vector<8x32xf32> to vector<8x8xf32>
    %c0_3 = arith.constant 0 : index
    %c0_4 = arith.constant 0 : index
    %c0_5 = arith.constant 0 : index
    %20 = vector.load %arg3[%c0_3, %c0_4, %c0_5] : memref<1x8x32xf32, #tpu.memory_space<vmem>>, vector<1x8x8xf32>
    %21 = vector.shape_cast %20 : vector<1x8x8xf32> to vector<8x8xf32>
    %22 = arith.truncf %21 : vector<8x8xf32> to vector<8x8xbf16>
    %c0_6 = arith.constant 0 : index
    %c0_7 = arith.constant 0 : index
    %c0_8 = arith.constant 0 : index
    %23 = vector.load %arg4[%c0_6, %c0_7, %c0_8] : memref<1x8x32xf32, #tpu.memory_space<vmem>>, vector<1x8x8xf32>
    %24 = vector.shape_cast %23 : vector<1x8x8xf32> to vector<8x8xf32>
    %25 = arith.truncf %24 : vector<8x8xf32> to vector<8x8xbf16>
    %c0_9 = arith.constant 0 : index
    %c0_10 = arith.constant 0 : index
    %c0_11 = arith.constant 0 : index
    %26 = vector.load %arg6[%c0_9, %c0_10, %c0_11] : memref<4x8x8xbf16, #tpu.memory_space<vmem>>, vector<1x8x8xbf16>
    %27 = vector.shape_cast %26 : vector<1x8x8xbf16> to vector<8x8xbf16>
    %cst = arith.constant dense<0.000000e+00> : vector<8x8xf32>
    %28 = tpu.matmul %22, %27, %cst {dimension_numbers = #tpu.dot_dimension_numbers<[1], [0], [0], [1], [0, 0, 1, 1], [], []>} : vector<8x8xbf16>, vector<8x8xbf16>, vector<8x8xf32> -> vector<8x8xf32>
    %c0_12 = arith.constant 0 : index
    %c0_13 = arith.constant 0 : index
    %c0_14 = arith.constant 0 : index
    %29 = vector.load %arg7[%c0_12, %c0_13, %c0_14] : memref<4x8x8xbf16, #tpu.memory_space<vmem>>, vector<1x8x8xbf16>
    %30 = vector.shape_cast %29 : vector<1x8x8xbf16> to vector<8x8xbf16>
    %cst_15 = arith.constant dense<0.000000e+00> : vector<8x8xf32>
    %31 = tpu.matmul %25, %30, %cst_15 {dimension_numbers = #tpu.dot_dimension_numbers<[1], [0], [0], [1], [0, 0, 1, 1], [], []>} : vector<8x8xbf16>, vector<8x8xbf16>, vector<8x8xf32> -> vector<8x8xf32>
    %c0_16 = arith.constant 0 : index
    %c0_17 = arith.constant 0 : index
    %c0_18 = arith.constant 0 : index
    %32 = vector.load %arg8[%c0_16, %c0_17, %c0_18] : memref<4x8x8xbf16, #tpu.memory_space<vmem>>, vector<1x8x8xbf16>
    %33 = vector.shape_cast %32 : vector<1x8x8xbf16> to vector<8x8xbf16>
    %cst_19 = arith.constant dense<0.000000e+00> : vector<8x8xf32>
    %34 = tpu.matmul %25, %33, %cst_19 {dimension_numbers = #tpu.dot_dimension_numbers<[1], [0], [0], [1], [0, 0, 1, 1], [], []>} : vector<8x8xbf16>, vector<8x8xbf16>, vector<8x8xf32> -> vector<8x8xf32>
    %35 = arith.mulf %28, %18 : vector<8x8xf32>
    %36 = arith.mulf %28, %19 : vector<8x8xf32>
    %37 = arith.mulf %31, %18 : vector<8x8xf32>
    %cst_20 = arith.constant 0.000000e+00 : f32
    %38 = vector.broadcast %cst_20 : f32 to vector<8x8xf32>
    %39 = arith.subf %38, %31 : vector<8x8xf32>
    %40 = arith.mulf %39, %19 : vector<8x8xf32>
    %41 = arith.truncf %37 : vector<8x8xf32> to vector<8x8xbf16>
    %42 = arith.index_cast %1 : i32 to index
    %c0_21 = arith.constant 0 : index
    %43 = vector.load %arg11[%42, %c0_21] : memref<8x32xbf16, #tpu.memory_space<vmem>>, vector<8x8xbf16>
    tpu.vector_store %arg11[%42, %c0_21], %41 {strides = array<i32>} : memref<8x32xbf16, #tpu.memory_space<vmem>>, vector<8x8xbf16>,
    %44 = arith.truncf %40 : vector<8x8xf32> to vector<8x8xbf16>
    %45 = arith.index_cast %1 : i32 to index
    %c0_22 = arith.constant 0 : index
    %46 = vector.load %arg12[%45, %c0_22] : memref<8x32xbf16, #tpu.memory_space<vmem>>, vector<8x8xbf16>
    tpu.vector_store %arg12[%45, %c0_22], %44 {strides = array<i32>} : memref<8x32xbf16, #tpu.memory_space<vmem>>, vector<8x8xbf16>,
    %47 = arith.truncf %34 : vector<8x8xf32> to vector<8x8xbf16>
    %48 = arith.index_cast %1 : i32 to index
    %c0_23 = arith.constant 0 : index
    %49 = vector.load %arg13[%48, %c0_23] : memref<8x32xbf16, #tpu.memory_space<vmem>>, vector<8x8xbf16>
    tpu.vector_store %arg13[%48, %c0_23], %47 {strides = array<i32>} : memref<8x32xbf16, #tpu.memory_space<vmem>>, vector<8x8xbf16>,
    %50 = arith.truncf %35 : vector<8x8xf32> to vector<8x8xbf16>
    %51 = arith.truncf %36 : vector<8x8xf32> to vector<8x8xbf16>
    %52 = arith.addf %35, %36 : vector<8x8xf32>
    %53 = arith.truncf %52 : vector<8x8xf32> to vector<8x8xbf16>
    %cst_24 = arith.constant 0.000000e+00 : f32
    %54 = vector.broadcast %cst_24 : f32 to vector<8x8xf32>
    %cst_25 = arith.constant 0.000000e+00 : f32
    %55 = vector.broadcast %cst_25 : f32 to vector<8x8xf32>
    %c1_i32_26 = arith.constant 1 : i32
    %56 = arith.addi %arg1, %c1_i32_26 : i32
    %c0_i32 = arith.constant 0 : i32
    %57 = arith.subi %56, %c0_i32 : i32
    %58 = arith.addi %c0_i32, %57 : i32
    %c1_i32_27 = arith.constant 1 : i32
    %59:2 = scf.for %arg14 = %c0_i32 to %58 step %c1_i32_27 iter_args(%arg15 = %54, %arg16 = %55) -> (vector<8x8xf32>, vector<8x8xf32>)  : i32 {
      %c8_i32_130 = arith.constant 8 : i32
      %213 = arith.muli %arg14, %c8_i32_130 : i32
      %214 = tpu.assume_multiple %213, 8 : i32
      %215 = arith.index_cast %214 : i32 to index
      %c0_131 = arith.constant 0 : index
      %216 = vector.load %arg11[%215, %c0_131] : memref<8x32xbf16, #tpu.memory_space<vmem>>, vector<8x8xbf16>
      %217 = arith.index_cast %214 : i32 to index
      %c0_132 = arith.constant 0 : index
      %218 = vector.load %arg12[%217, %c0_132] : memref<8x32xbf16, #tpu.memory_space<vmem>>, vector<8x8xbf16>
      %219 = arith.index_cast %214 : i32 to index
      %c0_133 = arith.constant 0 : index
      %220 = vector.load %arg13[%219, %c0_133] : memref<8x32xbf16, #tpu.memory_space<vmem>>, vector<8x8xbf16>
      %cst_134 = arith.constant dense<0.000000e+00> : vector<8x8xf32>
      %221 = tpu.matmul %50, %216, %cst_134 {dimension_numbers = #tpu.dot_dimension_numbers<[1], [1], [0], [0], [0, 0, 1, 0], [], []>} : vector<8x8xbf16>, vector<8x8xbf16>, vector<8x8xf32> -> vector<8x8xf32>
      %cst_135 = arith.constant dense<0.000000e+00> : vector<8x8xf32>
      %222 = tpu.matmul %51, %218, %cst_135 {dimension_numbers = #tpu.dot_dimension_numbers<[1], [1], [0], [0], [0, 0, 1, 0], [], []>} : vector<8x8xbf16>, vector<8x8xbf16>, vector<8x8xf32> -> vector<8x8xf32>
      %223 = arith.addf %216, %218 : vector<8x8xbf16>
      %cst_136 = arith.constant dense<0.000000e+00> : vector<8x8xf32>
      %224 = tpu.matmul %53, %223, %cst_136 {dimension_numbers = #tpu.dot_dimension_numbers<[1], [1], [0], [0], [0, 0, 1, 0], [], []>} : vector<8x8xbf16>, vector<8x8xbf16>, vector<8x8xf32> -> vector<8x8xf32>
      %225 = arith.subf %221, %222 : vector<8x8xf32>
      %226 = arith.subf %224, %221 : vector<8x8xf32>
      %227 = arith.subf %226, %222 : vector<8x8xf32>
      %228 = arith.subi %arg1, %arg14 : i32
      %c8_i32_137 = arith.constant 8 : i32
      %229 = arith.muli %228, %c8_i32_137 : i32
      %230 = vector.broadcast %229 : i32 to vector<8x8xi32>
      %231 = arith.addi %230, %15 : vector<8x8xi32>
      %232 = arith.subi %231, %16 : vector<8x8xi32>
      %233 = arith.sitofp %232 : vector<8x8xi32> to vector<8x8xf32>
      %cst_138 = arith.constant 0.000000e+00 : f32
      %234 = vector.broadcast %cst_138 : f32 to vector<8x8xf32>
      %235 = arith.cmpf oge, %233, %234 : vector<8x8xf32>
      %cst_139 = arith.constant 0.000000e+00 : f32
      %236 = vector.broadcast %cst_139 : f32 to vector<8x8xf32>
      %237 = arith.maximumf %233, %236 : vector<8x8xf32>
      %238 = vector.broadcast %17 : f32 to vector<8x8xf32>
      %239 = arith.mulf %238, %237 : vector<8x8xf32>
      %240 = math.exp %239 : vector<8x8xf32>
      %cst_140 = arith.constant 0.000000e+00 : f32
      %241 = vector.broadcast %cst_140 : f32 to vector<8x8xf32>
      %242 = arith.select %235, %240, %241 : vector<8x8xi1>, vector<8x8xf32>
      %243 = arith.mulf %225, %242 : vector<8x8xf32>
      %244 = arith.truncf %243 : vector<8x8xf32> to vector<8x8xbf16>
      %cst_141 = arith.constant dense<0.000000e+00> : vector<8x8xf32>
      %245 = tpu.matmul %244, %220, %cst_141 {dimension_numbers = #tpu.dot_dimension_numbers<[1], [0], [0], [1], [0, 0, 1, 1], [], []>} : vector<8x8xbf16>, vector<8x8xbf16>, vector<8x8xf32> -> vector<8x8xf32>
      %246 = arith.addf %arg15, %245 : vector<8x8xf32>
      %247 = arith.mulf %227, %242 : vector<8x8xf32>
      %248 = arith.truncf %247 : vector<8x8xf32> to vector<8x8xbf16>
      %cst_142 = arith.constant dense<0.000000e+00> : vector<8x8xf32>
      %249 = tpu.matmul %248, %220, %cst_142 {dimension_numbers = #tpu.dot_dimension_numbers<[1], [0], [0], [1], [0, 0, 1, 1], [], []>} : vector<8x8xbf16>, vector<8x8xbf16>, vector<8x8xf32> -> vector<8x8xf32>
      %250 = arith.addf %arg16, %249 : vector<8x8xf32>
      scf.yield %246, %250 : vector<8x8xf32>, vector<8x8xf32>
    }
    %c0_28 = arith.constant 0 : index
    %c0_29 = arith.constant 0 : index
    %c0_30 = arith.constant 0 : index
    %60 = vector.load %arg9[%c0_28, %c0_29, %c0_30] : memref<1x8x32xf32, #tpu.memory_space<vmem>>, vector<1x8x8xf32>
    %61 = vector.shape_cast %60 : vector<1x8x8xf32> to vector<8x8xf32>
    %62 = vector.shape_cast %59#0 : vector<8x8xf32> to vector<1x8x8xf32>
    tpu.vector_store %arg9[%c0_28, %c0_29, %c0_30], %62 {strides = array<i32>} : memref<1x8x32xf32, #tpu.memory_space<vmem>>, vector<1x8x8xf32>,
    %c0_31 = arith.constant 0 : index
    %c0_32 = arith.constant 0 : index
    %c0_33 = arith.constant 0 : index
    %63 = vector.load %arg10[%c0_31, %c0_32, %c0_33] : memref<1x8x32xf32, #tpu.memory_space<vmem>>, vector<1x8x8xf32>
    %64 = vector.shape_cast %63 : vector<1x8x8xf32> to vector<8x8xf32>
    %65 = vector.shape_cast %59#1 : vector<8x8xf32> to vector<1x8x8xf32>
    tpu.vector_store %arg10[%c0_31, %c0_32, %c0_33], %65 {strides = array<i32>} : memref<1x8x32xf32, #tpu.memory_space<vmem>>, vector<1x8x8xf32>,
    %c1 = arith.constant 1 : index
    %66 = memref.load %arg2[%c1] : memref<4xf32, #tpu.memory_space<smem>>
    %67 = vector.extract_strided_slice %13 {offsets = [0, 8], sizes = [8, 8], strides = [1, 1]} : vector<8x32xf32> to vector<8x8xf32>
    %68 = vector.extract_strided_slice %14 {offsets = [0, 8], sizes = [8, 8], strides = [1, 1]} : vector<8x32xf32> to vector<8x8xf32>
    %c0_34 = arith.constant 0 : index
    %c0_35 = arith.constant 0 : index
    %c8 = arith.constant 8 : index
    %69 = vector.load %arg3[%c0_34, %c0_35, %c8] : memref<1x8x32xf32, #tpu.memory_space<vmem>>, vector<1x8x8xf32>
    %70 = vector.shape_cast %69 : vector<1x8x8xf32> to vector<8x8xf32>
    %71 = arith.truncf %70 : vector<8x8xf32> to vector<8x8xbf16>
    %c0_36 = arith.constant 0 : index
    %c0_37 = arith.constant 0 : index
    %c8_38 = arith.constant 8 : index
    %72 = vector.load %arg4[%c0_36, %c0_37, %c8_38] : memref<1x8x32xf32, #tpu.memory_space<vmem>>, vector<1x8x8xf32>
    %73 = vector.shape_cast %72 : vector<1x8x8xf32> to vector<8x8xf32>
    %74 = arith.truncf %73 : vector<8x8xf32> to vector<8x8xbf16>
    %c1_39 = arith.constant 1 : index
    %c0_40 = arith.constant 0 : index
    %c0_41 = arith.constant 0 : index
    %75 = vector.load %arg6[%c1_39, %c0_40, %c0_41] : memref<4x8x8xbf16, #tpu.memory_space<vmem>>, vector<1x8x8xbf16>
    %76 = vector.shape_cast %75 : vector<1x8x8xbf16> to vector<8x8xbf16>
    %cst_42 = arith.constant dense<0.000000e+00> : vector<8x8xf32>
    %77 = tpu.matmul %71, %76, %cst_42 {dimension_numbers = #tpu.dot_dimension_numbers<[1], [0], [0], [1], [0, 0, 1, 1], [], []>} : vector<8x8xbf16>, vector<8x8xbf16>, vector<8x8xf32> -> vector<8x8xf32>
    %c1_43 = arith.constant 1 : index
    %c0_44 = arith.constant 0 : index
    %c0_45 = arith.constant 0 : index
    %78 = vector.load %arg7[%c1_43, %c0_44, %c0_45] : memref<4x8x8xbf16, #tpu.memory_space<vmem>>, vector<1x8x8xbf16>
    %79 = vector.shape_cast %78 : vector<1x8x8xbf16> to vector<8x8xbf16>
    %cst_46 = arith.constant dense<0.000000e+00> : vector<8x8xf32>
    %80 = tpu.matmul %74, %79, %cst_46 {dimension_numbers = #tpu.dot_dimension_numbers<[1], [0], [0], [1], [0, 0, 1, 1], [], []>} : vector<8x8xbf16>, vector<8x8xbf16>, vector<8x8xf32> -> vector<8x8xf32>
    %c1_47 = arith.constant 1 : index
    %c0_48 = arith.constant 0 : index
    %c0_49 = arith.constant 0 : index
    %81 = vector.load %arg8[%c1_47, %c0_48, %c0_49] : memref<4x8x8xbf16, #tpu.memory_space<vmem>>, vector<1x8x8xbf16>
    %82 = vector.shape_cast %81 : vector<1x8x8xbf16> to vector<8x8xbf16>
    %cst_50 = arith.constant dense<0.000000e+00> : vector<8x8xf32>
    %83 = tpu.matmul %74, %82, %cst_50 {dimension_numbers = #tpu.dot_dimension_numbers<[1], [0], [0], [1], [0, 0, 1, 1], [], []>} : vector<8x8xbf16>, vector<8x8xbf16>, vector<8x8xf32> -> vector<8x8xf32>
    %84 = arith.mulf %77, %67 : vector<8x8xf32>
    %85 = arith.mulf %77, %68 : vector<8x8xf32>
    %86 = arith.mulf %80, %67 : vector<8x8xf32>
    %cst_51 = arith.constant 0.000000e+00 : f32
    %87 = vector.broadcast %cst_51 : f32 to vector<8x8xf32>
    %88 = arith.subf %87, %80 : vector<8x8xf32>
    %89 = arith.mulf %88, %68 : vector<8x8xf32>
    %90 = arith.truncf %86 : vector<8x8xf32> to vector<8x8xbf16>
    %91 = arith.index_cast %1 : i32 to index
    %c8_52 = arith.constant 8 : index
    %92 = vector.load %arg11[%91, %c8_52] : memref<8x32xbf16, #tpu.memory_space<vmem>>, vector<8x8xbf16>
    tpu.vector_store %arg11[%91, %c8_52], %90 {strides = array<i32>} : memref<8x32xbf16, #tpu.memory_space<vmem>>, vector<8x8xbf16>,
    %93 = arith.truncf %89 : vector<8x8xf32> to vector<8x8xbf16>
    %94 = arith.index_cast %1 : i32 to index
    %c8_53 = arith.constant 8 : index
    %95 = vector.load %arg12[%94, %c8_53] : memref<8x32xbf16, #tpu.memory_space<vmem>>, vector<8x8xbf16>
    tpu.vector_store %arg12[%94, %c8_53], %93 {strides = array<i32>} : memref<8x32xbf16, #tpu.memory_space<vmem>>, vector<8x8xbf16>,
    %96 = arith.truncf %83 : vector<8x8xf32> to vector<8x8xbf16>
    %97 = arith.index_cast %1 : i32 to index
    %c8_54 = arith.constant 8 : index
    %98 = vector.load %arg13[%97, %c8_54] : memref<8x32xbf16, #tpu.memory_space<vmem>>, vector<8x8xbf16>
    tpu.vector_store %arg13[%97, %c8_54], %96 {strides = array<i32>} : memref<8x32xbf16, #tpu.memory_space<vmem>>, vector<8x8xbf16>,
    %99 = arith.truncf %84 : vector<8x8xf32> to vector<8x8xbf16>
    %100 = arith.truncf %85 : vector<8x8xf32> to vector<8x8xbf16>
    %101 = arith.addf %84, %85 : vector<8x8xf32>
    %102 = arith.truncf %101 : vector<8x8xf32> to vector<8x8xbf16>
    %cst_55 = arith.constant 0.000000e+00 : f32
    %103 = vector.broadcast %cst_55 : f32 to vector<8x8xf32>
    %cst_56 = arith.constant 0.000000e+00 : f32
    %104 = vector.broadcast %cst_56 : f32 to vector<8x8xf32>
    %c1_i32_57 = arith.constant 1 : i32
    %105 = arith.addi %arg1, %c1_i32_57 : i32
    %c0_i32_58 = arith.constant 0 : i32
    %106 = arith.subi %105, %c0_i32_58 : i32
    %107 = arith.addi %c0_i32_58, %106 : i32
    %c1_i32_59 = arith.constant 1 : i32
    %108:2 = scf.for %arg14 = %c0_i32_58 to %107 step %c1_i32_59 iter_args(%arg15 = %103, %arg16 = %104) -> (vector<8x8xf32>, vector<8x8xf32>)  : i32 {
      %c8_i32_130 = arith.constant 8 : i32
      %213 = arith.muli %arg14, %c8_i32_130 : i32
      %214 = tpu.assume_multiple %213, 8 : i32
      %215 = arith.index_cast %214 : i32 to index
      %c8_131 = arith.constant 8 : index
      %216 = vector.load %arg11[%215, %c8_131] : memref<8x32xbf16, #tpu.memory_space<vmem>>, vector<8x8xbf16>
      %217 = arith.index_cast %214 : i32 to index
      %c8_132 = arith.constant 8 : index
      %218 = vector.load %arg12[%217, %c8_132] : memref<8x32xbf16, #tpu.memory_space<vmem>>, vector<8x8xbf16>
      %219 = arith.index_cast %214 : i32 to index
      %c8_133 = arith.constant 8 : index
      %220 = vector.load %arg13[%219, %c8_133] : memref<8x32xbf16, #tpu.memory_space<vmem>>, vector<8x8xbf16>
      %cst_134 = arith.constant dense<0.000000e+00> : vector<8x8xf32>
      %221 = tpu.matmul %99, %216, %cst_134 {dimension_numbers = #tpu.dot_dimension_numbers<[1], [1], [0], [0], [0, 0, 1, 0], [], []>} : vector<8x8xbf16>, vector<8x8xbf16>, vector<8x8xf32> -> vector<8x8xf32>
      %cst_135 = arith.constant dense<0.000000e+00> : vector<8x8xf32>
      %222 = tpu.matmul %100, %218, %cst_135 {dimension_numbers = #tpu.dot_dimension_numbers<[1], [1], [0], [0], [0, 0, 1, 0], [], []>} : vector<8x8xbf16>, vector<8x8xbf16>, vector<8x8xf32> -> vector<8x8xf32>
      %223 = arith.addf %216, %218 : vector<8x8xbf16>
      %cst_136 = arith.constant dense<0.000000e+00> : vector<8x8xf32>
      %224 = tpu.matmul %102, %223, %cst_136 {dimension_numbers = #tpu.dot_dimension_numbers<[1], [1], [0], [0], [0, 0, 1, 0], [], []>} : vector<8x8xbf16>, vector<8x8xbf16>, vector<8x8xf32> -> vector<8x8xf32>
      %225 = arith.subf %221, %222 : vector<8x8xf32>
      %226 = arith.subf %224, %221 : vector<8x8xf32>
      %227 = arith.subf %226, %222 : vector<8x8xf32>
      %228 = arith.subi %arg1, %arg14 : i32
      %c8_i32_137 = arith.constant 8 : i32
      %229 = arith.muli %228, %c8_i32_137 : i32
      %230 = vector.broadcast %229 : i32 to vector<8x8xi32>
      %231 = arith.addi %230, %15 : vector<8x8xi32>
      %232 = arith.subi %231, %16 : vector<8x8xi32>
      %233 = arith.sitofp %232 : vector<8x8xi32> to vector<8x8xf32>
      %cst_138 = arith.constant 0.000000e+00 : f32
      %234 = vector.broadcast %cst_138 : f32 to vector<8x8xf32>
      %235 = arith.cmpf oge, %233, %234 : vector<8x8xf32>
      %cst_139 = arith.constant 0.000000e+00 : f32
      %236 = vector.broadcast %cst_139 : f32 to vector<8x8xf32>
      %237 = arith.maximumf %233, %236 : vector<8x8xf32>
      %238 = vector.broadcast %66 : f32 to vector<8x8xf32>
      %239 = arith.mulf %238, %237 : vector<8x8xf32>
      %240 = math.exp %239 : vector<8x8xf32>
      %cst_140 = arith.constant 0.000000e+00 : f32
      %241 = vector.broadcast %cst_140 : f32 to vector<8x8xf32>
      %242 = arith.select %235, %240, %241 : vector<8x8xi1>, vector<8x8xf32>
      %243 = arith.mulf %225, %242 : vector<8x8xf32>
      %244 = arith.truncf %243 : vector<8x8xf32> to vector<8x8xbf16>
      %cst_141 = arith.constant dense<0.000000e+00> : vector<8x8xf32>
      %245 = tpu.matmul %244, %220, %cst_141 {dimension_numbers = #tpu.dot_dimension_numbers<[1], [0], [0], [1], [0, 0, 1, 1], [], []>} : vector<8x8xbf16>, vector<8x8xbf16>, vector<8x8xf32> -> vector<8x8xf32>
      %246 = arith.addf %arg15, %245 : vector<8x8xf32>
      %247 = arith.mulf %227, %242 : vector<8x8xf32>
      %248 = arith.truncf %247 : vector<8x8xf32> to vector<8x8xbf16>
      %cst_142 = arith.constant dense<0.000000e+00> : vector<8x8xf32>
      %249 = tpu.matmul %248, %220, %cst_142 {dimension_numbers = #tpu.dot_dimension_numbers<[1], [0], [0], [1], [0, 0, 1, 1], [], []>} : vector<8x8xbf16>, vector<8x8xbf16>, vector<8x8xf32> -> vector<8x8xf32>
      %250 = arith.addf %arg16, %249 : vector<8x8xf32>
      scf.yield %246, %250 : vector<8x8xf32>, vector<8x8xf32>
    }
    %c0_60 = arith.constant 0 : index
    %c0_61 = arith.constant 0 : index
    %c8_62 = arith.constant 8 : index
    %109 = vector.load %arg9[%c0_60, %c0_61, %c8_62] : memref<1x8x32xf32, #tpu.memory_space<vmem>>, vector<1x8x8xf32>
    %110 = vector.shape_cast %109 : vector<1x8x8xf32> to vector<8x8xf32>
    %111 = vector.shape_cast %108#0 : vector<8x8xf32> to vector<1x8x8xf32>
    tpu.vector_store %arg9[%c0_60, %c0_61, %c8_62], %111 {strides = array<i32>} : memref<1x8x32xf32, #tpu.memory_space<vmem>>, vector<1x8x8xf32>,
    %c0_63 = arith.constant 0 : index
    %c0_64 = arith.constant 0 : index
    %c8_65 = arith.constant 8 : index
    %112 = vector.load %arg10[%c0_63, %c0_64, %c8_65] : memref<1x8x32xf32, #tpu.memory_space<vmem>>, vector<1x8x8xf32>
    %113 = vector.shape_cast %112 : vector<1x8x8xf32> to vector<8x8xf32>
    %114 = vector.shape_cast %108#1 : vector<8x8xf32> to vector<1x8x8xf32>
    tpu.vector_store %arg10[%c0_63, %c0_64, %c8_65], %114 {strides = array<i32>} : memref<1x8x32xf32, #tpu.memory_space<vmem>>, vector<1x8x8xf32>,
    %c2 = arith.constant 2 : index
    %115 = memref.load %arg2[%c2] : memref<4xf32, #tpu.memory_space<smem>>
    %116 = vector.extract_strided_slice %13 {offsets = [0, 16], sizes = [8, 8], strides = [1, 1]} : vector<8x32xf32> to vector<8x8xf32>
    %117 = vector.extract_strided_slice %14 {offsets = [0, 16], sizes = [8, 8], strides = [1, 1]} : vector<8x32xf32> to vector<8x8xf32>
    %c0_66 = arith.constant 0 : index
    %c0_67 = arith.constant 0 : index
    %c16 = arith.constant 16 : index
    %118 = vector.load %arg3[%c0_66, %c0_67, %c16] : memref<1x8x32xf32, #tpu.memory_space<vmem>>, vector<1x8x8xf32>
    %119 = vector.shape_cast %118 : vector<1x8x8xf32> to vector<8x8xf32>
    %120 = arith.truncf %119 : vector<8x8xf32> to vector<8x8xbf16>
    %c0_68 = arith.constant 0 : index
    %c0_69 = arith.constant 0 : index
    %c16_70 = arith.constant 16 : index
    %121 = vector.load %arg4[%c0_68, %c0_69, %c16_70] : memref<1x8x32xf32, #tpu.memory_space<vmem>>, vector<1x8x8xf32>
    %122 = vector.shape_cast %121 : vector<1x8x8xf32> to vector<8x8xf32>
    %123 = arith.truncf %122 : vector<8x8xf32> to vector<8x8xbf16>
    %c2_71 = arith.constant 2 : index
    %c0_72 = arith.constant 0 : index
    %c0_73 = arith.constant 0 : index
    %124 = vector.load %arg6[%c2_71, %c0_72, %c0_73] : memref<4x8x8xbf16, #tpu.memory_space<vmem>>, vector<1x8x8xbf16>
    %125 = vector.shape_cast %124 : vector<1x8x8xbf16> to vector<8x8xbf16>
    %cst_74 = arith.constant dense<0.000000e+00> : vector<8x8xf32>
    %126 = tpu.matmul %120, %125, %cst_74 {dimension_numbers = #tpu.dot_dimension_numbers<[1], [0], [0], [1], [0, 0, 1, 1], [], []>} : vector<8x8xbf16>, vector<8x8xbf16>, vector<8x8xf32> -> vector<8x8xf32>
    %c2_75 = arith.constant 2 : index
    %c0_76 = arith.constant 0 : index
    %c0_77 = arith.constant 0 : index
    %127 = vector.load %arg7[%c2_75, %c0_76, %c0_77] : memref<4x8x8xbf16, #tpu.memory_space<vmem>>, vector<1x8x8xbf16>
    %128 = vector.shape_cast %127 : vector<1x8x8xbf16> to vector<8x8xbf16>
    %cst_78 = arith.constant dense<0.000000e+00> : vector<8x8xf32>
    %129 = tpu.matmul %123, %128, %cst_78 {dimension_numbers = #tpu.dot_dimension_numbers<[1], [0], [0], [1], [0, 0, 1, 1], [], []>} : vector<8x8xbf16>, vector<8x8xbf16>, vector<8x8xf32> -> vector<8x8xf32>
    %c2_79 = arith.constant 2 : index
    %c0_80 = arith.constant 0 : index
    %c0_81 = arith.constant 0 : index
    %130 = vector.load %arg8[%c2_79, %c0_80, %c0_81] : memref<4x8x8xbf16, #tpu.memory_space<vmem>>, vector<1x8x8xbf16>
    %131 = vector.shape_cast %130 : vector<1x8x8xbf16> to vector<8x8xbf16>
    %cst_82 = arith.constant dense<0.000000e+00> : vector<8x8xf32>
    %132 = tpu.matmul %123, %131, %cst_82 {dimension_numbers = #tpu.dot_dimension_numbers<[1], [0], [0], [1], [0, 0, 1, 1], [], []>} : vector<8x8xbf16>, vector<8x8xbf16>, vector<8x8xf32> -> vector<8x8xf32>
    %133 = arith.mulf %126, %116 : vector<8x8xf32>
    %134 = arith.mulf %126, %117 : vector<8x8xf32>
    %135 = arith.mulf %129, %116 : vector<8x8xf32>
    %cst_83 = arith.constant 0.000000e+00 : f32
    %136 = vector.broadcast %cst_83 : f32 to vector<8x8xf32>
    %137 = arith.subf %136, %129 : vector<8x8xf32>
    %138 = arith.mulf %137, %117 : vector<8x8xf32>
    %139 = arith.truncf %135 : vector<8x8xf32> to vector<8x8xbf16>
    %140 = arith.index_cast %1 : i32 to index
    %c16_84 = arith.constant 16 : index
    %141 = vector.load %arg11[%140, %c16_84] : memref<8x32xbf16, #tpu.memory_space<vmem>>, vector<8x8xbf16>
    tpu.vector_store %arg11[%140, %c16_84], %139 {strides = array<i32>} : memref<8x32xbf16, #tpu.memory_space<vmem>>, vector<8x8xbf16>,
    %142 = arith.truncf %138 : vector<8x8xf32> to vector<8x8xbf16>
    %143 = arith.index_cast %1 : i32 to index
    %c16_85 = arith.constant 16 : index
    %144 = vector.load %arg12[%143, %c16_85] : memref<8x32xbf16, #tpu.memory_space<vmem>>, vector<8x8xbf16>
    tpu.vector_store %arg12[%143, %c16_85], %142 {strides = array<i32>} : memref<8x32xbf16, #tpu.memory_space<vmem>>, vector<8x8xbf16>,
    %145 = arith.truncf %132 : vector<8x8xf32> to vector<8x8xbf16>
    %146 = arith.index_cast %1 : i32 to index
    %c16_86 = arith.constant 16 : index
    %147 = vector.load %arg13[%146, %c16_86] : memref<8x32xbf16, #tpu.memory_space<vmem>>, vector<8x8xbf16>
    tpu.vector_store %arg13[%146, %c16_86], %145 {strides = array<i32>} : memref<8x32xbf16, #tpu.memory_space<vmem>>, vector<8x8xbf16>,
    %148 = arith.truncf %133 : vector<8x8xf32> to vector<8x8xbf16>
    %149 = arith.truncf %134 : vector<8x8xf32> to vector<8x8xbf16>
    %150 = arith.addf %133, %134 : vector<8x8xf32>
    %151 = arith.truncf %150 : vector<8x8xf32> to vector<8x8xbf16>
    %cst_87 = arith.constant 0.000000e+00 : f32
    %152 = vector.broadcast %cst_87 : f32 to vector<8x8xf32>
    %cst_88 = arith.constant 0.000000e+00 : f32
    %153 = vector.broadcast %cst_88 : f32 to vector<8x8xf32>
    %c1_i32_89 = arith.constant 1 : i32
    %154 = arith.addi %arg1, %c1_i32_89 : i32
    %c0_i32_90 = arith.constant 0 : i32
    %155 = arith.subi %154, %c0_i32_90 : i32
    %156 = arith.addi %c0_i32_90, %155 : i32
    %c1_i32_91 = arith.constant 1 : i32
    %157:2 = scf.for %arg14 = %c0_i32_90 to %156 step %c1_i32_91 iter_args(%arg15 = %152, %arg16 = %153) -> (vector<8x8xf32>, vector<8x8xf32>)  : i32 {
      %c8_i32_130 = arith.constant 8 : i32
      %213 = arith.muli %arg14, %c8_i32_130 : i32
      %214 = tpu.assume_multiple %213, 8 : i32
      %215 = arith.index_cast %214 : i32 to index
      %c16_131 = arith.constant 16 : index
      %216 = vector.load %arg11[%215, %c16_131] : memref<8x32xbf16, #tpu.memory_space<vmem>>, vector<8x8xbf16>
      %217 = arith.index_cast %214 : i32 to index
      %c16_132 = arith.constant 16 : index
      %218 = vector.load %arg12[%217, %c16_132] : memref<8x32xbf16, #tpu.memory_space<vmem>>, vector<8x8xbf16>
      %219 = arith.index_cast %214 : i32 to index
      %c16_133 = arith.constant 16 : index
      %220 = vector.load %arg13[%219, %c16_133] : memref<8x32xbf16, #tpu.memory_space<vmem>>, vector<8x8xbf16>
      %cst_134 = arith.constant dense<0.000000e+00> : vector<8x8xf32>
      %221 = tpu.matmul %148, %216, %cst_134 {dimension_numbers = #tpu.dot_dimension_numbers<[1], [1], [0], [0], [0, 0, 1, 0], [], []>} : vector<8x8xbf16>, vector<8x8xbf16>, vector<8x8xf32> -> vector<8x8xf32>
      %cst_135 = arith.constant dense<0.000000e+00> : vector<8x8xf32>
      %222 = tpu.matmul %149, %218, %cst_135 {dimension_numbers = #tpu.dot_dimension_numbers<[1], [1], [0], [0], [0, 0, 1, 0], [], []>} : vector<8x8xbf16>, vector<8x8xbf16>, vector<8x8xf32> -> vector<8x8xf32>
      %223 = arith.addf %216, %218 : vector<8x8xbf16>
      %cst_136 = arith.constant dense<0.000000e+00> : vector<8x8xf32>
      %224 = tpu.matmul %151, %223, %cst_136 {dimension_numbers = #tpu.dot_dimension_numbers<[1], [1], [0], [0], [0, 0, 1, 0], [], []>} : vector<8x8xbf16>, vector<8x8xbf16>, vector<8x8xf32> -> vector<8x8xf32>
      %225 = arith.subf %221, %222 : vector<8x8xf32>
      %226 = arith.subf %224, %221 : vector<8x8xf32>
      %227 = arith.subf %226, %222 : vector<8x8xf32>
      %228 = arith.subi %arg1, %arg14 : i32
      %c8_i32_137 = arith.constant 8 : i32
      %229 = arith.muli %228, %c8_i32_137 : i32
      %230 = vector.broadcast %229 : i32 to vector<8x8xi32>
      %231 = arith.addi %230, %15 : vector<8x8xi32>
      %232 = arith.subi %231, %16 : vector<8x8xi32>
      %233 = arith.sitofp %232 : vector<8x8xi32> to vector<8x8xf32>
      %cst_138 = arith.constant 0.000000e+00 : f32
      %234 = vector.broadcast %cst_138 : f32 to vector<8x8xf32>
      %235 = arith.cmpf oge, %233, %234 : vector<8x8xf32>
      %cst_139 = arith.constant 0.000000e+00 : f32
      %236 = vector.broadcast %cst_139 : f32 to vector<8x8xf32>
      %237 = arith.maximumf %233, %236 : vector<8x8xf32>
      %238 = vector.broadcast %115 : f32 to vector<8x8xf32>
      %239 = arith.mulf %238, %237 : vector<8x8xf32>
      %240 = math.exp %239 : vector<8x8xf32>
      %cst_140 = arith.constant 0.000000e+00 : f32
      %241 = vector.broadcast %cst_140 : f32 to vector<8x8xf32>
      %242 = arith.select %235, %240, %241 : vector<8x8xi1>, vector<8x8xf32>
      %243 = arith.mulf %225, %242 : vector<8x8xf32>
      %244 = arith.truncf %243 : vector<8x8xf32> to vector<8x8xbf16>
      %cst_141 = arith.constant dense<0.000000e+00> : vector<8x8xf32>
      %245 = tpu.matmul %244, %220, %cst_141 {dimension_numbers = #tpu.dot_dimension_numbers<[1], [0], [0], [1], [0, 0, 1, 1], [], []>} : vector<8x8xbf16>, vector<8x8xbf16>, vector<8x8xf32> -> vector<8x8xf32>
      %246 = arith.addf %arg15, %245 : vector<8x8xf32>
      %247 = arith.mulf %227, %242 : vector<8x8xf32>
      %248 = arith.truncf %247 : vector<8x8xf32> to vector<8x8xbf16>
      %cst_142 = arith.constant dense<0.000000e+00> : vector<8x8xf32>
      %249 = tpu.matmul %248, %220, %cst_142 {dimension_numbers = #tpu.dot_dimension_numbers<[1], [0], [0], [1], [0, 0, 1, 1], [], []>} : vector<8x8xbf16>, vector<8x8xbf16>, vector<8x8xf32> -> vector<8x8xf32>
      %250 = arith.addf %arg16, %249 : vector<8x8xf32>
      scf.yield %246, %250 : vector<8x8xf32>, vector<8x8xf32>
    }
    %c0_92 = arith.constant 0 : index
    %c0_93 = arith.constant 0 : index
    %c16_94 = arith.constant 16 : index
    %158 = vector.load %arg9[%c0_92, %c0_93, %c16_94] : memref<1x8x32xf32, #tpu.memory_space<vmem>>, vector<1x8x8xf32>
    %159 = vector.shape_cast %158 : vector<1x8x8xf32> to vector<8x8xf32>
    %160 = vector.shape_cast %157#0 : vector<8x8xf32> to vector<1x8x8xf32>
    tpu.vector_store %arg9[%c0_92, %c0_93, %c16_94], %160 {strides = array<i32>} : memref<1x8x32xf32, #tpu.memory_space<vmem>>, vector<1x8x8xf32>,
    %c0_95 = arith.constant 0 : index
    %c0_96 = arith.constant 0 : index
    %c16_97 = arith.constant 16 : index
    %161 = vector.load %arg10[%c0_95, %c0_96, %c16_97] : memref<1x8x32xf32, #tpu.memory_space<vmem>>, vector<1x8x8xf32>
    %162 = vector.shape_cast %161 : vector<1x8x8xf32> to vector<8x8xf32>
    %163 = vector.shape_cast %157#1 : vector<8x8xf32> to vector<1x8x8xf32>
    tpu.vector_store %arg10[%c0_95, %c0_96, %c16_97], %163 {strides = array<i32>} : memref<1x8x32xf32, #tpu.memory_space<vmem>>, vector<1x8x8xf32>,
    %c3 = arith.constant 3 : index
    %164 = memref.load %arg2[%c3] : memref<4xf32, #tpu.memory_space<smem>>
    %165 = vector.extract_strided_slice %13 {offsets = [0, 24], sizes = [8, 8], strides = [1, 1]} : vector<8x32xf32> to vector<8x8xf32>
    %166 = vector.extract_strided_slice %14 {offsets = [0, 24], sizes = [8, 8], strides = [1, 1]} : vector<8x32xf32> to vector<8x8xf32>
    %c0_98 = arith.constant 0 : index
    %c0_99 = arith.constant 0 : index
    %c24 = arith.constant 24 : index
    %167 = vector.load %arg3[%c0_98, %c0_99, %c24] : memref<1x8x32xf32, #tpu.memory_space<vmem>>, vector<1x8x8xf32>
    %168 = vector.shape_cast %167 : vector<1x8x8xf32> to vector<8x8xf32>
    %169 = arith.truncf %168 : vector<8x8xf32> to vector<8x8xbf16>
    %c0_100 = arith.constant 0 : index
    %c0_101 = arith.constant 0 : index
    %c24_102 = arith.constant 24 : index
    %170 = vector.load %arg4[%c0_100, %c0_101, %c24_102] : memref<1x8x32xf32, #tpu.memory_space<vmem>>, vector<1x8x8xf32>
    %171 = vector.shape_cast %170 : vector<1x8x8xf32> to vector<8x8xf32>
    %172 = arith.truncf %171 : vector<8x8xf32> to vector<8x8xbf16>
    %c3_103 = arith.constant 3 : index
    %c0_104 = arith.constant 0 : index
    %c0_105 = arith.constant 0 : index
    %173 = vector.load %arg6[%c3_103, %c0_104, %c0_105] : memref<4x8x8xbf16, #tpu.memory_space<vmem>>, vector<1x8x8xbf16>
    %174 = vector.shape_cast %173 : vector<1x8x8xbf16> to vector<8x8xbf16>
    %cst_106 = arith.constant dense<0.000000e+00> : vector<8x8xf32>
    %175 = tpu.matmul %169, %174, %cst_106 {dimension_numbers = #tpu.dot_dimension_numbers<[1], [0], [0], [1], [0, 0, 1, 1], [], []>} : vector<8x8xbf16>, vector<8x8xbf16>, vector<8x8xf32> -> vector<8x8xf32>
    %c3_107 = arith.constant 3 : index
    %c0_108 = arith.constant 0 : index
    %c0_109 = arith.constant 0 : index
    %176 = vector.load %arg7[%c3_107, %c0_108, %c0_109] : memref<4x8x8xbf16, #tpu.memory_space<vmem>>, vector<1x8x8xbf16>
    %177 = vector.shape_cast %176 : vector<1x8x8xbf16> to vector<8x8xbf16>
    %cst_110 = arith.constant dense<0.000000e+00> : vector<8x8xf32>
    %178 = tpu.matmul %172, %177, %cst_110 {dimension_numbers = #tpu.dot_dimension_numbers<[1], [0], [0], [1], [0, 0, 1, 1], [], []>} : vector<8x8xbf16>, vector<8x8xbf16>, vector<8x8xf32> -> vector<8x8xf32>
    %c3_111 = arith.constant 3 : index
    %c0_112 = arith.constant 0 : index
    %c0_113 = arith.constant 0 : index
    %179 = vector.load %arg8[%c3_111, %c0_112, %c0_113] : memref<4x8x8xbf16, #tpu.memory_space<vmem>>, vector<1x8x8xbf16>
    %180 = vector.shape_cast %179 : vector<1x8x8xbf16> to vector<8x8xbf16>
    %cst_114 = arith.constant dense<0.000000e+00> : vector<8x8xf32>
    %181 = tpu.matmul %172, %180, %cst_114 {dimension_numbers = #tpu.dot_dimension_numbers<[1], [0], [0], [1], [0, 0, 1, 1], [], []>} : vector<8x8xbf16>, vector<8x8xbf16>, vector<8x8xf32> -> vector<8x8xf32>
    %182 = arith.mulf %175, %165 : vector<8x8xf32>
    %183 = arith.mulf %175, %166 : vector<8x8xf32>
    %184 = arith.mulf %178, %165 : vector<8x8xf32>
    %cst_115 = arith.constant 0.000000e+00 : f32
    %185 = vector.broadcast %cst_115 : f32 to vector<8x8xf32>
    %186 = arith.subf %185, %178 : vector<8x8xf32>
    %187 = arith.mulf %186, %166 : vector<8x8xf32>
    %188 = arith.truncf %184 : vector<8x8xf32> to vector<8x8xbf16>
    %189 = arith.index_cast %1 : i32 to index
    %c24_116 = arith.constant 24 : index
    %190 = vector.load %arg11[%189, %c24_116] : memref<8x32xbf16, #tpu.memory_space<vmem>>, vector<8x8xbf16>
    tpu.vector_store %arg11[%189, %c24_116], %188 {strides = array<i32>} : memref<8x32xbf16, #tpu.memory_space<vmem>>, vector<8x8xbf16>,
    %191 = arith.truncf %187 : vector<8x8xf32> to vector<8x8xbf16>
    %192 = arith.index_cast %1 : i32 to index
    %c24_117 = arith.constant 24 : index
    %193 = vector.load %arg12[%192, %c24_117] : memref<8x32xbf16, #tpu.memory_space<vmem>>, vector<8x8xbf16>
    tpu.vector_store %arg12[%192, %c24_117], %191 {strides = array<i32>} : memref<8x32xbf16, #tpu.memory_space<vmem>>, vector<8x8xbf16>,
    %194 = arith.truncf %181 : vector<8x8xf32> to vector<8x8xbf16>
    %195 = arith.index_cast %1 : i32 to index
    %c24_118 = arith.constant 24 : index
    %196 = vector.load %arg13[%195, %c24_118] : memref<8x32xbf16, #tpu.memory_space<vmem>>, vector<8x8xbf16>
    tpu.vector_store %arg13[%195, %c24_118], %194 {strides = array<i32>} : memref<8x32xbf16, #tpu.memory_space<vmem>>, vector<8x8xbf16>,
    %197 = arith.truncf %182 : vector<8x8xf32> to vector<8x8xbf16>
    %198 = arith.truncf %183 : vector<8x8xf32> to vector<8x8xbf16>
    %199 = arith.addf %182, %183 : vector<8x8xf32>
    %200 = arith.truncf %199 : vector<8x8xf32> to vector<8x8xbf16>
    %cst_119 = arith.constant 0.000000e+00 : f32
    %201 = vector.broadcast %cst_119 : f32 to vector<8x8xf32>
    %cst_120 = arith.constant 0.000000e+00 : f32
    %202 = vector.broadcast %cst_120 : f32 to vector<8x8xf32>
    %c1_i32_121 = arith.constant 1 : i32
    %203 = arith.addi %arg1, %c1_i32_121 : i32
    %c0_i32_122 = arith.constant 0 : i32
    %204 = arith.subi %203, %c0_i32_122 : i32
    %205 = arith.addi %c0_i32_122, %204 : i32
    %c1_i32_123 = arith.constant 1 : i32
    %206:2 = scf.for %arg14 = %c0_i32_122 to %205 step %c1_i32_123 iter_args(%arg15 = %201, %arg16 = %202) -> (vector<8x8xf32>, vector<8x8xf32>)  : i32 {
      %c8_i32_130 = arith.constant 8 : i32
      %213 = arith.muli %arg14, %c8_i32_130 : i32
      %214 = tpu.assume_multiple %213, 8 : i32
      %215 = arith.index_cast %214 : i32 to index
      %c24_131 = arith.constant 24 : index
      %216 = vector.load %arg11[%215, %c24_131] : memref<8x32xbf16, #tpu.memory_space<vmem>>, vector<8x8xbf16>
      %217 = arith.index_cast %214 : i32 to index
      %c24_132 = arith.constant 24 : index
      %218 = vector.load %arg12[%217, %c24_132] : memref<8x32xbf16, #tpu.memory_space<vmem>>, vector<8x8xbf16>
      %219 = arith.index_cast %214 : i32 to index
      %c24_133 = arith.constant 24 : index
      %220 = vector.load %arg13[%219, %c24_133] : memref<8x32xbf16, #tpu.memory_space<vmem>>, vector<8x8xbf16>
      %cst_134 = arith.constant dense<0.000000e+00> : vector<8x8xf32>
      %221 = tpu.matmul %197, %216, %cst_134 {dimension_numbers = #tpu.dot_dimension_numbers<[1], [1], [0], [0], [0, 0, 1, 0], [], []>} : vector<8x8xbf16>, vector<8x8xbf16>, vector<8x8xf32> -> vector<8x8xf32>
      %cst_135 = arith.constant dense<0.000000e+00> : vector<8x8xf32>
      %222 = tpu.matmul %198, %218, %cst_135 {dimension_numbers = #tpu.dot_dimension_numbers<[1], [1], [0], [0], [0, 0, 1, 0], [], []>} : vector<8x8xbf16>, vector<8x8xbf16>, vector<8x8xf32> -> vector<8x8xf32>
      %223 = arith.addf %216, %218 : vector<8x8xbf16>
      %cst_136 = arith.constant dense<0.000000e+00> : vector<8x8xf32>
      %224 = tpu.matmul %200, %223, %cst_136 {dimension_numbers = #tpu.dot_dimension_numbers<[1], [1], [0], [0], [0, 0, 1, 0], [], []>} : vector<8x8xbf16>, vector<8x8xbf16>, vector<8x8xf32> -> vector<8x8xf32>
      %225 = arith.subf %221, %222 : vector<8x8xf32>
      %226 = arith.subf %224, %221 : vector<8x8xf32>
      %227 = arith.subf %226, %222 : vector<8x8xf32>
      %228 = arith.subi %arg1, %arg14 : i32
      %c8_i32_137 = arith.constant 8 : i32
      %229 = arith.muli %228, %c8_i32_137 : i32
      %230 = vector.broadcast %229 : i32 to vector<8x8xi32>
      %231 = arith.addi %230, %15 : vector<8x8xi32>
      %232 = arith.subi %231, %16 : vector<8x8xi32>
      %233 = arith.sitofp %232 : vector<8x8xi32> to vector<8x8xf32>
      %cst_138 = arith.constant 0.000000e+00 : f32
      %234 = vector.broadcast %cst_138 : f32 to vector<8x8xf32>
      %235 = arith.cmpf oge, %233, %234 : vector<8x8xf32>
      %cst_139 = arith.constant 0.000000e+00 : f32
      %236 = vector.broadcast %cst_139 : f32 to vector<8x8xf32>
      %237 = arith.maximumf %233, %236 : vector<8x8xf32>
      %238 = vector.broadcast %164 : f32 to vector<8x8xf32>
      %239 = arith.mulf %238, %237 : vector<8x8xf32>
      %240 = math.exp %239 : vector<8x8xf32>
      %cst_140 = arith.constant 0.000000e+00 : f32
      %241 = vector.broadcast %cst_140 : f32 to vector<8x8xf32>
      %242 = arith.select %235, %240, %241 : vector<8x8xi1>, vector<8x8xf32>
      %243 = arith.mulf %225, %242 : vector<8x8xf32>
      %244 = arith.truncf %243 : vector<8x8xf32> to vector<8x8xbf16>
      %cst_141 = arith.constant dense<0.000000e+00> : vector<8x8xf32>
      %245 = tpu.matmul %244, %220, %cst_141 {dimension_numbers = #tpu.dot_dimension_numbers<[1], [0], [0], [1], [0, 0, 1, 1], [], []>} : vector<8x8xbf16>, vector<8x8xbf16>, vector<8x8xf32> -> vector<8x8xf32>
      %246 = arith.addf %arg15, %245 : vector<8x8xf32>
      %247 = arith.mulf %227, %242 : vector<8x8xf32>
      %248 = arith.truncf %247 : vector<8x8xf32> to vector<8x8xbf16>
      %cst_142 = arith.constant dense<0.000000e+00> : vector<8x8xf32>
      %249 = tpu.matmul %248, %220, %cst_142 {dimension_numbers = #tpu.dot_dimension_numbers<[1], [0], [0], [1], [0, 0, 1, 1], [], []>} : vector<8x8xbf16>, vector<8x8xbf16>, vector<8x8xf32> -> vector<8x8xf32>
      %250 = arith.addf %arg16, %249 : vector<8x8xf32>
      scf.yield %246, %250 : vector<8x8xf32>, vector<8x8xf32>
    }
    %c0_124 = arith.constant 0 : index
    %c0_125 = arith.constant 0 : index
    %c24_126 = arith.constant 24 : index
    %207 = vector.load %arg9[%c0_124, %c0_125, %c24_126] : memref<1x8x32xf32, #tpu.memory_space<vmem>>, vector<1x8x8xf32>
    %208 = vector.shape_cast %207 : vector<1x8x8xf32> to vector<8x8xf32>
    %209 = vector.shape_cast %206#0 : vector<8x8xf32> to vector<1x8x8xf32>
    tpu.vector_store %arg9[%c0_124, %c0_125, %c24_126], %209 {strides = array<i32>} : memref<1x8x32xf32, #tpu.memory_space<vmem>>, vector<1x8x8xf32>,
    %c0_127 = arith.constant 0 : index
    %c0_128 = arith.constant 0 : index
    %c24_129 = arith.constant 24 : index
    %210 = vector.load %arg10[%c0_127, %c0_128, %c24_129] : memref<1x8x32xf32, #tpu.memory_space<vmem>>, vector<1x8x8xf32>
    %211 = vector.shape_cast %210 : vector<1x8x8xf32> to vector<8x8xf32>
    %212 = vector.shape_cast %206#1 : vector<8x8xf32> to vector<1x8x8xf32>
    tpu.vector_store %arg10[%c0_127, %c0_128, %c24_129], %212 {strides = array<i32>} : memref<1x8x32xf32, #tpu.memory_space<vmem>>, vector<1x8x8xf32>,
    return
  }
  func.func @transform_0(%arg0: i32, %arg1: i32, %arg2: memref<4xf32, #tpu.memory_space<smem>>) -> (i32, i32, i32) {
    %c0_i32 = arith.constant 0 : i32
    %c0_i32_0 = arith.constant 0 : i32
    return %arg0, %arg1, %c0_i32 : i32, i32, i32
  }
  func.func @transform_1(%arg0: i32, %arg1: i32, %arg2: memref<4xf32, #tpu.memory_space<smem>>) -> (i32, i32, i32) {
    %c0_i32 = arith.constant 0 : i32
    %c0_i32_0 = arith.constant 0 : i32
    return %arg0, %arg1, %c0_i32 : i32, i32, i32
  }
  func.func @transform_2(%arg0: i32, %arg1: i32, %arg2: memref<4xf32, #tpu.memory_space<smem>>) -> (i32, i32) {
    %c0_i32 = arith.constant 0 : i32
    %c0_i32_0 = arith.constant 0 : i32
    %c0_i32_1 = arith.constant 0 : i32
    return %c0_i32, %c0_i32_0 : i32, i32
  }
  func.func @transform_3(%arg0: i32, %arg1: i32, %arg2: memref<4xf32, #tpu.memory_space<smem>>) -> (i32, i32, i32) {
    %c0_i32 = arith.constant 0 : i32
    %c0_i32_0 = arith.constant 0 : i32
    %c0_i32_1 = arith.constant 0 : i32
    %c0_i32_2 = arith.constant 0 : i32
    return %c0_i32, %c0_i32_0, %c0_i32_1 : i32, i32, i32
  }
  func.func @transform_4(%arg0: i32, %arg1: i32, %arg2: memref<4xf32, #tpu.memory_space<smem>>) -> (i32, i32, i32) {
    %c0_i32 = arith.constant 0 : i32
    %c0_i32_0 = arith.constant 0 : i32
    %c0_i32_1 = arith.constant 0 : i32
    %c0_i32_2 = arith.constant 0 : i32
    return %c0_i32, %c0_i32_0, %c0_i32_1 : i32, i32, i32
  }
  func.func @transform_5(%arg0: i32, %arg1: i32, %arg2: memref<4xf32, #tpu.memory_space<smem>>) -> (i32, i32, i32) {
    %c0_i32 = arith.constant 0 : i32
    %c0_i32_0 = arith.constant 0 : i32
    %c0_i32_1 = arith.constant 0 : i32
    %c0_i32_2 = arith.constant 0 : i32
    return %c0_i32, %c0_i32_0, %c0_i32_1 : i32, i32, i32
  }
  func.func @transform_6(%arg0: i32, %arg1: i32, %arg2: memref<4xf32, #tpu.memory_space<smem>>) -> (i32, i32, i32) {
    %c0_i32 = arith.constant 0 : i32
    %c0_i32_0 = arith.constant 0 : i32
    return %arg0, %arg1, %c0_i32 : i32, i32, i32
  }
  func.func @transform_7(%arg0: i32, %arg1: i32, %arg2: memref<4xf32, #tpu.memory_space<smem>>) -> (i32, i32, i32) {
    %c0_i32 = arith.constant 0 : i32
    %c0_i32_0 = arith.constant 0 : i32
    return %arg0, %arg1, %c0_i32 : i32, i32, i32
  }
}

</mosaic_0001>

<bundles_post_ra>
// kernel: tpu_custom_call.1
= control target key start
LH: loop header
LB: loop body
LE: loop exit
PB: predicated region body
PF: predicated region fallthrough
CT: control target
= control target key end

     0   :  { %s2775_s30 = smov [#allocation6]   ;;  %s3422_s0 = inlined_call_operand.hbm [shape: f32[4], index: 0, kind: input, shape index: {}]   ;;  %s3423_s1 = inlined_call_operand.hbm [shape: f32[2,8,32], index: 1, kind: input, shape index: {}]   ;;  %s3424_s2 = inlined_call_operand.hbm [shape: f32[2,8,32], index: 2, kind: input, shape index: {}]   ;;  %s3425_s3 = inlined_call_operand.vmem [shape: f32[1,32], index: 3, kind: input, shape index: {}]   ;;  %s3426_s4 = inlined_call_operand.hbm [shape: bf16[4,8,8], index: 4, kind: input, shape index: {}]   ;;  %s3427_s5 = inlined_call_operand.hbm [shape: bf16[4,8,8], index: 5, kind: input, shape index: {}]   ;;  %s3428_s6 = inlined_call_operand.hbm [shape: bf16[4,8,8], index: 6, kind: input, shape index: {}]   ;;  %s3429_s7 = inlined_call_operand.hbm [shape: f32[2,8,32], index: 7, kind: output, shape index: {0}]   ;;  %s3430_s8 = inlined_call_operand.hbm [shape: f32[2,8,32], index: 8, kind: output, shape index: {1}]  }
   0x1   :  { %3435 = sst [smem:[#allocation31_spill]] %s3426_s4  ;;  %s15_s29 = sshll.u32 %s3422_s0, 4  ;;  %s16_s29 = int_to_ptr.hbm [resolvable:$true] %s15_s29 }
   0x2   :  { %3436 = sst [smem:[#allocation32_spill]] %s3427_s5 }
   0x3   :  { %3437 = sst [smem:[#allocation33_spill]] %s3428_s6 }
   0x4   :  { %18 = dma.hbm_to_smem %s16_s29, 16, %s2775_s30, [#allocation5] }
   0x5   :  { %2677 = dma.done.wait [#allocation5], 16 }
   0x6   :  { %2678 = vsyncadd [#allocation5], 4294967280 }
   0x7   :  { %21 = sfence }
   0x8   :  { %22 = vsyncpa [#allocation8], 0 }
   0x9   :  { %24 = vsyncpa [#allocation8 + $0x1], 0 }
   0xa   :  { %25 = vsyncpa [#allocation11], 0 }
   0xb   :  { %27 = vsyncpa [#allocation11 + $0x1], 0 }
   0xc   :  { %28 = vsyncpa [#allocation14], 0 }
   0xd   :  { %29 = vsyncpa [#allocation9], 0 }
   0xe   :  { %31 = vsyncpa [#allocation9 + $0x1], 0 }
   0xf   :  { %32 = vsyncpa [#allocation18], 0 }
  0x10   :  { %34 = vsyncpa [#allocation18 + $0x1], 0  ;;  %s2845_s9 = smov 0   ;;  %s2847_s10 = smov 0  }
  0x11   :  { %s2849_s0 = smov 0   ;;  %s2851_s11 = smov 0  }
  0x12   :  { %s2853_s12 = smov 0   ;;  %s2855_s13 = smov 0  }
  0x13 LB: > { %3438 = sst [smem:[#allocation26_spill]] %s2713_s0  ;;  %s2876_s14 = sadd.s32 4294967295, %s2725_s13   ;;  %s2725_s13 = sphi %s2855_s13, %s40_s13   ;;  %s2721_s12 = sphi %s2853_s12, %s3464_s12   ;;  %s2717_s11 = sphi %s2851_s11, %s3463_s11   ;;  %s2713_s0 = sphi %s2849_s0, %s3462_s0   ;;  %s2709_s10 = sphi %s2847_s10, %s3466_s10   ;;  %s2705_s9 = sphi %s2845_s9, %s3465_s9  }
  0x14   : > { %3439 = sst [smem:[#allocation27_spill]] %s2721_s12  ;;  %p2076_p0 = scmp.ge.s32.totalorder %s2725_s13, 1 }
  0x15   : > { %p75_p1 = scmp.eq.s32.totalorder %s2876_s14, 0  ;;  %p253_p2 = scmp.lt.s32.totalorder %s2725_s13, 3 }
  0x16   : > { %s3440_s4 = sld [smem:[#allocation31_spill]]  ;;  %s2776_s19 = smov [#allocation12]  }
  0x17   : > { %p2884_p3 = pnand %p2076_p0, %p253_p2  ;;  %s269_s20 = sshll.u32 %s2776_s19, 4  ;;  %s270_s20 = int_to_ptr.vmem [resolvable:$true] %s269_s20 }
  0x18   : > { %p2080_p6 = scmp.ge.s32.totalorder %s2725_s13, 2  ;;  %s3443_s5 = sld [smem:[#allocation32_spill]] }
  0x19   : > { %p2180_p4 = pneg %p2884_p3  ;;  %s2777_s25 = smov 64  }
  0x1a   : > { %s2778_s26 = smov 4   ;;  %s2779_s27 = smov [#allocation13]  }
  0x1b   : > { %p2892_p5 = pnand %p2180_p4, %p75_p1  ;;  %s283_s28 = sshll.u32 %s2779_s27, 4  ;;  %s284_s28 = int_to_ptr.vmem [resolvable:$true] %s283_s28 }
  0x1c   : > { %s267_s17 = sshll.u32 %s3440_s4, 4  ;;  %s3444_s6 = sld [smem:[#allocation33_spill]]  ;;  %s268_s17 = int_to_ptr.hbm [resolvable:$true] %s267_s17 }
  0x1d   : > { %2183 = dma.hbm_to_vmem [thread:$0]  (!%p2892_p5), %s268_s17, 256, %s270_s20, [#allocation11], %s2777_s25, %s2777_s25, %s2778_s26  }
  0x1e   : > { %s281_s24 = sshll.u32 %s3443_s5, 4  ;;  %s2780_s16 = smov [#allocation15]   ;;  %s282_s24 = int_to_ptr.hbm [resolvable:$true] %s281_s24 }
  0x1f   : > { %2186 = dma.hbm_to_vmem [thread:$0]  (!%p2892_p5), %s282_s24, 256, %s284_s28, [#allocation14], %s2777_s25, %s2777_s25, %s2778_s26  }
  0x20   : > { %s297_s19 = sshll.u32 %s2780_s16, 4  ;;  %s2075_s17 = sadd.s32 4294967294, %s2725_s13   ;;  %s298_s19 = int_to_ptr.vmem [resolvable:$true] %s297_s19 }
  0x21   : > { %s52_s20 = sadd.s32 1, %s2721_s12  ;;  %s61_s22 = sadd.s32 1, %s2713_s0 }
  0x22   : > { %s295_s15 = sshll.u32 %s3444_s6, 4  ;;  %p54_p7 = scmp.ge.s32.totalorder %s52_s20, 2  ;;  %s296_s15 = int_to_ptr.hbm [resolvable:$true] %s295_s15 }
  0x23   : > { %2189 = dma.hbm_to_vmem [thread:$0]  (!%p2892_p5), %s296_s15, 256, %s298_s19, [#allocation14], %s2777_s25, %s2777_s25, %s2778_s26  }
  0x24   : > { %p68_p8 = scmp.ne.s32.totalorder %s2713_s0, %s2709_s10  ;;  %p69_p9 = scmp.eq.s32.totalorder %s2725_s13, 0 }
  0x25   : > { %p74_p10 = scmp.ne.s32.totalorder %s2709_s10, %s2705_s9  ;;  %s3468_s20 = smov (%p54_p7, %s52_s20), 0 }
  0x26   : > { %3445 = sst [smem:[#allocation28_spill]] %s3468_s20  ;;  %p2919_p11 = por %p69_p9, %p68_p8 }
  0x27   : > { %p2925_p12 = por %p75_p1, %p74_p10  ;;  %s56_s24 = ssub.s32 %s2721_s12, %s3468_s20 }
  0x28   : > { %p212_p13 = scmp.eq.s32.totalorder %s2876_s14, 1  ;;  %p59_p0 = scmp.eq.s32.totalorder %s56_s24, 0 }
  0x29   : > { %p218_p2 = scmp.eq.s32.totalorder %s2075_s17, 1  ;;  %p2207_p5 = scmp.lt.s32.totalorder %s2725_s13, 2 }
  0x2a   : > { %p2932_p4 = por %p212_p13, %p68_p8  ;;  %s311_s28 = sand.u32 1, %s2713_s0  }
  0x2b   : > { %s2938_s26 = scalar_select %p59_p0, %s2713_s0, %s61_s22  }
  0x2c   : > { %p2940_p7 = por %p218_p2, %p74_p10  ;;  %s2081_s29 = sshll.u32 %s311_s28, 3 }
  0x2d   : > { %3449 = sst [smem:[#allocation29_spill]] %s2938_s26  ;;  %s2082_s30 = sshll.u32 %s2721_s12, 3 }
  0x2e   : > { %s3450_s27 = scalar_select %p2940_p7, 1, 0 }
  0x2f   : > { %s320_s19 = scalar_lea.hbm %s3423_s1, %s2082_s30  ;;  %s315_s17 = scalar_lea.vmem [#allocation7], %s2081_s29 }
  0x30   : > { %3451 = sst [smem:[#allocation30_spill]] %s3450_s27  ;;  %s324_s24 = sshll.u32 %s315_s17, 4  ;;  %s325_s24 = int_to_ptr.vmem [resolvable:$true] %s324_s24 }
  0x31   : > { %s322_s4 = sshll.u32 %s320_s19, 4  ;;  %p2191_p8 = pnand %p2207_p5, %p2919_p11  ;;  %s323_s4 = int_to_ptr.hbm [resolvable:$true] %s322_s4 }
  0x32   : > { %s340_s6 = scalar_lea.hbm %s3424_s2, %s2082_s30  ;;  %s331_s20 = sand.u32 1, %s2725_s13  }
  0x33   : > { %s312_s26 = scalar_lea.sflag [#allocation8], %s311_s28  ;;  %s342_s0 = sshll.u32 %s340_s6, 4  ;;  %s343_s0 = int_to_ptr.hbm [resolvable:$true] %s342_s0 }
  0x34   : > { %2193 = dma.hbm_to_vmem [thread:$0]  (!%p2191_p8), %s323_s4, 128, %s325_s24, %s312_s26  }
  0x35   : > { %s335_s12 = scalar_lea.vmem [#allocation10], %s2081_s29  ;;  %s332_s15 = scalar_lea.sflag [#allocation11], %s331_s20 }
  0x36   : > { %s344_s27 = sshll.u32 %s335_s12, 4  ;;  %353 = sbr.rel (%p2884_p3) target bundleno = 2713 (0xa99), region = 44  ;;  %s345_s27 = int_to_ptr.vmem [resolvable:$true] %s344_s27 }
  0x37   : > { %2196 = dma.hbm_to_vmem [thread:$0]  (!%p2191_p8), %s343_s0, 128, %s345_s27, %s332_s15  }
  0x38   : > { %s2958_s23 = sand.u32 (!%p2884_p3), 1, %s2709_s10  }
  0x39   : > { %s2961_s5 = sshll.u32 (!%p2884_p3), %s2958_s23, 3  ;;  %s356_s4 = scalar_lea.sflag (!%p2884_p3), [#allocation8], %s2958_s23 }
  0x3a   : > { %s2965_s6 = scalar_lea.vmem (!%p2884_p3), [#allocation7], %s2961_s5 }
  0x3b   : > { %2680 = dma.done.wait (%p2925_p12), %s356_s4, 128  }
  0x3c   : > { %2682 = vsyncadd (%p2925_p12), %s356_s4, 4294967168  ;;  %s365_s0 = sand.u32 1, %s2876_s14   ;;  %s2973_s18 = scalar_lea.vmem [#allocation10], %s2961_s5 }
  0x3d   : > { %s366_s12 = scalar_lea.sflag [#allocation11], %s365_s0 }
  0x3e   : > { %2684 = dma.done.wait (%p2925_p12), %s366_s12, 128  }
  0x3f   : > { %2686 = vsyncadd (%p2925_p12), %s366_s12, 4294967168 }
  0x40   : > { %2688 = dma.done.wait (%p75_p1), [#allocation11], 256  }
  0x41   : > { %2690 = vsyncadd (%p75_p1), [#allocation11], 4294967040 }
  0x42   : > { %2692 = dma.done.wait (%p75_p1), [#allocation14], 512  }
  0x43   : > { %2694 = vsyncadd (%p75_p1), [#allocation14], 4294966784  ;;  %v428_v0 = vlaneseq  ;;  %s2987_s20 = sld [smem:[#allocation6]]  ;;  %vm760_vm0 = vcmask 1043456   ;;  %v755_v3 = vld [vmem:[#allocation12] sm:$0xf] }
  0x44   : > { %v777_v4 = vld [vmem:[#allocation13] sm:$0xf]  ;;  %v797_v5 = vld [vmem:[#allocation15] sm:$0xf]  ;;  %v762_v7 = vsel %vm760_vm0, %v755_v3, 0  ;;  %vm756_vm1 = vcmask 64512  }
  0x45   : > { %v2990_v1 = vshrl.u32 %v428_v0, 7  ;;  %v782_v8 = vsel %vm760_vm0, %v777_v4, 0  ;;  %v799_v9 = vsel %vm760_vm0, %v797_v5, 0  ;;  %v751_v10 = vld [vmem:[%s2965_s6] sm:$0xff]  ;;  %v753_v11 = vld [vmem:[%s2973_s18] sm:$0xff]  ;;  %771 = vmatpush.bf16.msra.mxu0 %v762_v7  ;;  %s3076_s26 = scalar_lea.vmem [#allocation16], %s2961_s5 }
  0x46   : > { %791 = vmatpush.bf16.msra.mxu1 %v782_v8  ;;  %v752_v12 = vpack.c.bf16 %v751_v10, %v751_v10  ;;  %v754_v13 = vpack.c.bf16 %v753_v11, %v753_v11  ;;  %v2378_v14 = vld [vmem:[%s3425_s3] ss:$0 sm:$0xff]  ;;  %808 = vmatpush.bf16.msra.mxu2 %v799_v9  ;;  %v2781_v27 = vmov 683565275   ;;  %v2782_v29 = vmov 2475754826  }
  0x47   : > { %v432_v2 = vadd.s32 1, %v2990_v1  ;;  %v2783_v31 = vmov 2131351028   ;;  %v2784_v33 = vmov 2102212464   ;;  %s3079_s27 = scalar_lea.vmem [#allocation17], %s2961_s5 }
  0x48   : > { %2099 = vmatmul.msk.bf16.vlgmr.msra.gmra.mxu0 %vm756_vm1, %v752_v12  ;;  %v2785_v35 = vmov 920167782   ;;  %v2786_v41 = vmov 1326507024   ;;  %s3085_s28 = smov 0  }
  0x49   : > { %v433_v6 = vcvt.s32.f32 %v432_v2  ;;  %2100 = vmatmul.msk.bf16.vlgmr.msra.gmra.mxu1 %vm756_vm1, %v754_v13  ;;  %2101 = vmatmul.msk.bf16.vlgmr.msra.gmra.mxu2 %vm756_vm1, %v754_v13 }
  0x4b   : > { %v3001_v15 = vmul.f32 %v2378_v14, %v433_v6 }
  0x4d   : > { %v442_v16 = vand.u32 2139095040, %v3001_v15  ;;  %v439_v18 = vand.u32 2147483647, %v3001_v15  ;;  %vm441_vm14 = vcmp.lt.s32.totalorder %v3001_v15, 0 }
  0x4f   : > { %v443_v17 = vshrl.u32 %v442_v16, 23  ;;  %v446_v21 = vand.u32 8388607, %v439_v18  ;;  %vm440_vm15 = vcmp.le.f32.partialorder %v439_v18, 0.7853982 }
  0x51   : > { %v2093_v19 = vadd.s32 4294967169, %v443_v17  ;;  %v447_v24 = vor.u32 8388608, %v446_v21 }
  0x53   : > { %v449_v20 = vadd.s32 1, %v2093_v19  ;;  %v3013_v43 = vshll.u32 %v447_v24, 8  ;;  %v2787_v19 = vmov 0  }
  0x55   : > { %vm450_vm2 = vcmp.gt.s32.totalorder %v449_v20, 0  ;;  %v488_v55 = vand.u32 65535, %v3013_v43  ;;  %v489_v56 = vshrl.u32 %v3013_v43, 16 }
  0x56   : > { %v451_v22 = vsel %vm450_vm2, %v449_v20, 0 }
  0x57   : > { %v453_v23 = vand.u32 31, %v451_v22  ;;  %v3010_v25 = vshrl.u32 %v451_v22, 5 }
  0x59   : > { %v454_v26 = vsub.s32 32, %v453_v23  ;;  %v456_v28 = vshll.u32 %v2781_v27, %v453_v23  ;;  %v459_v30 = vshll.u32 %v2782_v29, %v453_v23  ;;  %v462_v32 = vshll.u32 %v2783_v31, %v453_v23 }
  0x5a   : > { %v465_v34 = vshll.u32 %v2784_v33, %v453_v23  ;;  %v468_v36 = vshll.u32 %v2785_v35, %v453_v23  ;;  %vm471_vm3 = vcmp.lt.s32.totalorder %v3010_v25, 1  ;;  %vm474_vm4 = vcmp.lt.s32.totalorder %v3010_v25, 4 }
  0x5b   : > { %v457_v37 = vshrl.u32 %v2782_v29, %v454_v26  ;;  %v460_v38 = vshrl.u32 %v2783_v31, %v454_v26  ;;  %v463_v39 = vshrl.u32 %v2784_v33, %v454_v26  ;;  %v466_v40 = vshrl.u32 %v2785_v35, %v454_v26 }
  0x5c   : > { %v469_v42 = vshrl.u32 %v2786_v41, %v454_v26  ;;  %vm473_vm5 = vcmp.lt.s32.totalorder %v3010_v25, 3  ;;  %vm472_vm6 = vcmp.lt.s32.totalorder %v3010_v25, 2  ;;  %v455_v63 = vshrl.u32 %v2781_v27, %v454_v26 }
  0x5d   : > { %v458_v44 = vor.u32 %v457_v37, %v456_v28  ;;  %v461_v45 = vor.u32 %v460_v38, %v459_v30  ;;  %v464_v46 = vor.u32 %v463_v39, %v462_v32  ;;  %v467_v47 = vor.u32 %v466_v40, %v465_v34 }
  0x5e   : > { %v470_v48 = vor.u32 %v469_v42, %v468_v36 }
  0x5f   : > { %v479_v49 = vsel %vm471_vm3, %v458_v44, %v461_v45  ;;  %v483_v50 = vsel %vm471_vm3, %v461_v45, %v464_v46  ;;  %v480_v51 = vsel %vm474_vm4, %v467_v47, 920167782  ;;  %v475_v14 = vsel %vm471_vm3, %v455_v63, %v458_v44 }
  0x60   : > { %v484_v52 = vsel %vm474_vm4, %v470_v48, 1326507024  ;;  %v481_v53 = vsel %vm473_vm5, %v464_v46, %v480_v51  ;;  %v476_v17 = vsel %vm474_vm4, %v464_v46, 2102212464 }
  0x61   : > { %v485_v54 = vsel %vm473_vm5, %v467_v47, %v484_v52  ;;  %v482_v57 = vsel %vm472_vm6, %v479_v49, %v481_v53  ;;  %v477_v29 = vsel %vm473_vm5, %v461_v45, %v476_v17 }
  0x62   : > { %v486_v58 = vsel %vm472_vm6, %v483_v50, %v485_v54  ;;  %v512_v61 = vand.u32 65535, %v482_v57  ;;  %v513_v62 = vshrl.u32 %v482_v57, 16  ;;  %v478_v37 = vsel %vm472_vm6, %v475_v14, %v477_v29 }
  0x63   : > { %v490_v59 = vand.u32 65535, %v486_v58  ;;  %v491_v60 = vshrl.u32 %v486_v58, 16  ;;  %v532_v41 = vmul.u32 %v3013_v43, %v478_v37 }
  0x64   : > { %v514_v5 = vmul.u32 %v512_v61, %v488_v55  ;;  %v515_v6 = vmul.u32 %v513_v62, %v488_v55  ;;  %v516_v7 = vmul.u32 %v512_v61, %v489_v56  ;;  %v517_v11 = vmul.u32 %v513_v62, %v489_v56 }
  0x65   : > { %v492_v2 = vmul.u32 %v490_v59, %v488_v55  ;;  %v493_v3 = vmul.u32 %v491_v60, %v488_v55  ;;  %v494_v4 = vmul.u32 %v490_v59, %v489_v56  ;;  %v495_v8 = vmul.u32 %v491_v60, %v489_v56 }
  0x66   : > { %v518_v12 = vshll.u32 %v515_v6, 16  ;;  %v520_v13 = vshll.u32 %v516_v7, 16  ;;  %v519_v27 = vshrl.u32 %v515_v6, 16  ;;  %v521_v33 = vshrl.u32 %v516_v7, 16 }
  0x67   : > { %v496_v9 = vshll.u32 %v493_v3, 16  ;;  %v498_v10 = vshll.u32 %v494_v4, 16  ;;  %v497_v22 = vshrl.u32 %v493_v3, 16  ;;  %v499_v30 = vshrl.u32 %v494_v4, 16 }
  0x68   : > { %vm522_vm8 = vc.u32 %v514_v5, %v518_v12  ;;  %v524_v21 = vadd.s32 %v518_v12, %v514_v5  ;;  %v3046_v61 = vand.u32 127, %v428_v0 }
  0x69   : > { %vm500_vm7 = vc.u32 %v492_v2, %v496_v9  ;;  %v502_v16 = vadd.s32 %v496_v9, %v492_v2  ;;  %v523_v24 = vsel %vm522_vm8, 1, %v2787_v19  ;;  %vm582_vm8 = vweird.f32 %v3001_v15 }
  0x6a   : > { %v501_v20 = vsel %vm500_vm7, 1, %v2787_v19  ;;  %v525_v28 = vadd.s32 %v523_v24, %v517_v11  ;;  %vm526_vm10 = vc.u32 %v524_v21, %v520_v13  ;;  %v528_v36 = vadd.s32 %v524_v21, %v520_v13 }
  0x6b   : > { %v503_v23 = vadd.s32 %v501_v20, %v495_v8  ;;  %vm504_vm9 = vc.u32 %v502_v16, %v498_v10  ;;  %v527_v32 = vsel %vm526_vm10, 1, %v2787_v19 }
  0x6c   : > { %v505_v26 = vsel %vm504_vm9, 1, %v2787_v19  ;;  %v529_v34 = vadd.s32 %v527_v32, %v525_v28  ;;  %vm824_vm9 = vcmask 60416  }
  0x6d   : > { %v507_v31 = vadd.s32 %v505_v26, %v503_v23 }
  0x6e   : > { %v530_v38 = vadd.s32 %v529_v34, %v519_v27 }
  0x6f   : > { %v508_v35 = vadd.s32 %v507_v31, %v497_v22 }
  0x70   : > { %v531_v40 = vadd.s32 %v530_v38, %v521_v33 }
  0x71   : > { %v509_v39 = vadd.s32 %v508_v35, %v499_v30 }
  0x72   : > { %v535_v42 = vadd.s32 1, %v531_v40 }
  0x73   : > { %vm534_vm11 = vc.u32 %v509_v39, %v528_v36  ;;  %v533_v25 = vadd.s32 %v528_v36, %v509_v39 }
  0x74   : > { %v536_v44 = vsel %vm534_vm11, %v535_v42, %v531_v40 }
  0x75   : > { %v537_v46 = vadd.s32 %v536_v44, %v532_v41 }
  0x77   : > { %v538_v45 = vadd.s32 536870912, %v537_v46 }
  0x79   : > { %v539_v47 = vshrl.u32 %v538_v45, 30 }
  0x7b   : > { %v540_v48 = vshll.u32 %v539_v47, 30  ;;  %v563_v12 = vsub.s32 4, %v539_v47 }
  0x7d   : > { %v541_v49 = vsub.s32 %v537_v46, %v540_v48  ;;  %v564_v16 = vsel %vm441_vm14, %v563_v12, %v539_v47 }
  0x7e   : > { %v566_v20 = vsel %vm440_vm15, 0, %v564_v16 }
  0x7f   : > { %vm542_vm12 = vcmp.lt.s32.totalorder %v541_v49, 0  ;;  %v543_v50 = vsub.s32 0, %v541_v49  ;;  %v737_v23 = vadd.s32 3, %v566_v20  ;;  %v583_v26 = vand.u32 3, %v566_v20 }
  0x81   : > { %v544_v51 = vsel %vm542_vm12, %v543_v50, %v541_v49  ;;  %v738_v27 = vand.u32 3, %v737_v23  ;;  %vm585_vm2 = vcmp.eq.s32.totalorder %v583_v26, 0  ;;  %vm588_vm3 = vcmp.eq.s32.totalorder %v583_v26, 2 }
  0x82   : > { %v545_v52 = vclz %v544_v51  ;;  %vm584_vm6 = vcmp.lt.s32.totalorder %v583_v26, 2 }
  0x83   : > { %vm740_vm4 = vcmp.eq.s32.totalorder %v738_v27, 0  ;;  %vm743_vm5 = vcmp.eq.s32.totalorder %v738_v27, 2  ;;  %vm739_vm7 = vcmp.lt.s32.totalorder %v738_v27, 2 }
  0x84   : > { %v2094_v53 = vadd.s32 4294967294, %v545_v52 }
  0x86   : > { %vm2095_vm13 = vcmp.lt.s32.totalorder %v2094_v53, 0 }
  0x87   : > { %v548_v54 = vsel %vm2095_vm13, 0, %v2094_v53 }
  0x88   : > { %v549_v55 = vsub.s32 32, %v548_v54  ;;  %v550_v56 = vshll.u32 %v541_v49, %v548_v54  ;;  %v553_v57 = vsub.s32 4294967266, %v548_v54 }
  0x8a   : > { %v551_v43 = vshrl.u32 %v533_v25, %v549_v55  ;;  %v554_v58 = vadd.s32 127, %v553_v57  ;;  %v3081_v55 = vmov 0.0  }
  0x8c   : > { %v552_v59 = vor.u32 %v551_v43, %v550_v56  ;;  %v555_v60 = vshll.u32 %v554_v58, 23  ;;  %v3083_v56 = vmov 0.0  }
  0x8e   : > { %v556_v62 = vor.u32 4788187, %v555_v60  ;;  %v559_v63 = vcvt.s32.f32 %v552_v59 }
  0x90   : > { %v557_v2 = vand.u32 2147483647, %v556_v62 }
  0x92   : > { %v560_v3 = vmul.f32 %v559_v63, %v557_v2 }
  0x94   : > { %v561_v4 = vxor.u32 2147483648, %v560_v3 }
  0x96   : > { %v562_v5 = vsel %vm441_vm14, %v561_v4, %v560_v3 }
  0x97   : > { %v565_v6 = vsel %vm440_vm15, %v3001_v15, %v562_v5 }
  0x98   : > { %v567_v7 = vmul.f32 %v565_v6, %v565_v6 }
  0x9a   : > { %v575_v8 = vmul.f32 -0.00019511016, %v567_v7  ;;  %v568_v9 = vmul.f32 -0.001358992, %v567_v7 }
  0x9c   : > { %v576_v10 = vadd.f32 0.008332121, %v575_v8  ;;  %v569_v11 = vadd.f32 0.041655596, %v568_v9 }
  0x9e   : > { %v577_v0 = vmul.f32 %v576_v10, %v567_v7  ;;  %v570_v13 = vmul.f32 %v569_v11, %v567_v7 }
  0xa0   : > { %v578_v14 = vadd.f32 -0.16666654, %v577_v0  ;;  %v571_v17 = vadd.f32 -0.4999988, %v570_v13 }
  0xa2   : > { %v579_v19 = vmul.f32 %v578_v14, %v567_v7  ;;  %v572_v21 = vmul.f32 %v571_v17, %v567_v7 }
  0xa4   : > { %v580_v22 = vadd.f32 1.0, %v579_v19  ;;  %v573_v18 = vadd.f32 1.0, %v572_v21 }
  0xa6   : > { %v581_v24 = vmul.f32 %v580_v22, %v565_v6  ;;  %v589_v29 = vxor.u32 2147483648, %v573_v18 }
  0xa8   : > { %v586_v28 = vxor.u32 2147483648, %v581_v24  ;;  %v590_v31 = vsel %vm588_vm3, %v589_v29, %v581_v24  ;;  %v745_v33 = vsel %vm743_vm5, %v589_v29, %v581_v24 }
  0xaa   : > { %v587_v30 = vsel %vm585_vm2, %v573_v18, %v586_v28  ;;  %v742_v32 = vsel %vm740_vm4, %v573_v18, %v586_v28 }
  0xab   : > { %v591_v34 = vsel %vm584_vm6, %v587_v30, %v590_v31  ;;  %v746_v35 = vsel %vm739_vm7, %v742_v32, %v745_v33 }
  0xac   : > { %v3053_v36 = vsel %vm582_vm8, nan, %v591_v34  ;;  %v3055_v37 = vsel %vm582_vm8, nan, %v746_v35 }
  0xc5   : > { %v773_v38 = vpop.f32.mrf.mxu0 }
  0xc6   : > { %v793_v39 = vpop.f32.mrf.mxu1  ;;  %v3058_v40 = vmul.f32 %v773_v38, %v3053_v36  ;;  %v3061_v41 = vmul.f32 %v773_v38, %v3055_v37 }
  0xc7   : > { %v816_v42 = vmul.f32 %v793_v39, %v3053_v36  ;;  %v817_v44 = vsub.f32 0.0, %v793_v39 }
  0xc8   : > { %v834_v15 = vpack.c.bf16 %v3058_v40, %v3058_v40  ;;  %v835_v46 = vpack.c.bf16 %v3061_v41, %v3061_v41  ;;  %v3070_v45 = vadd.f32 %v3061_v41, %v3058_v40 }
  0xc9   : > { %v818_v47 = vmul.f32 %v817_v44, %v3055_v37  ;;  %v819_v48 = vpack.c.bf16 %v816_v42, %v816_v42 }
  0xca   : > { %v837_v49 = vpack.c.bf16 %v3070_v45, %v3070_v45 }
  0xcb   : > { %v826_v50 = vpack.c.bf16 %v818_v47, %v818_v47  ;;  %825 = vst.msk [vmem:[#allocation2] sm:$0xf] %vm824_vm9, %v819_v48 }
  0xcc   : > { %v810_v51 = vpop.f32.mrf.mxu2 }
  0xcd   : > { %829 = vst.msk [vmem:[#allocation3] sm:$0xf] %vm824_vm9, %v826_v50  ;;  %v830_v52 = vpack.c.bf16 %v810_v51, %v810_v51  ;;  %v775_v53 = vpop.f32.mrf.mxu0 }
  0xce   : > { %v795_v25 = vpop.f32.mrf.mxu1 }
  0xcf   : > { %833 = vst.msk [vmem:[#allocation4] sm:$0xf] %vm824_vm9, %v830_v52 }
  0xd4   : > { %v812_v54 = vpop.f32.mrf.mxu2 }
  0xd5 LB: >> { %s2102_s29 = sshll.u32 %s2737_s28, 3  ;;  %s923_s24 = ssub.s32 0, %s2737_s28  ;;  %v931_v11 = vstv %s2987_s20  ;;  %s2737_s28 = sphi %s3085_s28, %s842_s28   ;;  %v2733_v56 = vphi %v3083_v56, %v3453_v56   ;;  %v2729_v55 = vphi %v3081_v55, %v3452_v55  }
  0xd6   : >> { %s848_s30 = sshra.s32 %s2102_s29, 3  ;;  %s2109_s22 = sshll.u32 %s923_s24, 3 }
  0xd7   : >> { %s2103_s16 = sshll.u32 %s848_s30, 2  ;;  %v925_v4 = vstv %s2109_s22  ;;  %s842_s28 = sadd.s32 1, %s2737_s28  }
  0xd8   : >> { %s851_s19 = scalar_lea.vmem [#allocation2], %s2103_s16  ;;  %s854_s17 = scalar_lea.vmem [#allocation3], %s2103_s16  ;;  %v926_v5 = vadd.s32 %v925_v4, %v2990_v1 }
  0xd9   : >> { %v852_v57 = vld [vmem:[%s851_s19] sm:$0xf]  ;;  %s857_s15 = scalar_lea.vmem [#allocation4], %s2103_s16  ;;  %p841_p1 = scmp.ge.s32.totalorder %s842_s28, 1 }
  0xda   : >> { %v855_v43 = vld [vmem:[%s854_s17] sm:$0xf]  ;;  %v863_v58 = vsel %vm756_vm1, %v852_v57, 0  ;;  %v897_v59 = vunpack.c.l.bf16 %v852_v57  ;;  %v927_v8 = vsub.s32 %v926_v5, %v3046_v61  ;;  %v1033_v47 = vld [vmem:[#allocation15 + $0x4] sm:$0xf] (%p841_p1)  ;;  %s2788_s5 = smov (%p841_p1), 120  }
  0xdb   : >> { %v882_v60 = vsel %vm756_vm1, %v855_v43, 0  ;;  %v898_v62 = vunpack.c.l.bf16 %v855_v43  ;;  %872 = vmatpush.bf16.xpose.msra.mxu0 %v863_v58  ;;  %v858_v6 = vld [vmem:[%s857_s15] sm:$0xf]  ;;  %1051 = vrot.lane.b32.xlu1 (%p841_p1), %v3053_v36, %s2788_s5  ;;  %s3129_s4 = sld [smem:[#allocation6 + $0x1]] (%p841_p1)  ;;  %v1035_v40 = vsel (%p841_p1), %vm760_vm0, %v1033_v47, 0  ;;  %v980_v41 = vld [vmem:[%s2965_s6] sm:$0xff] (%p841_p1) }
  0xdc   : >> { %891 = vmatpush.bf16.xpose.msra.mxu1 %v882_v60  ;;  %v942_v7 = vsel %vm760_vm0, %v858_v6, 0  ;;  %v928_v9 = vcvt.s32.f32 %v927_v8  ;;  %v982_v38 = vld [vmem:[%s2973_s18] sm:$0xff] (%p841_p1)  ;;  %s2789_s0 = smov (%p841_p1), 8   ;;  %vm1068_vm11 = vcmask (%p841_p1), 126016   ;;  %s3159_s12 = smov (%p841_p1), 0  }
  0xdd   : >> { %v899_v63 = vadd.f32 %v898_v62, %v897_v59  ;;  %951 = vmatpush.bf16.msra.mxu3 %v942_v7  ;;  %v1009_v39 = vld [vmem:[#allocation13 + $0x4] sm:$0xf] (%p841_p1)  ;;  %v983_v42 = vpack.c.bf16 (%p841_p1), %v982_v38, %v982_v38 }
  0xde   : >> { %v930_v10 = vmax.f32 %v928_v9, 0.0  ;;  %vm929_vm10 = vcmp.ge.f32.partialorder %v928_v9, 0.0  ;;  %v1017_v44 = vsel (%p841_p1), %vm760_vm0, %v1009_v39, 0 }
  0xdf   : >> { %v900_v2 = vpack.c.bf16 %v899_v63, %v899_v63  ;;  %1011 = vrot.lane.b32.xlu0 (%p841_p1), %v983_v42, %s2788_s5 }
  0xe0   : >> { %v932_v0 = vmul.f32 %v931_v11, %v930_v10  ;;  %v3155_v10 = vmov (%p841_p1), 0.0   ;;  %v3157_v11 = vmov (%p841_p1), 0.0  }
  0xe1   : >> { %v905_v3 = vsel %vm756_vm1, %v900_v2, 0  ;;  %970 = vmatpush.bf16.msrb.mxu3 %v942_v7 }
  0xe2   : >> { %914 = vmatpush.bf16.xpose.msra.mxu2 %v905_v3  ;;  %2106 = vmatmul.msk.bf16.vlgmr.msra.gmra.mxu0 %vm756_vm1, %v834_v15  ;;  %v933_v12 = vmul.f32 1.442695, %v932_v0  ;;  %v981_v15 = vpack.c.bf16 (%p841_p1), %v980_v41, %v980_v41 }
  0xe3   : >> { %2107 = vmatmul.msk.bf16.vlgmr.msra.gmra.mxu1 %vm756_vm1, %v835_v46  ;;  %1056 = vrot.lane.b32.xlu1 (%p841_p1), %v3055_v37, %s2788_s5  ;;  %v985_v46 = vld [vmem:[#allocation12 + $0x4] sm:$0xf] (%p841_p1) }
  0xe4   : >> { %2379 = vpow2.f32 %v933_v12  ;;  %1026 = vmatpush.bf16.msra.mxu1 (%p841_p1), %v1017_v44  ;;  %v993_v45 = vsel (%p841_p1), %vm760_vm0, %v985_v46, 0 }
  0xe5   : > { %1002 = vmatpush.bf16.msra.mxu0 (%p841_p1), %v993_v45 }
  0xe7   : > { %987 = vrot.lane.b32.xlu0 (%p841_p1), %v981_v15, %s2788_s5 }
  0xe9   : >> { %2108 = vmatmul.msk.bf16.vlgmr.msra.gmra.mxu2 %vm756_vm1, %v837_v49 }
  0xea   : >> { %v2380_v13 = vpop.eup %2379  ;;  %1044 = vmatpush.bf16.msra.mxu2 (%p841_p1), %v1035_v40 }
  0xeb   : >> { %v935_v17 = vsel %vm929_vm10, %v2380_v13, 0.0 }
 0x14d   : > { %v1052_v50 = vpop.permute.xlu1 (%p841_p1), %1051 }
 0x151   : > { %v1012_v48 = vpop.permute.xlu0 (%p841_p1), %1011 }
 0x152   : > { %2114 = vmatmul.msk.bf16.vlgmr.msra.gmra.mxu1 (%p841_p1), %vm756_vm1, %v1012_v48  ;;  %2115 = vmatmul.msk.bf16.vlgmr.msra.gmra.mxu2 (%p841_p1), %vm756_vm1, %v1012_v48 }
 0x155   : > { %v1057_v54 = vpop.permute.xlu1 (%p841_p1), %1056 }
 0x159   : > { %v988_v49 = vpop.permute.xlu0 (%p841_p1), %987 }
 0x15a   : > { %2113 = vmatmul.msk.bf16.vlgmr.msra.gmra.mxu0 (%p841_p1), %vm756_vm1, %v988_v49 }
 0x15f   : >> { %v874_v14 = vpop.f32.mrf.mxu0 }
 0x160   : >> { %v893_v16 = vpop.f32.mrf.mxu1 }
 0x161   : >> { %v920_v19 = vsub.f32 %v874_v14, %v893_v16 }
 0x163   : >> { %v936_v20 = vmul.f32 %v935_v17, %v920_v19 }
 0x165   : >> { %v937_v21 = vpack.c.bf16 %v936_v20, %v936_v20 }
 0x167   : >> { %2110 = vmatmul.msk.bf16.vlgmr.msra.gmra.mxu3 %vm756_vm1, %v937_v21  ;;  %v876_v22 = vpop.f32.mrf.mxu0 }
 0x168   : >> { %v895_v23 = vpop.f32.mrf.mxu1 }
 0x16c   : >> { %v916_v18 = vpop.f32.mrf.mxu2 }
 0x16d   : >> { %v921_v24 = vsub.f32 %v916_v18, %v874_v14 }
 0x16f   : >> { %v922_v26 = vsub.f32 %v921_v24, %v893_v16 }
 0x171   : >> { %v958_v27 = vmul.f32 %v935_v17, %v922_v26 }
 0x173   : >> { %v959_v29 = vpack.c.bf16 %v958_v27, %v958_v27 }
 0x174   : >> { %v918_v28 = vpop.f32.mrf.mxu2 }
 0x177   : >> { %2111 = vmatmul.msk.bf16.vlgmr.msrb.gmra.mxu3 %vm756_vm1, %v959_v29 }
 0x1cf   : > { %v1028_v51 = vpop.f32.mrf.mxu1 (%p841_p1) }
 0x1d0   : > { %v1060_v52 = vmul.f32 (%p841_p1), %v1052_v50, %v1028_v51  ;;  %v1061_v53 = vsub.f32 (%p841_p1), 0.0, %v1028_v51 }
 0x1d2   : > { %v1063_v25 = vpack.c.bf16 (%p841_p1), %v1060_v52, %v1060_v52 }
 0x1d4   : > { %1065 = vrot.lane.b32.xlu2 (%p841_p1), %v1063_v25, %s2789_s0 }
 0x1d7   : > { %v1030_v43 = vpop.f32.mrf.mxu1 (%p841_p1)  ;;  %v1004_v58 = vpop.f32.mrf.mxu0 (%p841_p1) }
 0x1d8   : > { %v3140_v59 = vmul.f32 (%p841_p1), %v1052_v50, %v1004_v58  ;;  %v3142_v60 = vmul.f32 (%p841_p1), %v1057_v54, %v1004_v58 }
 0x1da   : > { %v1082_v63 = vpack.c.bf16 (%p841_p1), %v3140_v59, %v3140_v59  ;;  %v1083_v2 = vpack.c.bf16 (%p841_p1), %v3142_v60, %v3142_v60  ;;  %v3150_v3 = vadd.f32 (%p841_p1), %v3142_v60, %v3140_v59 }
 0x1dc   : > { %v1085_v4 = vpack.c.bf16 (%p841_p1), %v3150_v3, %v3150_v3 }
 0x1df   : > { %v1006_v6 = vpop.f32.mrf.mxu0 (%p841_p1) }
 0x1ea   : >> { %v953_v30 = vpop.f32.mrf.mxu3 }
 0x1eb   : >> { %v957_v31 = vadd.f32 %v2733_v56, %v953_v30  }
 0x1ed   : >> { %v3453_v56 = vmov %v957_v31  ;;  %977 = vst.msk [vmem:[%s3076_s26] sm:$0xff] (%p841_p1), %vm756_vm1, %v957_v31 }
 0x1ee   : > { %v1062_v56 = vmul.f32 (%p841_p1), %v1061_v53, %v1057_v54 }
 0x1f0   : > { %v1070_v62 = vpack.c.bf16 (%p841_p1), %v1062_v56, %v1062_v56 }
 0x1f2   : >> { %v955_v32 = vpop.f32.mrf.mxu3  ;;  %1072 = vrot.lane.b32.xlu2 (%p841_p1), %v1070_v62, %s2789_s0 }
 0x1fa   : >> { %v972_v33 = vpop.f32.mrf.mxu3 }
 0x1fb   : >> { %v976_v34 = vadd.f32 %v2729_v55, %v972_v33  }
 0x1fd   : >> { %v3452_v55 = vmov %v976_v34  ;;  %978 = vst.msk [vmem:[%s3079_s27] sm:$0xff] (%p841_p1), %vm756_vm1, %v976_v34 }
 0x1fe   : > { %844 = sbr.rel (!%p841_p1) target bundleno = 213 (0xd5), region = 183  ;;  %v1046_v55 = vpop.f32.mrf.mxu2 (%p841_p1) }
 0x1ff   : > { %v1076_v57 = vpack.c.bf16 (%p841_p1), %v1046_v55, %v1046_v55 }
 0x201   : > { %1078 = vrot.lane.b32.xlu0 (%p841_p1), %v1076_v57, %s2789_s0 }
 0x202   : >> { %v974_v35 = vpop.f32.mrf.mxu3 }
 0x206   : > { %v1048_v5 = vpop.f32.mrf.mxu2 }
 0x22e   : > { %v1066_v7 = vpop.permute.xlu2 %1065 }
 0x22f   : > { %1069 = vst.msk [vmem:[#allocation2] sm:$0xf] %vm1068_vm11, %v1066_v7 }
 0x24c   : > { %v1073_v8 = vpop.permute.xlu2 %1072 }
 0x24d   : > { %1075 = vst.msk [vmem:[#allocation3] sm:$0xf] %vm1068_vm11, %v1073_v8 }
 0x273   : > { %v1079_v9 = vpop.permute.xlu0 %1078 }
 0x274   : > { %1081 = vst.msk [vmem:[#allocation4] sm:$0xf] %vm1068_vm11, %v1079_v9 }
 0x275 LB: >> { %s2116_s20 = sshll.u32 %s2749_s12, 3  ;;  %s2790_s30 = smov 120   ;;  %v1191_v44 = vstv %s3129_s4  ;;  %s2749_s12 = sphi %s3159_s12, %s1089_s12   ;;  %v2745_v11 = vphi %v3157_v11, %v3455_v11   ;;  %v2741_v10 = vphi %v3155_v10, %v3454_v10  }
 0x276   : >> { %s1095_s14 = sshra.s32 %s2116_s20, 3  ;;  %s1183_s19 = ssub.s32 0, %s2749_s12 }
 0x277   : >> { %s2117_s21 = sshll.u32 %s1095_s14, 2  ;;  %s2123_s17 = sshll.u32 %s1183_s19, 3 }
 0x278   : >> { %s1098_s28 = scalar_lea.vmem [#allocation2], %s2117_s21  ;;  %s1101_s29 = scalar_lea.vmem [#allocation3], %s2117_s21  ;;  %v1185_v32 = vstv %s2123_s17 }
 0x279   : >> { %v1099_v0 = vld [vmem:[%s1098_s28] sm:$0xf]  ;;  %s1104_s16 = scalar_lea.vmem [#allocation4], %s2117_s21  ;;  %v1186_v33 = vadd.s32 %v1185_v32, %v2990_v1  ;;  %s1089_s12 = sadd.s32 1, %s2749_s12  }
 0x27a   : >> { %v1102_v12 = vld [vmem:[%s1101_s29] sm:$0xf]  ;;  %v1107_v13 = vunpack.c.l.b16 %v1099_v0  ;;  %v1154_v14 = vunpack.c.l.bf16 %v1099_v0  ;;  %p1088_p3 = scmp.ge.s32.totalorder %s1089_s12, 1 }
 0x27b   : >> { %v1155_v16 = vunpack.c.l.bf16 %v1102_v12  ;;  %v1131_v21 = vunpack.c.l.b16 %v1102_v12  ;;  %v1105_v23 = vld [vmem:[%s1104_s16] sm:$0xf]  ;;  %v1187_v38 = vsub.s32 %v1186_v33, %v3046_v61  ;;  %v1283_v9 = vld [vmem:[#allocation13 + $0x8] sm:$0xf] (%p1088_p3)  ;;  %v1307_v12 = vld [vmem:[#allocation15 + $0x8] sm:$0xf] (%p1088_p3) }
 0x27c   : >> { %v1108_v17 = vpack.c.b16 %v1107_v13, %v1107_v13  ;;  %v1199_v18 = vunpack.c.l.b16 %v1105_v23  ;;  %v1256_v8 = vld [vmem:[%s2973_s18] sm:$0xff] (%p1088_p3)  ;;  %v1291_v0 = vsel (%p1088_p3), %vm760_vm0, %v1283_v9, 0  ;;  %s2791_s24 = smov (%p1088_p3), 112   ;;  %s3206_s22 = sld [smem:[#allocation6 + $0x2]] (%p1088_p3)  ;;  %v1309_v13 = vsel (%p1088_p3), %vm760_vm0, %v1307_v12, 0  ;;  %v1254_v59 = vld [vmem:[%s2965_s6] sm:$0xff] (%p1088_p3) }
 0x27d   : >> { %v1156_v19 = vadd.f32 %v1155_v16, %v1154_v14  ;;  %v1132_v22 = vpack.c.b16 %v1131_v21, %v1131_v21  ;;  %v1188_v39 = vcvt.s32.f32 %v1187_v38  ;;  %v1255_v60 = vpack.c.bf16 (%p1088_p3), %v1254_v59, %v1254_v59  ;;  %s2792_s15 = smov (%p1088_p3), 16   ;;  %s3239_s5 = smov (%p1088_p3), 0  }
 0x27e   : >> { %1109 = vrot.lane.b32.xlu0 %v1108_v17, %s2790_s30  ;;  %v1200_v24 = vpack.c.b16 %v1199_v18, %v1199_v18  ;;  %vm1246_vm13 = vcmask (%p1088_p3), 130112   ;;  %vm1340_vm14 = vcmask (%p1088_p3), 191616  }
 0x27f   : >> { %v1157_v20 = vpack.c.bf16 %v1156_v19, %v1156_v19  ;;  %v1190_v42 = vmax.f32 %v1188_v39, 0.0  ;;  %vm1189_vm12 = vcmp.ge.f32.partialorder %v1188_v39, 0.0 }
 0x281   : >> { %1159 = vrot.lane.b32.xlu1 %v1157_v20, %s2790_s30  ;;  %v1192_v47 = vmul.f32 %v1191_v44, %v1190_v42 }
 0x283   : >> { %v1193_v40 = vmul.f32 1.442695, %v1192_v47  ;;  %v3235_v47 = vmov (%p1088_p3), 0.0  }
 0x285   : >> { %2381 = vpow2.f32 %v1193_v40  ;;  %v3237_v40 = vmov (%p1088_p3), 0.0  }
 0x286   : >> { %1133 = vrot.lane.b32.xlu0 %v1132_v22, %s2790_s30 }
 0x289   : >> { %1201 = vrot.lane.b32.xlu1 %v1200_v24, %s2790_s30 }
 0x28b   : >> { %v2382_v15 = vpop.eup %2381 }
 0x28c   : >> { %v1195_v48 = vsel %vm1189_vm12, %v2382_v15, 0.0 }
 0x291   : > { %1324 = vrot.lane.b32.xlu1 (%p1088_p3), %v3053_v36, %s2791_s24 }
 0x299   : > { %1328 = vrot.lane.b32.xlu1 (%p1088_p3), %v3055_v37, %s2791_s24 }
 0x2f0   : >> { %v1110_v26 = vpop.permute.xlu0 %1109 }
 0x2f1   : >> { %v1115_v27 = vsel %vm756_vm1, %v1110_v26, 0 }
 0x2f2   : >> { %1124 = vmatpush.bf16.xpose.msra.mxu0 %v1115_v27 }
 0x2f3   : >> { %v1160_v28 = vpop.permute.xlu1 %1159 }
 0x2f4   : >> { %v1165_v29 = vsel %vm756_vm1, %v1160_v28, 0 }
 0x2f5   : >> { %1174 = vmatpush.bf16.xpose.msra.mxu2 %v1165_v29 }
 0x2f8   : >> { %v1134_v30 = vpop.permute.xlu0 %1133 }
 0x2f9   : >> { %2120 = vmatmul.msk.bf16.vlgmr.msra.gmra.mxu0 %vm756_vm1, %v1082_v63  ;;  %v1139_v31 = vsel %vm756_vm1, %v1134_v30, 0  ;;  %v1259_v63 = vld [vmem:[#allocation12 + $0x8] sm:$0xf] (%p1088_p3) }
 0x2fa   : >> { %1148 = vmatpush.bf16.xpose.msra.mxu1 %v1139_v31 }
 0x2fb   : >> { %v1202_v34 = vpop.permute.xlu1 %1201 }
 0x2fc   : >> { %2122 = vmatmul.msk.bf16.vlgmr.msra.gmra.mxu2 %vm756_vm1, %v1085_v4  ;;  %v1207_v35 = vsel %vm760_vm0, %v1202_v34, 0 }
 0x2fd   : >> { %1216 = vmatpush.bf16.msra.mxu3 %v1207_v35  ;;  %1318 = vmatpush.bf16.msra.mxu2 (%p1088_p3), %v1309_v13 }
 0x301   : >> { %2121 = vmatmul.msk.bf16.vlgmr.msra.gmra.mxu1 %vm756_vm1, %v1083_v2  ;;  %1235 = vmatpush.bf16.msrb.mxu3 %v1207_v35  ;;  %v1267_v2 = vsel (%p1088_p3), %vm760_vm0, %v1259_v63, 0 }
 0x302   : > { %1300 = vmatpush.bf16.msra.mxu1 (%p1088_p3), %v1291_v0  ;;  %1276 = vmatpush.bf16.msra.mxu0 (%p1088_p3), %v1267_v2 }
 0x303   : > { %v1325_v14 = vpop.permute.xlu1 (%p1088_p3), %1324 }
 0x30b   : > { %v1329_v19 = vpop.permute.xlu1 (%p1088_p3), %1328 }
 0x376   : >> { %v1126_v41 = vpop.f32.mrf.mxu0 }
 0x37e   : >> { %v1128_v46 = vpop.f32.mrf.mxu0  ;;  %v1150_v45 = vpop.f32.mrf.mxu1 }
 0x37f   : >> { %v1180_v49 = vsub.f32 %v1126_v41, %v1150_v45  ;;  %v1176_v50 = vpop.f32.mrf.mxu2 }
 0x380   : >> { %v1181_v25 = vsub.f32 %v1176_v50, %v1126_v41 }
 0x381   : >> { %v1196_v51 = vmul.f32 %v1195_v48, %v1180_v49 }
 0x382   : >> { %v1182_v55 = vsub.f32 %v1181_v25, %v1150_v45 }
 0x383   : >> { %v1197_v52 = vpack.c.bf16 %v1196_v51, %v1196_v51 }
 0x384   : >> { %v1223_v56 = vmul.f32 %v1195_v48, %v1182_v55 }
 0x385   : >> { %2124 = vmatmul.msk.bf16.vlgmr.msra.gmra.mxu3 %vm756_vm1, %v1197_v52 }
 0x386   : >> { %v1152_v53 = vpop.f32.mrf.mxu1  ;;  %v1224_v57 = vpack.c.bf16 %v1223_v56, %v1223_v56 }
 0x387   : >> { %v1178_v54 = vpop.f32.mrf.mxu2 }
 0x395   : >> { %2125 = vmatmul.msk.bf16.vlgmr.msrb.gmra.mxu3 %vm756_vm1, %v1224_v57 }
 0x408   : >> { %v1218_v43 = vpop.f32.mrf.mxu3 }
 0x409   : >> { %v1222_v58 = vadd.f32 %v2745_v11, %v1218_v43  }
 0x40b   : >> { %v3455_v11 = vmov %v1222_v58  ;;  %1243 = vrot.lane.b32.xlu2 (%p1088_p3), %v1222_v58, %s2789_s0 }
 0x40c   : > { %v1257_v11 = vpack.c.bf16 (%p1088_p3), %v1256_v8, %v1256_v8 }
 0x40e   : > { %1285 = vrot.lane.b32.xlu0 (%p1088_p3), %v1257_v11, %s2791_s24 }
 0x410   : >> { %v1220_v62 = vpop.f32.mrf.mxu3 }
 0x416   : > { %1261 = vrot.lane.b32.xlu0 (%p1088_p3), %v1255_v60, %s2791_s24 }
 0x418   : >> { %v1237_v5 = vpop.f32.mrf.mxu3 }
 0x419   : >> { %v1241_v6 = vadd.f32 %v2741_v10, %v1237_v5  }
 0x41b   : >> { %v3454_v10 = vmov %v1241_v6  ;;  %1249 = vrot.lane.b32.xlu2 (%p1088_p3), %v1241_v6, %s2789_s0 }
 0x41c   : > { %1091 = sbr.rel (!%p1088_p3) target bundleno = 629 (0x275), region = 194 }
 0x420   : >> { %v1239_v7 = vpop.f32.mrf.mxu3 }
 0x465   : > { %v1244_v10 = vpop.permute.xlu2 %1243 }
 0x466   : > { %1247 = vst.msk [vmem:[%s3076_s26] sm:$0xff] %vm1246_vm13, %v1244_v10 }
 0x475   : > { %v1250_v16 = vpop.permute.xlu2 %1249 }
 0x476   : > { %1252 = vst.msk [vmem:[%s3079_s27] sm:$0xff] %vm1246_vm13, %v1250_v16 }
 0x480   : > { %v1286_v3 = vpop.permute.xlu0 %1285 }
 0x481   : > { %2128 = vmatmul.msk.bf16.vlgmr.msra.gmra.mxu1 %vm756_vm1, %v1286_v3  ;;  %2129 = vmatmul.msk.bf16.vlgmr.msra.gmra.mxu2 %vm756_vm1, %v1286_v3 }
 0x488   : > { %v1262_v4 = vpop.permute.xlu0 %1261 }
 0x489   : > { %2127 = vmatmul.msk.bf16.vlgmr.msra.gmra.mxu0 %vm756_vm1, %v1262_v4 }
 0x4fe   : > { %v1302_v17 = vpop.f32.mrf.mxu1 }
 0x4ff   : > { %v1332_v20 = vmul.f32 %v1325_v14, %v1302_v17  ;;  %v1333_v21 = vsub.f32 0.0, %v1302_v17 }
 0x501   : > { %v1335_v22 = vpack.c.bf16 %v1332_v20, %v1332_v20  ;;  %v1334_v23 = vmul.f32 %v1333_v21, %v1329_v19 }
 0x503   : > { %v1342_v18 = vpack.c.bf16 %v1334_v23, %v1334_v23  ;;  %1337 = vrot.lane.b32.xlu0 %v1335_v22, %s2792_s15 }
 0x504   : > { %v1320_v24 = vpop.f32.mrf.mxu2 }
 0x505   : > { %v1348_v26 = vpack.c.bf16 %v1320_v24, %v1320_v24  ;;  %1344 = vrot.lane.b32.xlu1 %v1342_v18, %s2792_s15 }
 0x506   : > { %v1278_v27 = vpop.f32.mrf.mxu0  ;;  %v1304_v28 = vpop.f32.mrf.mxu1 }
 0x507   : > { %v3220_v29 = vmul.f32 %v1325_v14, %v1278_v27  ;;  %v3222_v30 = vmul.f32 %v1329_v19, %v1278_v27  ;;  %1350 = vrot.lane.b32.xlu2 %v1348_v26, %s2792_s15 }
 0x509   : > { %v1354_v31 = vpack.c.bf16 %v3220_v29, %v3220_v29  ;;  %v1355_v32 = vpack.c.bf16 %v3222_v30, %v3222_v30  ;;  %v3231_v33 = vadd.f32 %v3222_v30, %v3220_v29 }
 0x50b   : > { %v1357_v34 = vpack.c.bf16 %v3231_v33, %v3231_v33 }
 0x50c   : > { %v1322_v35 = vpop.f32.mrf.mxu2 }
 0x50e   : > { %v1280_v38 = vpop.f32.mrf.mxu0 }
 0x561   : > { %v1351_v39 = vpop.permute.xlu2 %1350 }
 0x562   : > { %1353 = vst.msk [vmem:[#allocation4] sm:$0xf] %vm1340_vm14, %v1351_v39 }
 0x575   : > { %v1338_v42 = vpop.permute.xlu0 %1337 }
 0x576   : > { %1341 = vst.msk [vmem:[#allocation2] sm:$0xf] %vm1340_vm14, %v1338_v42 }
 0x577   : > { %v1345_v44 = vpop.permute.xlu1 %1344 }
 0x578   : > { %1347 = vst.msk [vmem:[#allocation3] sm:$0xf] %vm1340_vm14, %v1345_v44 }
 0x579 LB: >> { %s2130_s4 = sshll.u32 %s2761_s5, 3  ;;  %s2793_s21 = smov 112   ;;  %v1463_v13 = vstv %s3206_s22  ;;  %s2761_s5 = sphi %s3239_s5, %s1361_s5   ;;  %v2757_v40 = vphi %v3237_v40, %v3457_v40   ;;  %v2753_v47 = vphi %v3235_v47, %v3456_v47  }
 0x57a   : >> { %s1367_s0 = sshra.s32 %s2130_s4, 3  ;;  %s1455_s29 = ssub.s32 0, %s2761_s5 }
 0x57b   : >> { %s2131_s12 = sshll.u32 %s1367_s0, 2  ;;  %s2137_s30 = sshll.u32 %s1455_s29, 3 }
 0x57c   : >> { %s1370_s20 = scalar_lea.vmem [#allocation2], %s2131_s12  ;;  %s1373_s14 = scalar_lea.vmem [#allocation3], %s2131_s12  ;;  %v1457_v6 = vstv %s2137_s30 }
 0x57d   : >> { %v1371_v41 = vld [vmem:[%s1370_s20] sm:$0xf]  ;;  %s1376_s28 = scalar_lea.vmem [#allocation4], %s2131_s12  ;;  %v1458_v7 = vadd.s32 %v1457_v6, %v2990_v1  ;;  %s1361_s5 = sadd.s32 1, %s2761_s5  }
 0x57e   : >> { %v1379_v46 = vunpack.c.l.b16 %v1371_v41  ;;  %v1426_v45 = vunpack.c.l.bf16 %v1371_v41  ;;  %v1377_v25 = vld [vmem:[%s1376_s28] sm:$0xf]  ;;  %p1360_p9 = scmp.ge.s32.totalorder %s1361_s5, 1 }
 0x57f   : >> { %v1374_v15 = vld [vmem:[%s1373_s14] sm:$0xf]  ;;  %v1471_v54 = vunpack.c.l.b16 %v1377_v25  ;;  %v1459_v11 = vsub.s32 %v1458_v7, %v3046_v61  ;;  %v1555_v44 = vld [vmem:[#allocation13 + $0xc] sm:$0xf] (%p1360_p9)  ;;  %s2794_s16 = smov (%p1360_p9), 104   ;;  %s3286_s19 = sld [smem:[#allocation6 + $0x3]] (%p1360_p9) }
 0x580   : >> { %v1427_v48 = vunpack.c.l.bf16 %v1374_v15  ;;  %v1380_v49 = vpack.c.b16 %v1379_v46, %v1379_v46  ;;  %v1403_v52 = vunpack.c.l.b16 %v1374_v15  ;;  %v1528_v42 = vld [vmem:[%s2973_s18] sm:$0xff] (%p1360_p9)  ;;  %v1563_v41 = vsel (%p1360_p9), %vm760_vm0, %v1555_v44, 0  ;;  %v1579_v15 = vld [vmem:[#allocation15 + $0xc] sm:$0xf] (%p1360_p9)  ;;  %s3319_s18 = smov (%p1360_p9), 0  }
 0x581   : >> { %v1472_v55 = vpack.c.b16 %v1471_v54, %v1471_v54  ;;  %v1460_v0 = vcvt.s32.f32 %v1459_v11  ;;  %v1581_v46 = vsel (%p1360_p9), %vm760_vm0, %v1579_v15, 0  ;;  %v1526_v29 = vld [vmem:[%s2965_s6] sm:$0xff] (%p1360_p9)  ;;  %vm1518_vm2 = vcmask (%p1360_p9), 195712   ;;  %s2795_s6 = smov (%p1360_p9), 24  }
 0x582   : >> { %v1428_v50 = vadd.f32 %v1427_v48, %v1426_v45  ;;  %1381 = vrot.lane.b32.xlu0 %v1380_v49, %s2793_s21  ;;  %v1404_v53 = vpack.c.b16 %v1403_v52, %v1403_v52  ;;  %v1527_v30 = vpack.c.bf16 (%p1360_p9), %v1526_v29, %v1526_v29  ;;  %vm1612_vm3 = vcmask (%p1360_p9), 257216  }
 0x583   : >> { %v1462_v12 = vmax.f32 %v1460_v0, 0.0  ;;  %vm1461_vm15 = vcmp.ge.f32.partialorder %v1460_v0, 0.0 }
 0x584   : >> { %v1429_v51 = vpack.c.bf16 %v1428_v50, %v1428_v50 }
 0x585   : >> { %v1464_v59 = vmul.f32 %v1463_v13, %v1462_v12  ;;  %v3315_v12 = vmov (%p1360_p9), 0.0   ;;  %v3317_v13 = vmov (%p1360_p9), 0.0  }
 0x586   : >> { %1431 = vrot.lane.b32.xlu1 %v1429_v51, %s2793_s21 }
 0x587   : >> { %v1465_v60 = vmul.f32 1.442695, %v1464_v59 }
 0x589   : >> { %2383 = vpow2.f32 %v1465_v60 }
 0x58a   : >> { %1405 = vrot.lane.b32.xlu0 %v1404_v53, %s2793_s21 }
 0x58e   : >> { %1473 = vrot.lane.b32.xlu1 %v1472_v55, %s2793_s21 }
 0x58f   : >> { %v2384_v2 = vpop.eup %2383 }
 0x590   : >> { %v1467_v10 = vsel %vm1461_vm15, %v2384_v2, 0.0 }
 0x596   : > { %1596 = vrot.lane.b32.xlu1 (%p1360_p9), %v3053_v36, %s2794_s16 }
 0x59e   : > { %1600 = vrot.lane.b32.xlu1 (%p1360_p9), %v3055_v37, %s2794_s16 }
 0x5f4   : >> { %v1382_v56 = vpop.permute.xlu0 %1381 }
 0x5f5   : >> { %v1387_v57 = vsel %vm756_vm1, %v1382_v56, 0 }
 0x5f6   : >> { %1396 = vmatpush.bf16.xpose.msra.mxu0 %v1387_v57 }
 0x5f8   : >> { %v1432_v43 = vpop.permute.xlu1 %1431 }
 0x5f9   : >> { %v1437_v58 = vsel %vm756_vm1, %v1432_v43, 0 }
 0x5fa   : >> { %1446 = vmatpush.bf16.xpose.msra.mxu2 %v1437_v58 }
 0x5fc   : >> { %v1406_v62 = vpop.permute.xlu0 %1405 }
 0x5fd   : >> { %2134 = vmatmul.msk.bf16.vlgmr.msra.gmra.mxu0 %vm756_vm1, %v1354_v31  ;;  %v1411_v5 = vsel %vm756_vm1, %v1406_v62, 0  ;;  %v1531_v31 = vld [vmem:[#allocation12 + $0xc] sm:$0xf] (%p1360_p9) }
 0x5fe   : >> { %1420 = vmatpush.bf16.xpose.msra.mxu1 %v1411_v5 }
 0x600   : >> { %v1474_v8 = vpop.permute.xlu1 %1473 }
 0x601   : >> { %2136 = vmatmul.msk.bf16.vlgmr.msra.gmra.mxu2 %vm756_vm1, %v1357_v34  ;;  %v1479_v9 = vsel %vm760_vm0, %v1474_v8, 0 }
 0x602   : >> { %1488 = vmatpush.bf16.msra.mxu3 %v1479_v9  ;;  %1590 = vmatpush.bf16.msra.mxu2 (%p1360_p9), %v1581_v46 }
 0x605   : >> { %2135 = vmatmul.msk.bf16.vlgmr.msra.gmra.mxu1 %vm756_vm1, %v1355_v32  ;;  %v1539_v32 = vsel (%p1360_p9), %vm760_vm0, %v1531_v31, 0 }
 0x606   : >> { %1507 = vmatpush.bf16.msrb.mxu3 %v1479_v9  ;;  %1572 = vmatpush.bf16.msra.mxu1 (%p1360_p9), %v1563_v41 }
 0x607   : > { %1548 = vmatpush.bf16.msra.mxu0 (%p1360_p9), %v1539_v32 }
 0x67a   : >> { %v1398_v63 = vpop.f32.mrf.mxu0 }
 0x682   : >> { %v1400_v3 = vpop.f32.mrf.mxu0  ;;  %v1422_v4 = vpop.f32.mrf.mxu1 }
 0x683   : >> { %v1452_v14 = vsub.f32 %v1398_v63, %v1422_v4 }
 0x684   : >> { %v1448_v16 = vpop.f32.mrf.mxu2 }
 0x685   : >> { %v1468_v17 = vmul.f32 %v1467_v10, %v1452_v14  ;;  %v1453_v21 = vsub.f32 %v1448_v16, %v1398_v63 }
 0x687   : >> { %v1469_v19 = vpack.c.bf16 %v1468_v17, %v1468_v17  ;;  %v1454_v23 = vsub.f32 %v1453_v21, %v1422_v4 }
 0x689   : >> { %2138 = vmatmul.msk.bf16.vlgmr.msra.gmra.mxu3 %vm756_vm1, %v1469_v19  ;;  %v1495_v18 = vmul.f32 %v1467_v10, %v1454_v23 }
 0x68a   : >> { %v1424_v20 = vpop.f32.mrf.mxu1 }
 0x68b   : >> { %v1496_v24 = vpack.c.bf16 %v1495_v18, %v1495_v18 }
 0x68c   : >> { %v1450_v22 = vpop.f32.mrf.mxu2 }
 0x699   : >> { %2139 = vmatmul.msk.bf16.vlgmr.msrb.gmra.mxu3 %vm756_vm1, %v1496_v24 }
 0x70c   : >> { %v1490_v26 = vpop.f32.mrf.mxu3 }
 0x70d   : >> { %v1494_v27 = vadd.f32 %v2757_v40, %v1490_v26  }
 0x70f   : >> { %v3457_v40 = vmov %v1494_v27  ;;  %1515 = vrot.lane.b32.xlu2 (%p1360_p9), %v1494_v27, %s2792_s15 }
 0x710   : > { %v1529_v40 = vpack.c.bf16 (%p1360_p9), %v1528_v42, %v1528_v42 }
 0x712   : > { %1557 = vrot.lane.b32.xlu0 (%p1360_p9), %v1529_v40, %s2794_s16 }
 0x714   : >> { %v1492_v28 = vpop.f32.mrf.mxu3 }
 0x71a   : > { %1533 = vrot.lane.b32.xlu0 (%p1360_p9), %v1527_v30, %s2794_s16 }
 0x71c   : >> { %v1509_v35 = vpop.f32.mrf.mxu3 }
 0x71d   : >> { %v1513_v38 = vadd.f32 %v2753_v47, %v1509_v35  }
 0x71f   : >> { %v3456_v47 = vmov %v1513_v38  ;;  %1521 = vrot.lane.b32.xlu2 (%p1360_p9), %v1513_v38, %s2792_s15 }
 0x720   : > { %1363 = sbr.rel (!%p1360_p9) target bundleno = 1401 (0x579), region = 205  ;;  %v1597_v47 = vpop.permute.xlu1 (%p1360_p9), %1596 }
 0x724   : >> { %v1511_v39 = vpop.f32.mrf.mxu3 }
 0x728   : > { %v1601_v48 = vpop.permute.xlu1 %1600 }
 0x769   : > { %v1516_v34 = vpop.permute.xlu2 %1515 }
 0x76a   : > { %1519 = vst.msk [vmem:[%s3076_s26] sm:$0xff] %vm1518_vm2, %v1516_v34 }
 0x779   : > { %v1522_v45 = vpop.permute.xlu2 %1521 }
 0x77a   : > { %1524 = vst.msk [vmem:[%s3079_s27] sm:$0xff] %vm1518_vm2, %v1522_v45 }
 0x784   : > { %v1558_v36 = vpop.permute.xlu0 %1557 }
 0x785   : > { %2142 = vmatmul.msk.bf16.vlgmr.msra.gmra.mxu1 %vm756_vm1, %v1558_v36  ;;  %2143 = vmatmul.msk.bf16.vlgmr.msra.gmra.mxu2 %vm756_vm1, %v1558_v36 }
 0x78c   : > { %v1534_v33 = vpop.permute.xlu0 %1533 }
 0x78d   : > { %2141 = vmatmul.msk.bf16.vlgmr.msra.gmra.mxu0 %vm756_vm1, %v1534_v33 }
 0x802   : > { %v1574_v37 = vpop.f32.mrf.mxu1 }
 0x803   : > { %v1604_v49 = vmul.f32 %v1597_v47, %v1574_v37  ;;  %v1605_v50 = vsub.f32 0.0, %v1574_v37 }
 0x805   : > { %v1607_v51 = vpack.c.bf16 %v1604_v49, %v1604_v49  ;;  %v1606_v52 = vmul.f32 %v1605_v50, %v1601_v48 }
 0x807   : > { %v1614_v53 = vpack.c.bf16 %v1606_v52, %v1606_v52  ;;  %1609 = vrot.lane.b32.xlu0 %v1607_v51, %s2795_s6 }
 0x808   : > { %v1592_v25 = vpop.f32.mrf.mxu2 }
 0x809   : > { %v1620_v54 = vpack.c.bf16 %v1592_v25, %v1592_v25  ;;  %1616 = vrot.lane.b32.xlu1 %v1614_v53, %s2795_s6 }
 0x80a   : > { %v1550_v55 = vpop.f32.mrf.mxu0  ;;  %v1576_v56 = vpop.f32.mrf.mxu1 }
 0x80b   : > { %v3300_v57 = vmul.f32 %v1597_v47, %v1550_v55  ;;  %v3302_v43 = vmul.f32 %v1601_v48, %v1550_v55  ;;  %1622 = vrot.lane.b32.xlu2 %v1620_v54, %s2795_s6 }
 0x80d   : > { %v1626_v58 = vpack.c.bf16 %v3300_v57, %v3300_v57  ;;  %v1627_v62 = vpack.c.bf16 %v3302_v43, %v3302_v43  ;;  %v3311_v5 = vadd.f32 %v3302_v43, %v3300_v57 }
 0x80f   : > { %v1629_v6 = vpack.c.bf16 %v3311_v5, %v3311_v5 }
 0x810   : > { %v1594_v7 = vpop.f32.mrf.mxu2 }
 0x812   : > { %v1552_v8 = vpop.f32.mrf.mxu0 }
 0x865   : > { %v1623_v9 = vpop.permute.xlu2 %1622 }
 0x866   : > { %1625 = vst.msk [vmem:[#allocation4] sm:$0xf] %vm1612_vm3, %v1623_v9 }
 0x879   : > { %v1610_v11 = vpop.permute.xlu0 %1609 }
 0x87a   : > { %1613 = vst.msk [vmem:[#allocation2] sm:$0xf] %vm1612_vm3, %v1610_v11 }
 0x87b   : > { %v1617_v0 = vpop.permute.xlu1 %1616 }
 0x87c   : > { %1619 = vst.msk [vmem:[#allocation3] sm:$0xf] %vm1612_vm3, %v1617_v0 }
 0x87d LB: >> { %s2144_s17 = sshll.u32 %s2773_s18, 3  ;;  %s2796_s4 = smov 104   ;;  %v1735_v41 = vstv %s3286_s19  ;;  %s2773_s18 = sphi %s3319_s18, %s1633_s18   ;;  %v2769_v13 = vphi %v3317_v13, %v3459_v13   ;;  %v2765_v12 = vphi %v3315_v12, %v3458_v12  }
 0x87e   : >> { %s1639_s24 = sshra.s32 %s2144_s17, 3  ;;  %s1727_s12 = ssub.s32 0, %s2773_s18 }
 0x87f   : >> { %s2145_s22 = sshll.u32 %s1639_s24, 2  ;;  %s2151_s20 = sshll.u32 %s1727_s12, 3 }
 0x880   : >> { %s1642_s15 = scalar_lea.vmem [#allocation2], %s2145_s22  ;;  %s1645_s5 = scalar_lea.vmem [#allocation3], %s2145_s22  ;;  %v1729_v28 = vstv %s2151_s20 }
 0x881   : >> { %v1643_v59 = vld [vmem:[%s1642_s15] sm:$0xf]  ;;  %s1648_s0 = scalar_lea.vmem [#allocation4], %s2145_s22  ;;  %v1730_v35 = vadd.s32 %v1729_v28, %v2990_v1  ;;  %s1633_s18 = sadd.s32 1, %s2773_s18  }
 0x882   : >> { %v1651_v63 = vunpack.c.l.b16 %v1643_v59  ;;  %v1698_v2 = vunpack.c.l.bf16 %v1643_v59  ;;  %v1649_v19 = vld [vmem:[%s1648_s0] sm:$0xf]  ;;  %p1632_p10 = scmp.ge.s32.totalorder %s1633_s18, 1 }
 0x883   : >> { %v1646_v60 = vld [vmem:[%s1645_s5] sm:$0xf]  ;;  %v1743_v20 = vunpack.c.l.b16 %v1649_v19  ;;  %v1731_v42 = vsub.s32 %v1730_v35, %v3046_v61  ;;  %s2156_s14 = sshll.u32 (%p1632_p10), %s2717_s11, 3  ;;  %s1816_s30 = sshll.u32 (%p1632_p10), %s3076_s26, 4  ;;  %vm1790_vm5 = vcmask (%p1632_p10), 261312   ;;  %s1817_s30 = int_to_ptr.vmem [resolvable:$true] %s1816_s30 }
 0x884   : >> { %v1699_v3 = vunpack.c.l.bf16 %v1646_v60  ;;  %v1652_v4 = vpack.c.b16 %v1651_v63, %v1651_v63  ;;  %v1675_v16 = vunpack.c.l.b16 %v1646_v60  ;;  %s1814_s29 = scalar_lea.hbm (%p1632_p10), %s3429_s7, %s2156_s14  ;;  %s1829_s17 = scalar_lea.hbm (%p1632_p10), %s3430_s8, %s2156_s14 }
 0x885   : >> { %v1744_v21 = vpack.c.b16 %v1743_v20, %v1743_v20  ;;  %v1732_v44 = vcvt.s32.f32 %v1731_v42  ;;  %s1818_s16 = sshll.u32 (%p1632_p10), %s1814_s29, 4  ;;  %s1798_s24 = scalar_lea.sflag (%p1632_p10), [#allocation9], %s2958_s23  ;;  %s1819_s16 = int_to_ptr.hbm [resolvable:$true] %s1818_s16 }
 0x886   : >> { %v1700_v10 = vadd.f32 %v1699_v3, %v1698_v2  ;;  %1653 = vrot.lane.b32.xlu0 %v1652_v4, %s2796_s4  ;;  %v1676_v17 = vpack.c.b16 %v1675_v16, %v1675_v16  ;;  %s2569_s5 = scalar_lea.hbm (%p1632_p10), %s3429_s7, 16 }
 0x887   : >> { %v1734_v40 = vmax.f32 %v1732_v44, 0.0  ;;  %vm1733_vm4 = vcmp.ge.f32.partialorder %v1732_v44, 0.0 }
 0x888   : >> { %v1701_v14 = vpack.c.bf16 %v1700_v10, %v1700_v10 }
 0x889   : >> { %v1736_v15 = vmul.f32 %v1735_v41, %v1734_v40 }
 0x88a   : >> { %1703 = vrot.lane.b32.xlu1 %v1701_v14, %s2796_s4 }
 0x88b   : >> { %v1737_v46 = vmul.f32 1.442695, %v1736_v15 }
 0x88d   : >> { %2385 = vpow2.f32 %v1737_v46 }
 0x88e   : >> { %1677 = vrot.lane.b32.xlu0 %v1676_v17, %s2796_s4 }
 0x892   : >> { %1745 = vrot.lane.b32.xlu1 %v1744_v21, %s2796_s4 }
 0x893   : >> { %v2386_v30 = vpop.eup %2385 }
 0x894   : >> { %v1739_v36 = vsel %vm1733_vm4, %v2386_v30, 0.0 }
 0x8f8   : >> { %v1654_v22 = vpop.permute.xlu0 %1653 }
 0x8f9   : >> { %v1659_v23 = vsel %vm756_vm1, %v1654_v22, 0 }
 0x8fa   : >> { %1668 = vmatpush.bf16.xpose.msra.mxu0 %v1659_v23 }
 0x8fc   : >> { %v1704_v18 = vpop.permute.xlu1 %1703 }
 0x8fd   : >> { %v1709_v24 = vsel %vm756_vm1, %v1704_v18, 0 }
 0x8fe   : >> { %1718 = vmatpush.bf16.xpose.msra.mxu2 %v1709_v24 }
 0x900   : >> { %v1678_v26 = vpop.permute.xlu0 %1677 }
 0x901   : >> { %2148 = vmatmul.msk.bf16.vlgmr.msra.gmra.mxu0 %vm756_vm1, %v1626_v58  ;;  %v1683_v27 = vsel %vm756_vm1, %v1678_v26, 0 }
 0x902   : >> { %1692 = vmatpush.bf16.xpose.msra.mxu1 %v1683_v27 }
 0x904   : >> { %v1746_v38 = vpop.permute.xlu1 %1745 }
 0x905   : >> { %2150 = vmatmul.msk.bf16.vlgmr.msra.gmra.mxu2 %vm756_vm1, %v1629_v6  ;;  %v1751_v39 = vsel %vm760_vm0, %v1746_v38, 0 }
 0x906   : >> { %1760 = vmatpush.bf16.msra.mxu3 %v1751_v39 }
 0x909   : >> { %2149 = vmatmul.msk.bf16.vlgmr.msra.gmra.mxu1 %vm756_vm1, %v1627_v62 }
 0x90a   : >> { %1779 = vmatpush.bf16.msrb.mxu3 %v1751_v39 }
 0x97e   : >> { %v1670_v29 = vpop.f32.mrf.mxu0 }
 0x986   : >> { %v1672_v31 = vpop.f32.mrf.mxu0  ;;  %v1694_v32 = vpop.f32.mrf.mxu1 }
 0x987   : >> { %v1724_v33 = vsub.f32 %v1670_v29, %v1694_v32 }
 0x988   : >> { %v1720_v34 = vpop.f32.mrf.mxu2 }
 0x989   : >> { %v1740_v47 = vmul.f32 %v1739_v36, %v1724_v33  ;;  %v1725_v48 = vsub.f32 %v1720_v34, %v1670_v29 }
 0x98b   : >> { %v1741_v45 = vpack.c.bf16 %v1740_v47, %v1740_v47  ;;  %v1726_v50 = vsub.f32 %v1725_v48, %v1694_v32 }
 0x98d   : >> { %2152 = vmatmul.msk.bf16.vlgmr.msra.gmra.mxu3 %vm756_vm1, %v1741_v45  ;;  %v1767_v51 = vmul.f32 %v1739_v36, %v1726_v50 }
 0x98e   : >> { %v1696_v37 = vpop.f32.mrf.mxu1 }
 0x98f   : >> { %v1768_v52 = vpack.c.bf16 %v1767_v51, %v1767_v51 }
 0x990   : >> { %v1722_v49 = vpop.f32.mrf.mxu2 }
 0x99d   : >> { %2153 = vmatmul.msk.bf16.vlgmr.msrb.gmra.mxu3 %vm756_vm1, %v1768_v52 }
 0xa10   : >> { %v1762_v53 = vpop.f32.mrf.mxu3 }
 0xa11   : >> { %v1766_v25 = vadd.f32 %v2769_v13, %v1762_v53  }
 0xa13   : >> { %v3459_v13 = vmov %v1766_v25  ;;  %1787 = vrot.lane.b32.xlu0 (%p1632_p10), %v1766_v25, %s2795_s6 }
 0xa18   : >> { %v1764_v54 = vpop.f32.mrf.mxu3 }
 0xa20   : >> { %v1781_v55 = vpop.f32.mrf.mxu3 }
 0xa21   : >> { %v1785_v56 = vadd.f32 %v2765_v12, %v1781_v55  }
 0xa23   : >> { %v3458_v12 = vmov %v1785_v56  ;;  %1793 = vrot.lane.b32.xlu0 (%p1632_p10), %v1785_v56, %s2795_s6  ;;  %s2563_s6 = sshra.s32 (%p1632_p10), %s1819_s16, 4  ;;  %s2564_s6 = int_to_ptr.hbm [resolvable:$true] %s2563_s6 }
 0xa24   : > { %1635 = sbr.rel (!%p1632_p10) target bundleno = 2173 (0x87d), region = 216  ;;  %s2565_s11 = scalar_lea.hbm (%p1632_p10), %s2564_s6, 8 }
 0xa25   : > { %p2566_p11 = scmp.ne.s32.totalorder (%p1632_p10), %s2564_s6, %s2565_s11  ;;  %p2570_p0 = scmp.lt.s32.totalorder (%p1632_p10), %s2564_s6, %s3429_s7 }
 0xa26   : > { %p2571_p2 = scmp.lt.s32.totalorder (%p1632_p10), %s2569_s5, %s2565_s11 }
 0xa27   : > { %p2567_p12 = pnand (%p1632_p10), %p2566_p11, %p2932_p4 }
 0xa28   : >> { %v1783_v7 = vpop.f32.mrf.mxu3  ;;  %p2572_p5 = por (%p1632_p10), %p2571_p2, %p2570_p0 }
 0xa29   : > { %p2568_p13 = pneg %p2567_p12 }
 0xa2b   : > { %p2573_p8 = pnand %p2572_p5, %p2568_p13 }
 0xa85   : > { %v1788_v8 = vpop.permute.xlu0 %1787 }
 0xa86   : > { %1791 = vst.msk [vmem:[%s3076_s26] sm:$0xff] %vm1790_vm5, %v1788_v8 }
 0xa87   : > { %2576 = shalt.err (!%p2573_p8)
}
 0xa88   : > { %2176 = dma.vmem_to_hbm [thread:$0]  (%p2932_p4), %s1817_s30, 128, %s1819_s16, %s1798_s24  }
 0xa89   : > { %s1831_s26 = sshll.u32 %s3079_s27, 4  ;;  %s1833_s12 = sshll.u32 %s1829_s17, 4  ;;  %s1832_s26 = int_to_ptr.vmem [resolvable:$true] %s1831_s26  ;;  %s1834_s12 = int_to_ptr.hbm [resolvable:$true] %s1833_s12 }
 0xa8a   : > { %s1803_s20 = scalar_lea.sflag [#allocation18], %s2958_s23  ;;  %s2591_s14 = sshra.s32 %s1834_s12, 4  ;;  %s2592_s14 = int_to_ptr.hbm [resolvable:$true] %s2591_s14 }
 0xa8b   : > { %s2593_s21 = scalar_lea.hbm %s2592_s14, 8  ;;  %s2597_s19 = scalar_lea.hbm %s3430_s8, 16 }
 0xa8c   : > { %p2594_p1 = scmp.ne.s32.totalorder %s2592_s14, %s2593_s21  ;;  %p2598_p10 = scmp.lt.s32.totalorder %s2592_s14, %s3430_s8 }
 0xa8d   : > { %p2599_p11 = scmp.lt.s32.totalorder %s2597_s19, %s2593_s21 }
 0xa8e   : > { %p2595_p3 = pnand %p2594_p1, %p2932_p4 }
 0xa8f   : > { %p2600_p12 = por %p2599_p11, %p2598_p10 }
 0xa90   : > { %p2596_p9 = pneg %p2595_p3 }
 0xa92   : > { %p2601_p13 = pnand %p2600_p12, %p2596_p9 }
 0xa95   : > { %v1794_v1 = vpop.permute.xlu0 %1793 }
 0xa96   : > { %1796 = vst.msk [vmem:[%s3079_s27] sm:$0xff] %vm1790_vm5, %v1794_v1 }
 0xa97   : > { %2604 = shalt.err (!%p2601_p13)
}
 0xa98   : > { %2177 = dma.vmem_to_hbm [thread:$0]  (%p2932_p4), %s1832_s26, 128, %s1834_s12, %s1803_s20  }
 0xa99 PF: > { %s1845_s27 = sand.u32 1, %s2705_s9   ;;  %p2198_p0 = pnand %p2080_p6, %p2940_p7 }
 0xa9a   : > { %s1846_s18 = scalar_lea.sflag [#allocation9], %s1845_s27 }
 0xa9b   : > { %p2199_p2 = pneg %p2198_p0 }
 0xa9d   : > { %2696 = dma.done.wait (%p2199_p2), %s1846_s18, 128  }
 0xa9e   : > { %2698 = vsyncadd (%p2199_p2), %s1846_s18, 4294967168  ;;  %s1856_s17 = scalar_lea.sflag [#allocation18], %s1845_s27 }
 0xa9f   : > { %2700 = dma.done.wait (%p2199_p2), %s1856_s17, 128  }
 0xaa0   : > { %2702 = vsyncadd (%p2199_p2), %s1856_s17, 4294967168  ;;  %s40_s13 = sadd.s32 1, %s2725_s13   ;;  %s3461_s25 = sld [smem:[#allocation26_spill]] }
 0xaa1   : > { %p37_p5 = scmp.ge.s32.totalorder %s40_s13, 4   ;;  %s3462_s0 = sld [smem:[#allocation29_spill]] }
 0xaa2   : > { %s3463_s11 = sld [smem:[#allocation27_spill]]  ;;  %s3465_s9 = smov %s2709_s10 }
 0xaa3   : > { %s3464_s12 = sld [smem:[#allocation28_spill]]  ;;  %39 = sbr.rel (!%p37_p5) target bundleno = 19 (0x13), region = 227 }
 0xaa6   : > { %s3466_s10 = smov %s3461_s25 }
 0xaa8   :  { %1862 = vsyncpa [#allocation8], 1 }
 0xaa9   :  { %1864 = vsyncpa [#allocation8 + $0x1], 1 }
 0xaaa   :  { %1865 = vsyncpa [#allocation11], 1 }
 0xaab   :  { %1867 = vsyncpa [#allocation11 + $0x1], 1 }
 0xaac   :  { %1868 = vsyncpa [#allocation14], 1 }
 0xaad   :  { %1869 = vsyncpa [#allocation9], 1 }
 0xaae   :  { %1871 = vsyncpa [#allocation9 + $0x1], 1 }
 0xaaf   :  { %1872 = vsyncpa [#allocation18], 1 }
 0xab0   :  { %1874 = vsyncpa [#allocation18 + $0x1], 1 }

// kernel: tpu_custom_call.1
= control target key start
LH: loop header
LB: loop body
LE: loop exit
PB: predicated region body
PF: predicated region fallthrough
CT: control target
= control target key end

     0   :  { %s2775_s30 = smov [#allocation6]   ;;  %s3422_s0 = inlined_call_operand.hbm [shape: f32[4], index: 0, kind: input, shape index: {}]   ;;  %s3423_s1 = inlined_call_operand.hbm [shape: f32[2,8,32], index: 1, kind: input, shape index: {}]   ;;  %s3424_s2 = inlined_call_operand.hbm [shape: f32[2,8,32], index: 2, kind: input, shape index: {}]   ;;  %s3425_s3 = inlined_call_operand.vmem [shape: f32[1,32], index: 3, kind: input, shape index: {}]   ;;  %s3426_s4 = inlined_call_operand.hbm [shape: bf16[4,8,8], index: 4, kind: input, shape index: {}]   ;;  %s3427_s5 = inlined_call_operand.hbm [shape: bf16[4,8,8], index: 5, kind: input, shape index: {}]   ;;  %s3428_s6 = inlined_call_operand.hbm [shape: bf16[4,8,8], index: 6, kind: input, shape index: {}]   ;;  %s3429_s7 = inlined_call_operand.hbm [shape: f32[2,8,32], index: 7, kind: output, shape index: {0}]   ;;  %s3430_s8 = inlined_call_operand.hbm [shape: f32[2,8,32], index: 8, kind: output, shape index: {1}]  }
   0x1   :  { %3435 = sst [smem:[#allocation31_spill]] %s3426_s4  ;;  %s15_s29 = sshll.u32 %s3422_s0, 4  ;;  %s16_s29 = int_to_ptr.hbm [resolvable:$true] %s15_s29 }
   0x2   :  { %3436 = sst [smem:[#allocation32_spill]] %s3427_s5 }
   0x3   :  { %3437 = sst [smem:[#allocation33_spill]] %s3428_s6 }
   0x4   :  { %18 = dma.hbm_to_smem %s16_s29, 16, %s2775_s30, [#allocation5] }
   0x5   :  { %2677 = dma.done.wait [#allocation5], 16 }
   0x6   :  { %2678 = vsyncadd [#allocation5], 4294967280 }
   0x7   :  { %21 = sfence }
   0x8   :  { %22 = vsyncpa [#allocation8], 0 }
   0x9   :  { %24 = vsyncpa [#allocation8 + $0x1], 0 }
   0xa   :  { %25 = vsyncpa [#allocation11], 0 }
   0xb   :  { %27 = vsyncpa [#allocation11 + $0x1], 0 }
   0xc   :  { %28 = vsyncpa [#allocation14], 0 }
   0xd   :  { %29 = vsyncpa [#allocation9], 0 }
   0xe   :  { %31 = vsyncpa [#allocation9 + $0x1], 0 }
   0xf   :  { %32 = vsyncpa [#allocation18], 0 }
  0x10   :  { %34 = vsyncpa [#allocation18 + $0x1], 0  ;;  %s2845_s9 = smov 0   ;;  %s2847_s10 = smov 0  }
  0x11   :  { %s2849_s0 = smov 0   ;;  %s2851_s11 = smov 0  }
  0x12   :  { %s2853_s12 = smov 0   ;;  %s2855_s13 = smov 0  }
  0x13 LB: > { %3438 = sst [smem:[#allocation26_spill]] %s2713_s0  ;;  %s2876_s14 = sadd.s32 4294967295, %s2725_s13   ;;  %s2725_s13 = sphi %s2855_s13, %s40_s13   ;;  %s2721_s12 = sphi %s2853_s12, %s3464_s12   ;;  %s2717_s11 = sphi %s2851_s11, %s3463_s11   ;;  %s2713_s0 = sphi %s2849_s0, %s3462_s0   ;;  %s2709_s10 = sphi %s2847_s10, %s3466_s10   ;;  %s2705_s9 = sphi %s2845_s9, %s3465_s9  }
  0x14   : > { %3439 = sst [smem:[#allocation27_spill]] %s2721_s12  ;;  %p2076_p0 = scmp.ge.s32.totalorder %s2725_s13, 1 }
  0x15   : > { %p75_p1 = scmp.eq.s32.totalorder %s2876_s14, 0  ;;  %p253_p2 = scmp.lt.s32.totalorder %s2725_s13, 3 }
  0x16   : > { %s3440_s4 = sld [smem:[#allocation31_spill]]  ;;  %s2776_s19 = smov [#allocation12]  }
  0x17   : > { %p2884_p3 = pnand %p2076_p0, %p253_p2  ;;  %s269_s20 = sshll.u32 %s2776_s19, 4  ;;  %s270_s20 = int_to_ptr.vmem [resolvable:$true] %s269_s20 }
  0x18   : > { %p2080_p6 = scmp.ge.s32.totalorder %s2725_s13, 2  ;;  %s3443_s5 = sld [smem:[#allocation32_spill]] }
  0x19   : > { %p2180_p4 = pneg %p2884_p3  ;;  %s2777_s25 = smov 64  }
  0x1a   : > { %s2778_s26 = smov 4   ;;  %s2779_s27 = smov [#allocation13]  }
  0x1b   : > { %p2892_p5 = pnand %p2180_p4, %p75_p1  ;;  %s283_s28 = sshll.u32 %s2779_s27, 4  ;;  %s284_s28 = int_to_ptr.vmem [resolvable:$true] %s283_s28 }
  0x1c   : > { %s267_s17 = sshll.u32 %s3440_s4, 4  ;;  %s3444_s6 = sld [smem:[#allocation33_spill]]  ;;  %s268_s17 = int_to_ptr.hbm [resolvable:$true] %s267_s17 }
  0x1d   : > { %2183 = dma.hbm_to_vmem [thread:$0]  (!%p2892_p5), %s268_s17, 256, %s270_s20, [#allocation11], %s2777_s25, %s2777_s25, %s2778_s26  }
  0x1e   : > { %s281_s24 = sshll.u32 %s3443_s5, 4  ;;  %s2780_s16 = smov [#allocation15]   ;;  %s282_s24 = int_to_ptr.hbm [resolvable:$true] %s281_s24 }
  0x1f   : > { %2186 = dma.hbm_to_vmem [thread:$0]  (!%p2892_p5), %s282_s24, 256, %s284_s28, [#allocation14], %s2777_s25, %s2777_s25, %s2778_s26  }
  0x20   : > { %s297_s19 = sshll.u32 %s2780_s16, 4  ;;  %s2075_s17 = sadd.s32 4294967294, %s2725_s13   ;;  %s298_s19 = int_to_ptr.vmem [resolvable:$true] %s297_s19 }
  0x21   : > { %s52_s20 = sadd.s32 1, %s2721_s12  ;;  %s61_s22 = sadd.s32 1, %s2713_s0 }
  0x22   : > { %s295_s15 = sshll.u32 %s3444_s6, 4  ;;  %p54_p7 = scmp.ge.s32.totalorder %s52_s20, 2  ;;  %s296_s15 = int_to_ptr.hbm [resolvable:$true] %s295_s15 }
  0x23   : > { %2189 = dma.hbm_to_vmem [thread:$0]  (!%p2892_p5), %s296_s15, 256, %s298_s19, [#allocation14], %s2777_s25, %s2777_s25, %s2778_s26  }
  0x24   : > { %p68_p8 = scmp.ne.s32.totalorder %s2713_s0, %s2709_s10  ;;  %p69_p9 = scmp.eq.s32.totalorder %s2725_s13, 0 }
  0x25   : > { %p74_p10 = scmp.ne.s32.totalorder %s2709_s10, %s2705_s9  ;;  %s3468_s20 = smov (%p54_p7, %s52_s20), 0 }
  0x26   : > { %3445 = sst [smem:[#allocation28_spill]] %s3468_s20  ;;  %p2919_p11 = por %p69_p9, %p68_p8 }
  0x27   : > { %p2925_p12 = por %p75_p1, %p74_p10  ;;  %s56_s24 = ssub.s32 %s2721_s12, %s3468_s20 }
  0x28   : > { %p212_p13 = scmp.eq.s32.totalorder %s2876_s14, 1  ;;  %p59_p0 = scmp.eq.s32.totalorder %s56_s24, 0 }
  0x29   : > { %p218_p2 = scmp.eq.s32.totalorder %s2075_s17, 1  ;;  %p2207_p5 = scmp.lt.s32.totalorder %s2725_s13, 2 }
  0x2a   : > { %p2932_p4 = por %p212_p13, %p68_p8  ;;  %s311_s28 = sand.u32 1, %s2713_s0  }
  0x2b   : > { %s2938_s26 = scalar_select %p59_p0, %s2713_s0, %s61_s22  }
  0x2c   : > { %p2940_p7 = por %p218_p2, %p74_p10  ;;  %s2081_s29 = sshll.u32 %s311_s28, 3 }
  0x2d   : > { %3449 = sst [smem:[#allocation29_spill]] %s2938_s26  ;;  %s2082_s30 = sshll.u32 %s2721_s12, 3 }
  0x2e   : > { %s3450_s27 = scalar_select %p2940_p7, 1, 0 }
  0x2f   : > { %s320_s19 = scalar_lea.hbm %s3423_s1, %s2082_s30  ;;  %s315_s17 = scalar_lea.vmem [#allocation7], %s2081_s29 }
  0x30   : > { %3451 = sst [smem:[#allocation30_spill]] %s3450_s27  ;;  %s324_s24 = sshll.u32 %s315_s17, 4  ;;  %s325_s24 = int_to_ptr.vmem [resolvable:$true] %s324_s24 }
  0x31   : > { %s322_s4 = sshll.u32 %s320_s19, 4  ;;  %p2191_p8 = pnand %p2207_p5, %p2919_p11  ;;  %s323_s4 = int_to_ptr.hbm [resolvable:$true] %s322_s4 }
  0x32   : > { %s340_s6 = scalar_lea.hbm %s3424_s2, %s2082_s30  ;;  %s331_s20 = sand.u32 1, %s2725_s13  }
  0x33   : > { %s312_s26 = scalar_lea.sflag [#allocation8], %s311_s28  ;;  %s342_s0 = sshll.u32 %s340_s6, 4  ;;  %s343_s0 = int_to_ptr.hbm [resolvable:$true] %s342_s0 }
  0x34   : > { %2193 = dma.hbm_to_vmem [thread:$0]  (!%p2191_p8), %s323_s4, 128, %s325_s24, %s312_s26  }
  0x35   : > { %s335_s12 = scalar_lea.vmem [#allocation10], %s2081_s29  ;;  %s332_s15 = scalar_lea.sflag [#allocation11], %s331_s20 }
  0x36   : > { %s344_s27 = sshll.u32 %s335_s12, 4  ;;  %353 = sbr.rel (%p2884_p3) target bundleno = 2713 (0xa99), region = 44  ;;  %s345_s27 = int_to_ptr.vmem [resolvable:$true] %s344_s27 }
  0x37   : > { %2196 = dma.hbm_to_vmem [thread:$0]  (!%p2191_p8), %s343_s0, 128, %s345_s27, %s332_s15  }
  0x38   : > { %s2958_s23 = sand.u32 (!%p2884_p3), 1, %s2709_s10  }
  0x39   : > { %s2961_s5 = sshll.u32 (!%p2884_p3), %s2958_s23, 3  ;;  %s356_s4 = scalar_lea.sflag (!%p2884_p3), [#allocation8], %s2958_s23 }
  0x3a   : > { %s2965_s6 = scalar_lea.vmem (!%p2884_p3), [#allocation7], %s2961_s5 }
  0x3b   : > { %2680 = dma.done.wait (%p2925_p12), %s356_s4, 128  }
  0x3c   : > { %2682 = vsyncadd (%p2925_p12), %s356_s4, 4294967168  ;;  %s365_s0 = sand.u32 1, %s2876_s14   ;;  %s2973_s18 = scalar_lea.vmem [#allocation10], %s2961_s5 }
  0x3d   : > { %s366_s12 = scalar_lea.sflag [#allocation11], %s365_s0 }
  0x3e   : > { %2684 = dma.done.wait (%p2925_p12), %s366_s12, 128  }
  0x3f   : > { %2686 = vsyncadd (%p2925_p12), %s366_s12, 4294967168 }
  0x40   : > { %2688 = dma.done.wait (%p75_p1), [#allocation11], 256  }
  0x41   : > { %2690 = vsyncadd (%p75_p1), [#allocation11], 4294967040 }
  0x42   : > { %2692 = dma.done.wait (%p75_p1), [#allocation14], 512  }
  0x43   : > { %2694 = vsyncadd (%p75_p1), [#allocation14], 4294966784  ;;  %v428_v0 = vlaneseq  ;;  %s2987_s20 = sld [smem:[#allocation6]]  ;;  %vm760_vm0 = vcmask 1043456   ;;  %v755_v3 = vld [vmem:[#allocation12] sm:$0xf] }
  0x44   : > { %v777_v4 = vld [vmem:[#allocation13] sm:$0xf]  ;;  %v797_v5 = vld [vmem:[#allocation15] sm:$0xf]  ;;  %v762_v7 = vsel %vm760_vm0, %v755_v3, 0  ;;  %vm756_vm1 = vcmask 64512  }
  0x45   : > { %v2990_v1 = vshrl.u32 %v428_v0, 7  ;;  %v782_v8 = vsel %vm760_vm0, %v777_v4, 0  ;;  %v799_v9 = vsel %vm760_vm0, %v797_v5, 0  ;;  %v751_v10 = vld [vmem:[%s2965_s6] sm:$0xff]  ;;  %v753_v11 = vld [vmem:[%s2973_s18] sm:$0xff]  ;;  %771 = vmatpush.bf16.msra.mxu0 %v762_v7  ;;  %s3076_s26 = scalar_lea.vmem [#allocation16], %s2961_s5 }
  0x46   : > { %791 = vmatpush.bf16.msra.mxu1 %v782_v8  ;;  %v752_v12 = vpack.c.bf16 %v751_v10, %v751_v10  ;;  %v754_v13 = vpack.c.bf16 %v753_v11, %v753_v11  ;;  %v2378_v14 = vld [vmem:[%s3425_s3] ss:$0 sm:$0xff]  ;;  %808 = vmatpush.bf16.msra.mxu2 %v799_v9  ;;  %v2781_v27 = vmov 683565275   ;;  %v2782_v29 = vmov 2475754826  }
  0x47   : > { %v432_v2 = vadd.s32 1, %v2990_v1  ;;  %v2783_v31 = vmov 2131351028   ;;  %v2784_v33 = vmov 2102212464   ;;  %s3079_s27 = scalar_lea.vmem [#allocation17], %s2961_s5 }
  0x48   : > { %2099 = vmatmul.msk.bf16.vlgmr.msra.gmra.mxu0 %vm756_vm1, %v752_v12  ;;  %v2785_v35 = vmov 920167782   ;;  %v2786_v41 = vmov 1326507024   ;;  %s3085_s28 = smov 0  }
  0x49   : > { %v433_v6 = vcvt.s32.f32 %v432_v2  ;;  %2100 = vmatmul.msk.bf16.vlgmr.msra.gmra.mxu1 %vm756_vm1, %v754_v13  ;;  %2101 = vmatmul.msk.bf16.vlgmr.msra.gmra.mxu2 %vm756_vm1, %v754_v13 }
  0x4b   : > { %v3001_v15 = vmul.f32 %v2378_v14, %v433_v6 }
  0x4d   : > { %v442_v16 = vand.u32 2139095040, %v3001_v15  ;;  %v439_v18 = vand.u32 2147483647, %v3001_v15  ;;  %vm441_vm14 = vcmp.lt.s32.totalorder %v3001_v15, 0 }
  0x4f   : > { %v443_v17 = vshrl.u32 %v442_v16, 23  ;;  %v446_v21 = vand.u32 8388607, %v439_v18  ;;  %vm440_vm15 = vcmp.le.f32.partialorder %v439_v18, 0.7853982 }
  0x51   : > { %v2093_v19 = vadd.s32 4294967169, %v443_v17  ;;  %v447_v24 = vor.u32 8388608, %v446_v21 }
  0x53   : > { %v449_v20 = vadd.s32 1, %v2093_v19  ;;  %v3013_v43 = vshll.u32 %v447_v24, 8  ;;  %v2787_v19 = vmov 0  }
  0x55   : > { %vm450_vm2 = vcmp.gt.s32.totalorder %v449_v20, 0  ;;  %v488_v55 = vand.u32 65535, %v3013_v43  ;;  %v489_v56 = vshrl.u32 %v3013_v43, 16 }
  0x56   : > { %v451_v22 = vsel %vm450_vm2, %v449_v20, 0 }
  0x57   : > { %v453_v23 = vand.u32 31, %v451_v22  ;;  %v3010_v25 = vshrl.u32 %v451_v22, 5 }
  0x59   : > { %v454_v26 = vsub.s32 32, %v453_v23  ;;  %v456_v28 = vshll.u32 %v2781_v27, %v453_v23  ;;  %v459_v30 = vshll.u32 %v2782_v29, %v453_v23  ;;  %v462_v32 = vshll.u32 %v2783_v31, %v453_v23 }
  0x5a   : > { %v465_v34 = vshll.u32 %v2784_v33, %v453_v23  ;;  %v468_v36 = vshll.u32 %v2785_v35, %v453_v23  ;;  %vm471_vm3 = vcmp.lt.s32.totalorder %v3010_v25, 1  ;;  %vm474_vm4 = vcmp.lt.s32.totalorder %v3010_v25, 4 }
  0x5b   : > { %v457_v37 = vshrl.u32 %v2782_v29, %v454_v26  ;;  %v460_v38 = vshrl.u32 %v2783_v31, %v454_v26  ;;  %v463_v39 = vshrl.u32 %v2784_v33, %v454_v26  ;;  %v466_v40 = vshrl.u32 %v2785_v35, %v454_v26 }
  0x5c   : > { %v469_v42 = vshrl.u32 %v2786_v41, %v454_v26  ;;  %vm473_vm5 = vcmp.lt.s32.totalorder %v3010_v25, 3  ;;  %vm472_vm6 = vcmp.lt.s32.totalorder %v3010_v25, 2  ;;  %v455_v63 = vshrl.u32 %v2781_v27, %v454_v26 }
  0x5d   : > { %v458_v44 = vor.u32 %v457_v37, %v456_v28  ;;  %v461_v45 = vor.u32 %v460_v38, %v459_v30  ;;  %v464_v46 = vor.u32 %v463_v39, %v462_v32  ;;  %v467_v47 = vor.u32 %v466_v40, %v465_v34 }
  0x5e   : > { %v470_v48 = vor.u32 %v469_v42, %v468_v36 }
  0x5f   : > { %v479_v49 = vsel %vm471_vm3, %v458_v44, %v461_v45  ;;  %v483_v50 = vsel %vm471_vm3, %v461_v45, %v464_v46  ;;  %v480_v51 = vsel %vm474_vm4, %v467_v47, 920167782  ;;  %v475_v14 = vsel %vm471_vm3, %v455_v63, %v458_v44 }
  0x60   : > { %v484_v52 = vsel %vm474_vm4, %v470_v48, 1326507024  ;;  %v481_v53 = vsel %vm473_vm5, %v464_v46, %v480_v51  ;;  %v476_v17 = vsel %vm474_vm4, %v464_v46, 2102212464 }
  0x61   : > { %v485_v54 = vsel %vm473_vm5, %v467_v47, %v484_v52  ;;  %v482_v57 = vsel %vm472_vm6, %v479_v49, %v481_v53  ;;  %v477_v29 = vsel %vm473_vm5, %v461_v45, %v476_v17 }
  0x62   : > { %v486_v58 = vsel %vm472_vm6, %v483_v50, %v485_v54  ;;  %v512_v61 = vand.u32 65535, %v482_v57  ;;  %v513_v62 = vshrl.u32 %v482_v57, 16  ;;  %v478_v37 = vsel %vm472_vm6, %v475_v14, %v477_v29 }
  0x63   : > { %v490_v59 = vand.u32 65535, %v486_v58  ;;  %v491_v60 = vshrl.u32 %v486_v58, 16  ;;  %v532_v41 = vmul.u32 %v3013_v43, %v478_v37 }
  0x64   : > { %v514_v5 = vmul.u32 %v512_v61, %v488_v55  ;;  %v515_v6 = vmul.u32 %v513_v62, %v488_v55  ;;  %v516_v7 = vmul.u32 %v512_v61, %v489_v56  ;;  %v517_v11 = vmul.u32 %v513_v62, %v489_v56 }
  0x65   : > { %v492_v2 = vmul.u32 %v490_v59, %v488_v55  ;;  %v493_v3 = vmul.u32 %v491_v60, %v488_v55  ;;  %v494_v4 = vmul.u32 %v490_v59, %v489_v56  ;;  %v495_v8 = vmul.u32 %v491_v60, %v489_v56 }
  0x66   : > { %v518_v12 = vshll.u32 %v515_v6, 16  ;;  %v520_v13 = vshll.u32 %v516_v7, 16  ;;  %v519_v27 = vshrl.u32 %v515_v6, 16  ;;  %v521_v33 = vshrl.u32 %v516_v7, 16 }
  0x67   : > { %v496_v9 = vshll.u32 %v493_v3, 16  ;;  %v498_v10 = vshll.u32 %v494_v4, 16  ;;  %v497_v22 = vshrl.u32 %v493_v3, 16  ;;  %v499_v30 = vshrl.u32 %v494_v4, 16 }
  0x68   : > { %vm522_vm8 = vc.u32 %v514_v5, %v518_v12  ;;  %v524_v21 = vadd.s32 %v518_v12, %v514_v5  ;;  %v3046_v61 = vand.u32 127, %v428_v0 }
  0x69   : > { %vm500_vm7 = vc.u32 %v492_v2, %v496_v9  ;;  %v502_v16 = vadd.s32 %v496_v9, %v492_v2  ;;  %v523_v24 = vsel %vm522_vm8, 1, %v2787_v19  ;;  %vm582_vm8 = vweird.f32 %v3001_v15 }
  0x6a   : > { %v501_v20 = vsel %vm500_vm7, 1, %v2787_v19  ;;  %v525_v28 = vadd.s32 %v523_v24, %v517_v11  ;;  %vm526_vm10 = vc.u32 %v524_v21, %v520_v13  ;;  %v528_v36 = vadd.s32 %v524_v21, %v520_v13 }
  0x6b   : > { %v503_v23 = vadd.s32 %v501_v20, %v495_v8  ;;  %vm504_vm9 = vc.u32 %v502_v16, %v498_v10  ;;  %v527_v32 = vsel %vm526_vm10, 1, %v2787_v19 }
  0x6c   : > { %v505_v26 = vsel %vm504_vm9, 1, %v2787_v19  ;;  %v529_v34 = vadd.s32 %v527_v32, %v525_v28  ;;  %vm824_vm9 = vcmask 60416  }
  0x6d   : > { %v507_v31 = vadd.s32 %v505_v26, %v503_v23 }
  0x6e   : > { %v530_v38 = vadd.s32 %v529_v34, %v519_v27 }
  0x6f   : > { %v508_v35 = vadd.s32 %v507_v31, %v497_v22 }
  0x70   : > { %v531_v40 = vadd.s32 %v530_v38, %v521_v33 }
  0x71   : > { %v509_v39 = vadd.s32 %v508_v35, %v499_v30 }
  0x72   : > { %v535_v42 = vadd.s32 1, %v531_v40 }
  0x73   : > { %vm534_vm11 = vc.u32 %v509_v39, %v528_v36  ;;  %v533_v25 = vadd.s32 %v528_v36, %v509_v39 }
  0x74   : > { %v536_v44 = vsel %vm534_vm11, %v535_v42, %v531_v40 }
  0x75   : > { %v537_v46 = vadd.s32 %v536_v44, %v532_v41 }
  0x77   : > { %v538_v45 = vadd.s32 536870912, %v537_v46 }
  0x79   : > { %v539_v47 = vshrl.u32 %v538_v45, 30 }
  0x7b   : > { %v540_v48 = vshll.u32 %v539_v47, 30  ;;  %v563_v12 = vsub.s32 4, %v539_v47 }
  0x7d   : > { %v541_v49 = vsub.s32 %v537_v46, %v540_v48  ;;  %v564_v16 = vsel %vm441_vm14, %v563_v12, %v539_v47 }
  0x7e   : > { %v566_v20 = vsel %vm440_vm15, 0, %v564_v16 }
  0x7f   : > { %vm542_vm12 = vcmp.lt.s32.totalorder %v541_v49, 0  ;;  %v543_v50 = vsub.s32 0, %v541_v49  ;;  %v737_v23 = vadd.s32 3, %v566_v20  ;;  %v583_v26 = vand.u32 3, %v566_v20 }
  0x81   : > { %v544_v51 = vsel %vm542_vm12, %v543_v50, %v541_v49  ;;  %v738_v27 = vand.u32 3, %v737_v23  ;;  %vm585_vm2 = vcmp.eq.s32.totalorder %v583_v26, 0  ;;  %vm588_vm3 = vcmp.eq.s32.totalorder %v583_v26, 2 }
  0x82   : > { %v545_v52 = vclz %v544_v51  ;;  %vm584_vm6 = vcmp.lt.s32.totalorder %v583_v26, 2 }
  0x83   : > { %vm740_vm4 = vcmp.eq.s32.totalorder %v738_v27, 0  ;;  %vm743_vm5 = vcmp.eq.s32.totalorder %v738_v27, 2  ;;  %vm739_vm7 = vcmp.lt.s32.totalorder %v738_v27, 2 }
  0x84   : > { %v2094_v53 = vadd.s32 4294967294, %v545_v52 }
  0x86   : > { %vm2095_vm13 = vcmp.lt.s32.totalorder %v2094_v53, 0 }
  0x87   : > { %v548_v54 = vsel %vm2095_vm13, 0, %v2094_v53 }
  0x88   : > { %v549_v55 = vsub.s32 32, %v548_v54  ;;  %v550_v56 = vshll.u32 %v541_v49, %v548_v54  ;;  %v553_v57 = vsub.s32 4294967266, %v548_v54 }
  0x8a   : > { %v551_v43 = vshrl.u32 %v533_v25, %v549_v55  ;;  %v554_v58 = vadd.s32 127, %v553_v57  ;;  %v3081_v55 = vmov 0.0  }
  0x8c   : > { %v552_v59 = vor.u32 %v551_v43, %v550_v56  ;;  %v555_v60 = vshll.u32 %v554_v58, 23  ;;  %v3083_v56 = vmov 0.0  }
  0x8e   : > { %v556_v62 = vor.u32 4788187, %v555_v60  ;;  %v559_v63 = vcvt.s32.f32 %v552_v59 }
  0x90   : > { %v557_v2 = vand.u32 2147483647, %v556_v62 }
  0x92   : > { %v560_v3 = vmul.f32 %v559_v63, %v557_v2 }
  0x94   : > { %v561_v4 = vxor.u32 2147483648, %v560_v3 }
  0x96   : > { %v562_v5 = vsel %vm441_vm14, %v561_v4, %v560_v3 }
  0x97   : > { %v565_v6 = vsel %vm440_vm15, %v3001_v15, %v562_v5 }
  0x98   : > { %v567_v7 = vmul.f32 %v565_v6, %v565_v6 }
  0x9a   : > { %v575_v8 = vmul.f32 -0.00019511016, %v567_v7  ;;  %v568_v9 = vmul.f32 -0.001358992, %v567_v7 }
  0x9c   : > { %v576_v10 = vadd.f32 0.008332121, %v575_v8  ;;  %v569_v11 = vadd.f32 0.041655596, %v568_v9 }
  0x9e   : > { %v577_v0 = vmul.f32 %v576_v10, %v567_v7  ;;  %v570_v13 = vmul.f32 %v569_v11, %v567_v7 }
  0xa0   : > { %v578_v14 = vadd.f32 -0.16666654, %v577_v0  ;;  %v571_v17 = vadd.f32 -0.4999988, %v570_v13 }
  0xa2   : > { %v579_v19 = vmul.f32 %v578_v14, %v567_v7  ;;  %v572_v21 = vmul.f32 %v571_v17, %v567_v7 }
  0xa4   : > { %v580_v22 = vadd.f32 1.0, %v579_v19  ;;  %v573_v18 = vadd.f32 1.0, %v572_v21 }
  0xa6   : > { %v581_v24 = vmul.f32 %v580_v22, %v565_v6  ;;  %v589_v29 = vxor.u32 2147483648, %v573_v18 }
  0xa8   : > { %v586_v28 = vxor.u32 2147483648, %v581_v24  ;;  %v590_v31 = vsel %vm588_vm3, %v589_v29, %v581_v24  ;;  %v745_v33 = vsel %vm743_vm5, %v589_v29, %v581_v24 }
  0xaa   : > { %v587_v30 = vsel %vm585_vm2, %v573_v18, %v586_v28  ;;  %v742_v32 = vsel %vm740_vm4, %v573_v18, %v586_v28 }
  0xab   : > { %v591_v34 = vsel %vm584_vm6, %v587_v30, %v590_v31  ;;  %v746_v35 = vsel %vm739_vm7, %v742_v32, %v745_v33 }
  0xac   : > { %v3053_v36 = vsel %vm582_vm8, nan, %v591_v34  ;;  %v3055_v37 = vsel %vm582_vm8, nan, %v746_v35 }
  0xc5   : > { %v773_v38 = vpop.f32.mrf.mxu0 }
  0xc6   : > { %v793_v39 = vpop.f32.mrf.mxu1  ;;  %v3058_v40 = vmul.f32 %v773_v38, %v3053_v36  ;;  %v3061_v41 = vmul.f32 %v773_v38, %v3055_v37 }
  0xc7   : > { %v816_v42 = vmul.f32 %v793_v39, %v3053_v36  ;;  %v817_v44 = vsub.f32 0.0, %v793_v39 }
  0xc8   : > { %v834_v15 = vpack.c.bf16 %v3058_v40, %v3058_v40  ;;  %v835_v46 = vpack.c.bf16 %v3061_v41, %v3061_v41  ;;  %v3070_v45 = vadd.f32 %v3061_v41, %v3058_v40 }
  0xc9   : > { %v818_v47 = vmul.f32 %v817_v44, %v3055_v37  ;;  %v819_v48 = vpack.c.bf16 %v816_v42, %v816_v42 }
  0xca   : > { %v837_v49 = vpack.c.bf16 %v3070_v45, %v3070_v45 }
  0xcb   : > { %v826_v50 = vpack.c.bf16 %v818_v47, %v818_v47  ;;  %825 = vst.msk [vmem:[#allocation2] sm:$0xf] %vm824_vm9, %v819_v48 }
  0xcc   : > { %v810_v51 = vpop.f32.mrf.mxu2 }
  0xcd   : > { %829 = vst.msk [vmem:[#allocation3] sm:$0xf] %vm824_vm9, %v826_v50  ;;  %v830_v52 = vpack.c.bf16 %v810_v51, %v810_v51  ;;  %v775_v53 = vpop.f32.mrf.mxu0 }
  0xce   : > { %v795_v25 = vpop.f32.mrf.mxu1 }
  0xcf   : > { %833 = vst.msk [vmem:[#allocation4] sm:$0xf] %vm824_vm9, %v830_v52 }
  0xd4   : > { %v812_v54 = vpop.f32.mrf.mxu2 }
  0xd5 LB: >> { %s2102_s29 = sshll.u32 %s2737_s28, 3  ;;  %s923_s24 = ssub.s32 0, %s2737_s28  ;;  %v931_v11 = vstv %s2987_s20  ;;  %s2737_s28 = sphi %s3085_s28, %s842_s28   ;;  %v2733_v56 = vphi %v3083_v56, %v3453_v56   ;;  %v2729_v55 = vphi %v3081_v55, %v3452_v55  }
  0xd6   : >> { %s848_s30 = sshra.s32 %s2102_s29, 3  ;;  %s2109_s22 = sshll.u32 %s923_s24, 3 }
  0xd7   : >> { %s2103_s16 = sshll.u32 %s848_s30, 2  ;;  %v925_v4 = vstv %s2109_s22  ;;  %s842_s28 = sadd.s32 1, %s2737_s28  }
  0xd8   : >> { %s851_s19 = scalar_lea.vmem [#allocation2], %s2103_s16  ;;  %s854_s17 = scalar_lea.vmem [#allocation3], %s2103_s16  ;;  %v926_v5 = vadd.s32 %v925_v4, %v2990_v1 }
  0xd9   : >> { %v852_v57 = vld [vmem:[%s851_s19] sm:$0xf]  ;;  %s857_s15 = scalar_lea.vmem [#allocation4], %s2103_s16  ;;  %p841_p1 = scmp.ge.s32.totalorder %s842_s28, 1 }
  0xda   : >> { %v855_v43 = vld [vmem:[%s854_s17] sm:$0xf]  ;;  %v863_v58 = vsel %vm756_vm1, %v852_v57, 0  ;;  %v897_v59 = vunpack.c.l.bf16 %v852_v57  ;;  %v927_v8 = vsub.s32 %v926_v5, %v3046_v61  ;;  %v1033_v47 = vld [vmem:[#allocation15 + $0x4] sm:$0xf] (%p841_p1)  ;;  %s2788_s5 = smov (%p841_p1), 120  }
  0xdb   : >> { %v882_v60 = vsel %vm756_vm1, %v855_v43, 0  ;;  %v898_v62 = vunpack.c.l.bf16 %v855_v43  ;;  %872 = vmatpush.bf16.xpose.msra.mxu0 %v863_v58  ;;  %v858_v6 = vld [vmem:[%s857_s15] sm:$0xf]  ;;  %1051 = vrot.lane.b32.xlu1 (%p841_p1), %v3053_v36, %s2788_s5  ;;  %s3129_s4 = sld [smem:[#allocation6 + $0x1]] (%p841_p1)  ;;  %v1035_v40 = vsel (%p841_p1), %vm760_vm0, %v1033_v47, 0  ;;  %v980_v41 = vld [vmem:[%s2965_s6] sm:$0xff] (%p841_p1) }
  0xdc   : >> { %891 = vmatpush.bf16.xpose.msra.mxu1 %v882_v60  ;;  %v942_v7 = vsel %vm760_vm0, %v858_v6, 0  ;;  %v928_v9 = vcvt.s32.f32 %v927_v8  ;;  %v982_v38 = vld [vmem:[%s2973_s18] sm:$0xff] (%p841_p1)  ;;  %s2789_s0 = smov (%p841_p1), 8   ;;  %vm1068_vm11 = vcmask (%p841_p1), 126016   ;;  %s3159_s12 = smov (%p841_p1), 0  }
  0xdd   : >> { %v899_v63 = vadd.f32 %v898_v62, %v897_v59  ;;  %951 = vmatpush.bf16.msra.mxu3 %v942_v7  ;;  %v1009_v39 = vld [vmem:[#allocation13 + $0x4] sm:$0xf] (%p841_p1)  ;;  %v983_v42 = vpack.c.bf16 (%p841_p1), %v982_v38, %v982_v38 }
  0xde   : >> { %v930_v10 = vmax.f32 %v928_v9, 0.0  ;;  %vm929_vm10 = vcmp.ge.f32.partialorder %v928_v9, 0.0  ;;  %v1017_v44 = vsel (%p841_p1), %vm760_vm0, %v1009_v39, 0 }
  0xdf   : >> { %v900_v2 = vpack.c.bf16 %v899_v63, %v899_v63  ;;  %1011 = vrot.lane.b32.xlu0 (%p841_p1), %v983_v42, %s2788_s5 }
  0xe0   : >> { %v932_v0 = vmul.f32 %v931_v11, %v930_v10  ;;  %v3155_v10 = vmov (%p841_p1), 0.0   ;;  %v3157_v11 = vmov (%p841_p1), 0.0  }
  0xe1   : >> { %v905_v3 = vsel %vm756_vm1, %v900_v2, 0  ;;  %970 = vmatpush.bf16.msrb.mxu3 %v942_v7 }
  0xe2   : >> { %914 = vmatpush.bf16.xpose.msra.mxu2 %v905_v3  ;;  %2106 = vmatmul.msk.bf16.vlgmr.msra.gmra.mxu0 %vm756_vm1, %v834_v15  ;;  %v933_v12 = vmul.f32 1.442695, %v932_v0  ;;  %v981_v15 = vpack.c.bf16 (%p841_p1), %v980_v41, %v980_v41 }
  0xe3   : >> { %2107 = vmatmul.msk.bf16.vlgmr.msra.gmra.mxu1 %vm756_vm1, %v835_v46  ;;  %1056 = vrot.lane.b32.xlu1 (%p841_p1), %v3055_v37, %s2788_s5  ;;  %v985_v46 = vld [vmem:[#allocation12 + $0x4] sm:$0xf] (%p841_p1) }
  0xe4   : >> { %2379 = vpow2.f32 %v933_v12  ;;  %1026 = vmatpush.bf16.msra.mxu1 (%p841_p1), %v1017_v44  ;;  %v993_v45 = vsel (%p841_p1), %vm760_vm0, %v985_v46, 0 }
  0xe5   : > { %1002 = vmatpush.bf16.msra.mxu0 (%p841_p1), %v993_v45 }
  0xe7   : > { %987 = vrot.lane.b32.xlu0 (%p841_p1), %v981_v15, %s2788_s5 }
  0xe9   : >> { %2108 = vmatmul.msk.bf16.vlgmr.msra.gmra.mxu2 %vm756_vm1, %v837_v49 }
  0xea   : >> { %v2380_v13 = vpop.eup %2379  ;;  %1044 = vmatpush.bf16.msra.mxu2 (%p841_p1), %v1035_v40 }
  0xeb   : >> { %v935_v17 = vsel %vm929_vm10, %v2380_v13, 0.0 }
 0x14d   : > { %v1052_v50 = vpop.permute.xlu1 (%p841_p1), %1051 }
 0x151   : > { %v1012_v48 = vpop.permute.xlu0 (%p841_p1), %1011 }
 0x152   : > { %2114 = vmatmul.msk.bf16.vlgmr.msra.gmra.mxu1 (%p841_p1), %vm756_vm1, %v1012_v48  ;;  %2115 = vmatmul.msk.bf16.vlgmr.msra.gmra.mxu2 (%p841_p1), %vm756_vm1, %v1012_v48 }
 0x155   : > { %v1057_v54 = vpop.permute.xlu1 (%p841_p1), %1056 }
 0x159   : > { %v988_v49 = vpop.permute.xlu0 (%p841_p1), %987 }
 0x15a   : > { %2113 = vmatmul.msk.bf16.vlgmr.msra.gmra.mxu0 (%p841_p1), %vm756_vm1, %v988_v49 }
 0x15f   : >> { %v874_v14 = vpop.f32.mrf.mxu0 }
 0x160   : >> { %v893_v16 = vpop.f32.mrf.mxu1 }
 0x161   : >> { %v920_v19 = vsub.f32 %v874_v14, %v893_v16 }
 0x163   : >> { %v936_v20 = vmul.f32 %v935_v17, %v920_v19 }
 0x165   : >> { %v937_v21 = vpack.c.bf16 %v936_v20, %v936_v20 }
 0x167   : >> { %2110 = vmatmul.msk.bf16.vlgmr.msra.gmra.mxu3 %vm756_vm1, %v937_v21  ;;  %v876_v22 = vpop.f32.mrf.mxu0 }
 0x168   : >> { %v895_v23 = vpop.f32.mrf.mxu1 }
 0x16c   : >> { %v916_v18 = vpop.f32.mrf.mxu2 }
 0x16d   : >> { %v921_v24 = vsub.f32 %v916_v18, %v874_v14 }
 0x16f   : >> { %v922_v26 = vsub.f32 %v921_v24, %v893_v16 }
 0x171   : >> { %v958_v27 = vmul.f32 %v935_v17, %v922_v26 }
 0x173   : >> { %v959_v29 = vpack.c.bf16 %v958_v27, %v958_v27 }
 0x174   : >> { %v918_v28 = vpop.f32.mrf.mxu2 }
 0x177   : >> { %2111 = vmatmul.msk.bf16.vlgmr.msrb.gmra.mxu3 %vm756_vm1, %v959_v29 }
 0x1cf   : > { %v1028_v51 = vpop.f32.mrf.mxu1 (%p841_p1) }
 0x1d0   : > { %v1060_v52 = vmul.f32 (%p841_p1), %v1052_v50, %v1028_v51  ;;  %v1061_v53 = vsub.f32 (%p841_p1), 0.0, %v1028_v51 }
 0x1d2   : > { %v1063_v25 = vpack.c.bf16 (%p841_p1), %v1060_v52, %v1060_v52 }
 0x1d4   : > { %1065 = vrot.lane.b32.xlu2 (%p841_p1), %v1063_v25, %s2789_s0 }
 0x1d7   : > { %v1030_v43 = vpop.f32.mrf.mxu1 (%p841_p1)  ;;  %v1004_v58 = vpop.f32.mrf.mxu0 (%p841_p1) }
 0x1d8   : > { %v3140_v59 = vmul.f32 (%p841_p1), %v1052_v50, %v1004_v58  ;;  %v3142_v60 = vmul.f32 (%p841_p1), %v1057_v54, %v1004_v58 }
 0x1da   : > { %v1082_v63 = vpack.c.bf16 (%p841_p1), %v3140_v59, %v3140_v59  ;;  %v1083_v2 = vpack.c.bf16 (%p841_p1), %v3142_v60, %v3142_v60  ;;  %v3150_v3 = vadd.f32 (%p841_p1), %v3142_v60, %v3140_v59 }
 0x1dc   : > { %v1085_v4 = vpack.c.bf16 (%p841_p1), %v3150_v3, %v3150_v3 }
 0x1df   : > { %v1006_v6 = vpop.f32.mrf.mxu0 (%p841_p1) }
 0x1ea   : >> { %v953_v30 = vpop.f32.mrf.mxu3 }
 0x1eb   : >> { %v957_v31 = vadd.f32 %v2733_v56, %v953_v30  }
 0x1ed   : >> { %v3453_v56 = vmov %v957_v31  ;;  %977 = vst.msk [vmem:[%s3076_s26] sm:$0xff] (%p841_p1), %vm756_vm1, %v957_v31 }
 0x1ee   : > { %v1062_v56 = vmul.f32 (%p841_p1), %v1061_v53, %v1057_v54 }
 0x1f0   : > { %v1070_v62 = vpack.c.bf16 (%p841_p1), %v1062_v56, %v1062_v56 }
 0x1f2   : >> { %v955_v32 = vpop.f32.mrf.mxu3  ;;  %1072 = vrot.lane.b32.xlu2 (%p841_p1), %v1070_v62, %s2789_s0 }
 0x1fa   : >> { %v972_v33 = vpop.f32.mrf.mxu3 }
 0x1fb   : >> { %v976_v34 = vadd.f32 %v2729_v55, %v972_v33  }
 0x1fd   : >> { %v3452_v55 = vmov %v976_v34  ;;  %978 = vst.msk [vmem:[%s3079_s27] sm:$0xff] (%p841_p1), %vm756_vm1, %v976_v34 }
 0x1fe   : > { %844 = sbr.rel (!%p841_p1) target bundleno = 213 (0xd5), region = 183  ;;  %v1046_v55 = vpop.f32.mrf.mxu2 (%p841_p1) }
 0x1ff   : > { %v1076_v57 = vpack.c.bf16 (%p841_p1), %v1046_v55, %v1046_v55 }
 0x201   : > { %1078 = vrot.lane.b32.xlu0 (%p841_p1), %v1076_v57, %s2789_s0 }
 0x202   : >> { %v974_v35 = vpop.f32.mrf.mxu3 }
 0x206   : > { %v1048_v5 = vpop.f32.mrf.mxu2 }
 0x22e   : > { %v1066_v7 = vpop.permute.xlu2 %1065 }
 0x22f   : > { %1069 = vst.msk [vmem:[#allocation2] sm:$0xf] %vm1068_vm11, %v1066_v7 }
 0x24c   : > { %v1073_v8 = vpop.permute.xlu2 %1072 }
 0x24d   : > { %1075 = vst.msk [vmem:[#allocation3] sm:$0xf] %vm1068_vm11, %v1073_v8 }
 0x273   : > { %v1079_v9 = vpop.permute.xlu0 %1078 }
 0x274   : > { %1081 = vst.msk [vmem:[#allocation4] sm:$0xf] %vm1068_vm11, %v1079_v9 }
 0x275 LB: >> { %s2116_s20 = sshll.u32 %s2749_s12, 3  ;;  %s2790_s30 = smov 120   ;;  %v1191_v44 = vstv %s3129_s4  ;;  %s2749_s12 = sphi %s3159_s12, %s1089_s12   ;;  %v2745_v11 = vphi %v3157_v11, %v3455_v11   ;;  %v2741_v10 = vphi %v3155_v10, %v3454_v10  }
 0x276   : >> { %s1095_s14 = sshra.s32 %s2116_s20, 3  ;;  %s1183_s19 = ssub.s32 0, %s2749_s12 }
 0x277   : >> { %s2117_s21 = sshll.u32 %s1095_s14, 2  ;;  %s2123_s17 = sshll.u32 %s1183_s19, 3 }
 0x278   : >> { %s1098_s28 = scalar_lea.vmem [#allocation2], %s2117_s21  ;;  %s1101_s29 = scalar_lea.vmem [#allocation3], %s2117_s21  ;;  %v1185_v32 = vstv %s2123_s17 }
 0x279   : >> { %v1099_v0 = vld [vmem:[%s1098_s28] sm:$0xf]  ;;  %s1104_s16 = scalar_lea.vmem [#allocation4], %s2117_s21  ;;  %v1186_v33 = vadd.s32 %v1185_v32, %v2990_v1  ;;  %s1089_s12 = sadd.s32 1, %s2749_s12  }
 0x27a   : >> { %v1102_v12 = vld [vmem:[%s1101_s29] sm:$0xf]  ;;  %v1107_v13 = vunpack.c.l.b16 %v1099_v0  ;;  %v1154_v14 = vunpack.c.l.bf16 %v1099_v0  ;;  %p1088_p3 = scmp.ge.s32.totalorder %s1089_s12, 1 }
 0x27b   : >> { %v1155_v16 = vunpack.c.l.bf16 %v1102_v12  ;;  %v1131_v21 = vunpack.c.l.b16 %v1102_v12  ;;  %v1105_v23 = vld [vmem:[%s1104_s16] sm:$0xf]  ;;  %v1187_v38 = vsub.s32 %v1186_v33, %v3046_v61  ;;  %v1283_v9 = vld [vmem:[#allocation13 + $0x8] sm:$0xf] (%p1088_p3)  ;;  %v1307_v12 = vld [vmem:[#allocation15 + $0x8] sm:$0xf] (%p1088_p3) }
 0x27c   : >> { %v1108_v17 = vpack.c.b16 %v1107_v13, %v1107_v13  ;;  %v1199_v18 = vunpack.c.l.b16 %v1105_v23  ;;  %v1256_v8 = vld [vmem:[%s2973_s18] sm:$0xff] (%p1088_p3)  ;;  %v1291_v0 = vsel (%p1088_p3), %vm760_vm0, %v1283_v9, 0  ;;  %s2791_s24 = smov (%p1088_p3), 112   ;;  %s3206_s22 = sld [smem:[#allocation6 + $0x2]] (%p1088_p3)  ;;  %v1309_v13 = vsel (%p1088_p3), %vm760_vm0, %v1307_v12, 0  ;;  %v1254_v59 = vld [vmem:[%s2965_s6] sm:$0xff] (%p1088_p3) }
 0x27d   : >> { %v1156_v19 = vadd.f32 %v1155_v16, %v1154_v14  ;;  %v1132_v22 = vpack.c.b16 %v1131_v21, %v1131_v21  ;;  %v1188_v39 = vcvt.s32.f32 %v1187_v38  ;;  %v1255_v60 = vpack.c.bf16 (%p1088_p3), %v1254_v59, %v1254_v59  ;;  %s2792_s15 = smov (%p1088_p3), 16   ;;  %s3239_s5 = smov (%p1088_p3), 0  }
 0x27e   : >> { %1109 = vrot.lane.b32.xlu0 %v1108_v17, %s2790_s30  ;;  %v1200_v24 = vpack.c.b16 %v1199_v18, %v1199_v18  ;;  %vm1246_vm13 = vcmask (%p1088_p3), 130112   ;;  %vm1340_vm14 = vcmask (%p1088_p3), 191616  }
 0x27f   : >> { %v1157_v20 = vpack.c.bf16 %v1156_v19, %v1156_v19  ;;  %v1190_v42 = vmax.f32 %v1188_v39, 0.0  ;;  %vm1189_vm12 = vcmp.ge.f32.partialorder %v1188_v39, 0.0 }
 0x281   : >> { %1159 = vrot.lane.b32.xlu1 %v1157_v20, %s2790_s30  ;;  %v1192_v47 = vmul.f32 %v1191_v44, %v1190_v42 }
 0x283   : >> { %v1193_v40 = vmul.f32 1.442695, %v1192_v47  ;;  %v3235_v47 = vmov (%p1088_p3), 0.0  }
 0x285   : >> { %2381 = vpow2.f32 %v1193_v40  ;;  %v3237_v40 = vmov (%p1088_p3), 0.0  }
 0x286   : >> { %1133 = vrot.lane.b32.xlu0 %v1132_v22, %s2790_s30 }
 0x289   : >> { %1201 = vrot.lane.b32.xlu1 %v1200_v24, %s2790_s30 }
 0x28b   : >> { %v2382_v15 = vpop.eup %2381 }
 0x28c   : >> { %v1195_v48 = vsel %vm1189_vm12, %v2382_v15, 0.0 }
 0x291   : > { %1324 = vrot.lane.b32.xlu1 (%p1088_p3), %v3053_v36, %s2791_s24 }
 0x299   : > { %1328 = vrot.lane.b32.xlu1 (%p1088_p3), %v3055_v37, %s2791_s24 }
 0x2f0   : >> { %v1110_v26 = vpop.permute.xlu0 %1109 }
 0x2f1   : >> { %v1115_v27 = vsel %vm756_vm1, %v1110_v26, 0 }
 0x2f2   : >> { %1124 = vmatpush.bf16.xpose.msra.mxu0 %v1115_v27 }
 0x2f3   : >> { %v1160_v28 = vpop.permute.xlu1 %1159 }
 0x2f4   : >> { %v1165_v29 = vsel %vm756_vm1, %v1160_v28, 0 }
 0x2f5   : >> { %1174 = vmatpush.bf16.xpose.msra.mxu2 %v1165_v29 }
 0x2f8   : >> { %v1134_v30 = vpop.permute.xlu0 %1133 }
 0x2f9   : >> { %2120 = vmatmul.msk.bf16.vlgmr.msra.gmra.mxu0 %vm756_vm1, %v1082_v63  ;;  %v1139_v31 = vsel %vm756_vm1, %v1134_v30, 0  ;;  %v1259_v63 = vld [vmem:[#allocation12 + $0x8] sm:$0xf] (%p1088_p3) }
 0x2fa   : >> { %1148 = vmatpush.bf16.xpose.msra.mxu1 %v1139_v31 }
 0x2fb   : >> { %v1202_v34 = vpop.permute.xlu1 %1201 }
 0x2fc   : >> { %2122 = vmatmul.msk.bf16.vlgmr.msra.gmra.mxu2 %vm756_vm1, %v1085_v4  ;;  %v1207_v35 = vsel %vm760_vm0, %v1202_v34, 0 }
 0x2fd   : >> { %1216 = vmatpush.bf16.msra.mxu3 %v1207_v35  ;;  %1318 = vmatpush.bf16.msra.mxu2 (%p1088_p3), %v1309_v13 }
 0x301   : >> { %2121 = vmatmul.msk.bf16.vlgmr.msra.gmra.mxu1 %vm756_vm1, %v1083_v2  ;;  %1235 = vmatpush.bf16.msrb.mxu3 %v1207_v35  ;;  %v1267_v2 = vsel (%p1088_p3), %vm760_vm0, %v1259_v63, 0 }
 0x302   : > { %1300 = vmatpush.bf16.msra.mxu1 (%p1088_p3), %v1291_v0  ;;  %1276 = vmatpush.bf16.msra.mxu0 (%p1088_p3), %v1267_v2 }
 0x303   : > { %v1325_v14 = vpop.permute.xlu1 (%p1088_p3), %1324 }
 0x30b   : > { %v1329_v19 = vpop.permute.xlu1 (%p1088_p3), %1328 }
 0x376   : >> { %v1126_v41 = vpop.f32.mrf.mxu0 }
 0x37e   : >> { %v1128_v46 = vpop.f32.mrf.mxu0  ;;  %v1150_v45 = vpop.f32.mrf.mxu1 }
 0x37f   : >> { %v1180_v49 = vsub.f32 %v1126_v41, %v1150_v45  ;;  %v1176_v50 = vpop.f32.mrf.mxu2 }
 0x380   : >> { %v1181_v25 = vsub.f32 %v1176_v50, %v1126_v41 }
 0x381   : >> { %v1196_v51 = vmul.f32 %v1195_v48, %v1180_v49 }
 0x382   : >> { %v1182_v55 = vsub.f32 %v1181_v25, %v1150_v45 }
 0x383   : >> { %v1197_v52 = vpack.c.bf16 %v1196_v51, %v1196_v51 }
 0x384   : >> { %v1223_v56 = vmul.f32 %v1195_v48, %v1182_v55 }
 0x385   : >> { %2124 = vmatmul.msk.bf16.vlgmr.msra.gmra.mxu3 %vm756_vm1, %v1197_v52 }
 0x386   : >> { %v1152_v53 = vpop.f32.mrf.mxu1  ;;  %v1224_v57 = vpack.c.bf16 %v1223_v56, %v1223_v56 }
 0x387   : >> { %v1178_v54 = vpop.f32.mrf.mxu2 }
 0x395   : >> { %2125 = vmatmul.msk.bf16.vlgmr.msrb.gmra.mxu3 %vm756_vm1, %v1224_v57 }
 0x408   : >> { %v1218_v43 = vpop.f32.mrf.mxu3 }
 0x409   : >> { %v1222_v58 = vadd.f32 %v2745_v11, %v1218_v43  }
 0x40b   : >> { %v3455_v11 = vmov %v1222_v58  ;;  %1243 = vrot.lane.b32.xlu2 (%p1088_p3), %v1222_v58, %s2789_s0 }
 0x40c   : > { %v1257_v11 = vpack.c.bf16 (%p1088_p3), %v1256_v8, %v1256_v8 }
 0x40e   : > { %1285 = vrot.lane.b32.xlu0 (%p1088_p3), %v1257_v11, %s2791_s24 }
 0x410   : >> { %v1220_v62 = vpop.f32.mrf.mxu3 }
 0x416   : > { %1261 = vrot.lane.b32.xlu0 (%p1088_p3), %v1255_v60, %s2791_s24 }
 0x418   : >> { %v1237_v5 = vpop.f32.mrf.mxu3 }
 0x419   : >> { %v1241_v6 = vadd.f32 %v2741_v10, %v1237_v5  }
 0x41b   : >> { %v3454_v10 = vmov %v1241_v6  ;;  %1249 = vrot.lane.b32.xlu2 (%p1088_p3), %v1241_v6, %s2789_s0 }
 0x41c   : > { %1091 = sbr.rel (!%p1088_p3) target bundleno = 629 (0x275), region = 194 }
 0x420   : >> { %v1239_v7 = vpop.f32.mrf.mxu3 }
 0x465   : > { %v1244_v10 = vpop.permute.xlu2 %1243 }
 0x466   : > { %1247 = vst.msk [vmem:[%s3076_s26] sm:$0xff] %vm1246_vm13, %v1244_v10 }
 0x475   : > { %v1250_v16 = vpop.permute.xlu2 %1249 }
 0x476   : > { %1252 = vst.msk [vmem:[%s3079_s27] sm:$0xff] %vm1246_vm13, %v1250_v16 }
 0x480   : > { %v1286_v3 = vpop.permute.xlu0 %1285 }
 0x481   : > { %2128 = vmatmul.msk.bf16.vlgmr.msra.gmra.mxu1 %vm756_vm1, %v1286_v3  ;;  %2129 = vmatmul.msk.bf16.vlgmr.msra.gmra.mxu2 %vm756_vm1, %v1286_v3 }
 0x488   : > { %v1262_v4 = vpop.permute.xlu0 %1261 }
 0x489   : > { %2127 = vmatmul.msk.bf16.vlgmr.msra.gmra.mxu0 %vm756_vm1, %v1262_v4 }
 0x4fe   : > { %v1302_v17 = vpop.f32.mrf.mxu1 }
 0x4ff   : > { %v1332_v20 = vmul.f32 %v1325_v14, %v1302_v17  ;;  %v1333_v21 = vsub.f32 0.0, %v1302_v17 }
 0x501   : > { %v1335_v22 = vpack.c.bf16 %v1332_v20, %v1332_v20  ;;  %v1334_v23 = vmul.f32 %v1333_v21, %v1329_v19 }
 0x503   : > { %v1342_v18 = vpack.c.bf16 %v1334_v23, %v1334_v23  ;;  %1337 = vrot.lane.b32.xlu0 %v1335_v22, %s2792_s15 }
 0x504   : > { %v1320_v24 = vpop.f32.mrf.mxu2 }
 0x505   : > { %v1348_v26 = vpack.c.bf16 %v1320_v24, %v1320_v24  ;;  %1344 = vrot.lane.b32.xlu1 %v1342_v18, %s2792_s15 }
 0x506   : > { %v1278_v27 = vpop.f32.mrf.mxu0  ;;  %v1304_v28 = vpop.f32.mrf.mxu1 }
 0x507   : > { %v3220_v29 = vmul.f32 %v1325_v14, %v1278_v27  ;;  %v3222_v30 = vmul.f32 %v1329_v19, %v1278_v27  ;;  %1350 = vrot.lane.b32.xlu2 %v1348_v26, %s2792_s15 }
 0x509   : > { %v1354_v31 = vpack.c.bf16 %v3220_v29, %v3220_v29  ;;  %v1355_v32 = vpack.c.bf16 %v3222_v30, %v3222_v30  ;;  %v3231_v33 = vadd.f32 %v3222_v30, %v3220_v29 }
 0x50b   : > { %v1357_v34 = vpack.c.bf16 %v3231_v33, %v3231_v33 }
 0x50c   : > { %v1322_v35 = vpop.f32.mrf.mxu2 }
 0x50e   : > { %v1280_v38 = vpop.f32.mrf.mxu0 }
 0x561   : > { %v1351_v39 = vpop.permute.xlu2 %1350 }
 0x562   : > { %1353 = vst.msk [vmem:[#allocation4] sm:$0xf] %vm1340_vm14, %v1351_v39 }
 0x575   : > { %v1338_v42 = vpop.permute.xlu0 %1337 }
 0x576   : > { %1341 = vst.msk [vmem:[#allocation2] sm:$0xf] %vm1340_vm14, %v1338_v42 }
 0x577   : > { %v1345_v44 = vpop.permute.xlu1 %1344 }
 0x578   : > { %1347 = vst.msk [vmem:[#allocation3] sm:$0xf] %vm1340_vm14, %v1345_v44 }
 0x579 LB: >> { %s2130_s4 = sshll.u32 %s2761_s5, 3  ;;  %s2793_s21 = smov 112   ;;  %v1463_v13 = vstv %s3206_s22  ;;  %s2761_s5 = sphi %s3239_s5, %s1361_s5   ;;  %v2757_v40 = vphi %v3237_v40, %v3457_v40   ;;  %v2753_v47 = vphi %v3235_v47, %v3456_v47  }
 0x57a   : >> { %s1367_s0 = sshra.s32 %s2130_s4, 3  ;;  %s1455_s29 = ssub.s32 0, %s2761_s5 }
 0x57b   : >> { %s2131_s12 = sshll.u32 %s1367_s0, 2  ;;  %s2137_s30 = sshll.u32 %s1455_s29, 3 }
 0x57c   : >> { %s1370_s20 = scalar_lea.vmem [#allocation2], %s2131_s12  ;;  %s1373_s14 = scalar_lea.vmem [#allocation3], %s2131_s12  ;;  %v1457_v6 = vstv %s2137_s30 }
 0x57d   : >> { %v1371_v41 = vld [vmem:[%s1370_s20] sm:$0xf]  ;;  %s1376_s28 = scalar_lea.vmem [#allocation4], %s2131_s12  ;;  %v1458_v7 = vadd.s32 %v1457_v6, %v2990_v1  ;;  %s1361_s5 = sadd.s32 1, %s2761_s5  }
 0x57e   : >> { %v1379_v46 = vunpack.c.l.b16 %v1371_v41  ;;  %v1426_v45 = vunpack.c.l.bf16 %v1371_v41  ;;  %v1377_v25 = vld [vmem:[%s1376_s28] sm:$0xf]  ;;  %p1360_p9 = scmp.ge.s32.totalorder %s1361_s5, 1 }
 0x57f   : >> { %v1374_v15 = vld [vmem:[%s1373_s14] sm:$0xf]  ;;  %v1471_v54 = vunpack.c.l.b16 %v1377_v25  ;;  %v1459_v11 = vsub.s32 %v1458_v7, %v3046_v61  ;;  %v1555_v44 = vld [vmem:[#allocation13 + $0xc] sm:$0xf] (%p1360_p9)  ;;  %s2794_s16 = smov (%p1360_p9), 104   ;;  %s3286_s19 = sld [smem:[#allocation6 + $0x3]] (%p1360_p9) }
 0x580   : >> { %v1427_v48 = vunpack.c.l.bf16 %v1374_v15  ;;  %v1380_v49 = vpack.c.b16 %v1379_v46, %v1379_v46  ;;  %v1403_v52 = vunpack.c.l.b16 %v1374_v15  ;;  %v1528_v42 = vld [vmem:[%s2973_s18] sm:$0xff] (%p1360_p9)  ;;  %v1563_v41 = vsel (%p1360_p9), %vm760_vm0, %v1555_v44, 0  ;;  %v1579_v15 = vld [vmem:[#allocation15 + $0xc] sm:$0xf] (%p1360_p9)  ;;  %s3319_s18 = smov (%p1360_p9), 0  }
 0x581   : >> { %v1472_v55 = vpack.c.b16 %v1471_v54, %v1471_v54  ;;  %v1460_v0 = vcvt.s32.f32 %v1459_v11  ;;  %v1581_v46 = vsel (%p1360_p9), %vm760_vm0, %v1579_v15, 0  ;;  %v1526_v29 = vld [vmem:[%s2965_s6] sm:$0xff] (%p1360_p9)  ;;  %vm1518_vm2 = vcmask (%p1360_p9), 195712   ;;  %s2795_s6 = smov (%p1360_p9), 24  }
 0x582   : >> { %v1428_v50 = vadd.f32 %v1427_v48, %v1426_v45  ;;  %1381 = vrot.lane.b32.xlu0 %v1380_v49, %s2793_s21  ;;  %v1404_v53 = vpack.c.b16 %v1403_v52, %v1403_v52  ;;  %v1527_v30 = vpack.c.bf16 (%p1360_p9), %v1526_v29, %v1526_v29  ;;  %vm1612_vm3 = vcmask (%p1360_p9), 257216  }
 0x583   : >> { %v1462_v12 = vmax.f32 %v1460_v0, 0.0  ;;  %vm1461_vm15 = vcmp.ge.f32.partialorder %v1460_v0, 0.0 }
 0x584   : >> { %v1429_v51 = vpack.c.bf16 %v1428_v50, %v1428_v50 }
 0x585   : >> { %v1464_v59 = vmul.f32 %v1463_v13, %v1462_v12  ;;  %v3315_v12 = vmov (%p1360_p9), 0.0   ;;  %v3317_v13 = vmov (%p1360_p9), 0.0  }
 0x586   : >> { %1431 = vrot.lane.b32.xlu1 %v1429_v51, %s2793_s21 }
 0x587   : >> { %v1465_v60 = vmul.f32 1.442695, %v1464_v59 }
 0x589   : >> { %2383 = vpow2.f32 %v1465_v60 }
 0x58a   : >> { %1405 = vrot.lane.b32.xlu0 %v1404_v53, %s2793_s21 }
 0x58e   : >> { %1473 = vrot.lane.b32.xlu1 %v1472_v55, %s2793_s21 }
 0x58f   : >> { %v2384_v2 = vpop.eup %2383 }
 0x590   : >> { %v1467_v10 = vsel %vm1461_vm15, %v2384_v2, 0.0 }
 0x596   : > { %1596 = vrot.lane.b32.xlu1 (%p1360_p9), %v3053_v36, %s2794_s16 }
 0x59e   : > { %1600 = vrot.lane.b32.xlu1 (%p1360_p9), %v3055_v37, %s2794_s16 }
 0x5f4   : >> { %v1382_v56 = vpop.permute.xlu0 %1381 }
 0x5f5   : >> { %v1387_v57 = vsel %vm756_vm1, %v1382_v56, 0 }
 0x5f6   : >> { %1396 = vmatpush.bf16.xpose.msra.mxu0 %v1387_v57 }
 0x5f8   : >> { %v1432_v43 = vpop.permute.xlu1 %1431 }
 0x5f9   : >> { %v1437_v58 = vsel %vm756_vm1, %v1432_v43, 0 }
 0x5fa   : >> { %1446 = vmatpush.bf16.xpose.msra.mxu2 %v1437_v58 }
 0x5fc   : >> { %v1406_v62 = vpop.permute.xlu0 %1405 }
 0x5fd   : >> { %2134 = vmatmul.msk.bf16.vlgmr.msra.gmra.mxu0 %vm756_vm1, %v1354_v31  ;;  %v1411_v5 = vsel %vm756_vm1, %v1406_v62, 0  ;;  %v1531_v31 = vld [vmem:[#allocation12 + $0xc] sm:$0xf] (%p1360_p9) }
 0x5fe   : >> { %1420 = vmatpush.bf16.xpose.msra.mxu1 %v1411_v5 }
 0x600   : >> { %v1474_v8 = vpop.permute.xlu1 %1473 }
 0x601   : >> { %2136 = vmatmul.msk.bf16.vlgmr.msra.gmra.mxu2 %vm756_vm1, %v1357_v34  ;;  %v1479_v9 = vsel %vm760_vm0, %v1474_v8, 0 }
 0x602   : >> { %1488 = vmatpush.bf16.msra.mxu3 %v1479_v9  ;;  %1590 = vmatpush.bf16.msra.mxu2 (%p1360_p9), %v1581_v46 }
 0x605   : >> { %2135 = vmatmul.msk.bf16.vlgmr.msra.gmra.mxu1 %vm756_vm1, %v1355_v32  ;;  %v1539_v32 = vsel (%p1360_p9), %vm760_vm0, %v1531_v31, 0 }
 0x606   : >> { %1507 = vmatpush.bf16.msrb.mxu3 %v1479_v9  ;;  %1572 = vmatpush.bf16.msra.mxu1 (%p1360_p9), %v1563_v41 }
 0x607   : > { %1548 = vmatpush.bf16.msra.mxu0 (%p1360_p9), %v1539_v32 }
 0x67a   : >> { %v1398_v63 = vpop.f32.mrf.mxu0 }
 0x682   : >> { %v1400_v3 = vpop.f32.mrf.mxu0  ;;  %v1422_v4 = vpop.f32.mrf.mxu1 }
 0x683   : >> { %v1452_v14 = vsub.f32 %v1398_v63, %v1422_v4 }
 0x684   : >> { %v1448_v16 = vpop.f32.mrf.mxu2 }
 0x685   : >> { %v1468_v17 = vmul.f32 %v1467_v10, %v1452_v14  ;;  %v1453_v21 = vsub.f32 %v1448_v16, %v1398_v63 }
 0x687   : >> { %v1469_v19 = vpack.c.bf16 %v1468_v17, %v1468_v17  ;;  %v1454_v23 = vsub.f32 %v1453_v21, %v1422_v4 }
 0x689   : >> { %2138 = vmatmul.msk.bf16.vlgmr.msra.gmra.mxu3 %vm756_vm1, %v1469_v19  ;;  %v1495_v18 = vmul.f32 %v1467_v10, %v1454_v23 }
 0x68a   : >> { %v1424_v20 = vpop.f32.mrf.mxu1 }
 0x68b   : >> { %v1496_v24 = vpack.c.bf16 %v1495_v18, %v1495_v18 }
 0x68c   : >> { %v1450_v22 = vpop.f32.mrf.mxu2 }
 0x699   : >> { %2139 = vmatmul.msk.bf16.vlgmr.msrb.gmra.mxu3 %vm756_vm1, %v1496_v24 }
 0x70c   : >> { %v1490_v26 = vpop.f32.mrf.mxu3 }
 0x70d   : >> { %v1494_v27 = vadd.f32 %v2757_v40, %v1490_v26  }
 0x70f   : >> { %v3457_v40 = vmov %v1494_v27  ;;  %1515 = vrot.lane.b32.xlu2 (%p1360_p9), %v1494_v27, %s2792_s15 }
 0x710   : > { %v1529_v40 = vpack.c.bf16 (%p1360_p9), %v1528_v42, %v1528_v42 }
 0x712   : > { %1557 = vrot.lane.b32.xlu0 (%p1360_p9), %v1529_v40, %s2794_s16 }
 0x714   : >> { %v1492_v28 = vpop.f32.mrf.mxu3 }
 0x71a   : > { %1533 = vrot.lane.b32.xlu0 (%p1360_p9), %v1527_v30, %s2794_s16 }
 0x71c   : >> { %v1509_v35 = vpop.f32.mrf.mxu3 }
 0x71d   : >> { %v1513_v38 = vadd.f32 %v2753_v47, %v1509_v35  }
 0x71f   : >> { %v3456_v47 = vmov %v1513_v38  ;;  %1521 = vrot.lane.b32.xlu2 (%p1360_p9), %v1513_v38, %s2792_s15 }
 0x720   : > { %1363 = sbr.rel (!%p1360_p9) target bundleno = 1401 (0x579), region = 205  ;;  %v1597_v47 = vpop.permute.xlu1 (%p1360_p9), %1596 }
 0x724   : >> { %v1511_v39 = vpop.f32.mrf.mxu3 }
 0x728   : > { %v1601_v48 = vpop.permute.xlu1 %1600 }
 0x769   : > { %v1516_v34 = vpop.permute.xlu2 %1515 }
 0x76a   : > { %1519 = vst.msk [vmem:[%s3076_s26] sm:$0xff] %vm1518_vm2, %v1516_v34 }
 0x779   : > { %v1522_v45 = vpop.permute.xlu2 %1521 }
 0x77a   : > { %1524 = vst.msk [vmem:[%s3079_s27] sm:$0xff] %vm1518_vm2, %v1522_v45 }
 0x784   : > { %v1558_v36 = vpop.permute.xlu0 %1557 }
 0x785   : > { %2142 = vmatmul.msk.bf16.vlgmr.msra.gmra.mxu1 %vm756_vm1, %v1558_v36  ;;  %2143 = vmatmul.msk.bf16.vlgmr.msra.gmra.mxu2 %vm756_vm1, %v1558_v36 }
 0x78c   : > { %v1534_v33 = vpop.permute.xlu0 %1533 }
 0x78d   : > { %2141 = vmatmul.msk.bf16.vlgmr.msra.gmra.mxu0 %vm756_vm1, %v1534_v33 }
 0x802   : > { %v1574_v37 = vpop.f32.mrf.mxu1 }
 0x803   : > { %v1604_v49 = vmul.f32 %v1597_v47, %v1574_v37  ;;  %v1605_v50 = vsub.f32 0.0, %v1574_v37 }
 0x805   : > { %v1607_v51 = vpack.c.bf16 %v1604_v49, %v1604_v49  ;;  %v1606_v52 = vmul.f32 %v1605_v50, %v1601_v48 }
 0x807   : > { %v1614_v53 = vpack.c.bf16 %v1606_v52, %v1606_v52  ;;  %1609 = vrot.lane.b32.xlu0 %v1607_v51, %s2795_s6 }
 0x808   : > { %v1592_v25 = vpop.f32.mrf.mxu2 }
 0x809   : > { %v1620_v54 = vpack.c.bf16 %v1592_v25, %v1592_v25  ;;  %1616 = vrot.lane.b32.xlu1 %v1614_v53, %s2795_s6 }
 0x80a   : > { %v1550_v55 = vpop.f32.mrf.mxu0  ;;  %v1576_v56 = vpop.f32.mrf.mxu1 }
 0x80b   : > { %v3300_v57 = vmul.f32 %v1597_v47, %v1550_v55  ;;  %v3302_v43 = vmul.f32 %v1601_v48, %v1550_v55  ;;  %1622 = vrot.lane.b32.xlu2 %v1620_v54, %s2795_s6 }
 0x80d   : > { %v1626_v58 = vpack.c.bf16 %v3300_v57, %v3300_v57  ;;  %v1627_v62 = vpack.c.bf16 %v3302_v43, %v3302_v43  ;;  %v3311_v5 = vadd.f32 %v3302_v43, %v3300_v57 }
 0x80f   : > { %v1629_v6 = vpack.c.bf16 %v3311_v5, %v3311_v5 }
 0x810   : > { %v1594_v7 = vpop.f32.mrf.mxu2 }
 0x812   : > { %v1552_v8 = vpop.f32.mrf.mxu0 }
 0x865   : > { %v1623_v9 = vpop.permute.xlu2 %1622 }
 0x866   : > { %1625 = vst.msk [vmem:[#allocation4] sm:$0xf] %vm1612_vm3, %v1623_v9 }
 0x879   : > { %v1610_v11 = vpop.permute.xlu0 %1609 }
 0x87a   : > { %1613 = vst.msk [vmem:[#allocation2] sm:$0xf] %vm1612_vm3, %v1610_v11 }
 0x87b   : > { %v1617_v0 = vpop.permute.xlu1 %1616 }
 0x87c   : > { %1619 = vst.msk [vmem:[#allocation3] sm:$0xf] %vm1612_vm3, %v1617_v0 }
 0x87d LB: >> { %s2144_s17 = sshll.u32 %s2773_s18, 3  ;;  %s2796_s4 = smov 104   ;;  %v1735_v41 = vstv %s3286_s19  ;;  %s2773_s18 = sphi %s3319_s18, %s1633_s18   ;;  %v2769_v13 = vphi %v3317_v13, %v3459_v13   ;;  %v2765_v12 = vphi %v3315_v12, %v3458_v12  }
 0x87e   : >> { %s1639_s24 = sshra.s32 %s2144_s17, 3  ;;  %s1727_s12 = ssub.s32 0, %s2773_s18 }
 0x87f   : >> { %s2145_s22 = sshll.u32 %s1639_s24, 2  ;;  %s2151_s20 = sshll.u32 %s1727_s12, 3 }
 0x880   : >> { %s1642_s15 = scalar_lea.vmem [#allocation2], %s2145_s22  ;;  %s1645_s5 = scalar_lea.vmem [#allocation3], %s2145_s22  ;;  %v1729_v28 = vstv %s2151_s20 }
 0x881   : >> { %v1643_v59 = vld [vmem:[%s1642_s15] sm:$0xf]  ;;  %s1648_s0 = scalar_lea.vmem [#allocation4], %s2145_s22  ;;  %v1730_v35 = vadd.s32 %v1729_v28, %v2990_v1  ;;  %s1633_s18 = sadd.s32 1, %s2773_s18  }
 0x882   : >> { %v1651_v63 = vunpack.c.l.b16 %v1643_v59  ;;  %v1698_v2 = vunpack.c.l.bf16 %v1643_v59  ;;  %v1649_v19 = vld [vmem:[%s1648_s0] sm:$0xf]  ;;  %p1632_p10 = scmp.ge.s32.totalorder %s1633_s18, 1 }
 0x883   : >> { %v1646_v60 = vld [vmem:[%s1645_s5] sm:$0xf]  ;;  %v1743_v20 = vunpack.c.l.b16 %v1649_v19  ;;  %v1731_v42 = vsub.s32 %v1730_v35, %v3046_v61  ;;  %s2156_s14 = sshll.u32 (%p1632_p10), %s2717_s11, 3  ;;  %s1816_s30 = sshll.u32 (%p1632_p10), %s3076_s26, 4  ;;  %vm1790_vm5 = vcmask (%p1632_p10), 261312   ;;  %s1817_s30 = int_to_ptr.vmem [resolvable:$true] %s1816_s30 }
 0x884   : >> { %v1699_v3 = vunpack.c.l.bf16 %v1646_v60  ;;  %v1652_v4 = vpack.c.b16 %v1651_v63, %v1651_v63  ;;  %v1675_v16 = vunpack.c.l.b16 %v1646_v60  ;;  %s1814_s29 = scalar_lea.hbm (%p1632_p10), %s3429_s7, %s2156_s14  ;;  %s1829_s17 = scalar_lea.hbm (%p1632_p10), %s3430_s8, %s2156_s14 }
 0x885   : >> { %v1744_v21 = vpack.c.b16 %v1743_v20, %v1743_v20  ;;  %v1732_v44 = vcvt.s32.f32 %v1731_v42  ;;  %s1818_s16 = sshll.u32 (%p1632_p10), %s1814_s29, 4  ;;  %s1798_s24 = scalar_lea.sflag (%p1632_p10), [#allocation9], %s2958_s23  ;;  %s1819_s16 = int_to_ptr.hbm [resolvable:$true] %s1818_s16 }
 0x886   : >> { %v1700_v10 = vadd.f32 %v1699_v3, %v1698_v2  ;;  %1653 = vrot.lane.b32.xlu0 %v1652_v4, %s2796_s4  ;;  %v1676_v17 = vpack.c.b16 %v1675_v16, %v1675_v16  ;;  %s2569_s5 = scalar_lea.hbm (%p1632_p10), %s3429_s7, 16 }
 0x887   : >> { %v1734_v40 = vmax.f32 %v1732_v44, 0.0  ;;  %vm1733_vm4 = vcmp.ge.f32.partialorder %v1732_v44, 0.0 }
 0x888   : >> { %v1701_v14 = vpack.c.bf16 %v1700_v10, %v1700_v10 }
 0x889   : >> { %v1736_v15 = vmul.f32 %v1735_v41, %v1734_v40 }
 0x88a   : >> { %1703 = vrot.lane.b32.xlu1 %v1701_v14, %s2796_s4 }
 0x88b   : >> { %v1737_v46 = vmul.f32 1.442695, %v1736_v15 }
 0x88d   : >> { %2385 = vpow2.f32 %v1737_v46 }
 0x88e   : >> { %1677 = vrot.lane.b32.xlu0 %v1676_v17, %s2796_s4 }
 0x892   : >> { %1745 = vrot.lane.b32.xlu1 %v1744_v21, %s2796_s4 }
 0x893   : >> { %v2386_v30 = vpop.eup %2385 }
 0x894   : >> { %v1739_v36 = vsel %vm1733_vm4, %v2386_v30, 0.0 }
 0x8f8   : >> { %v1654_v22 = vpop.permute.xlu0 %1653 }
 0x8f9   : >> { %v1659_v23 = vsel %vm756_vm1, %v1654_v22, 0 }
 0x8fa   : >> { %1668 = vmatpush.bf16.xpose.msra.mxu0 %v1659_v23 }
 0x8fc   : >> { %v1704_v18 = vpop.permute.xlu1 %1703 }
 0x8fd   : >> { %v1709_v24 = vsel %vm756_vm1, %v1704_v18, 0 }
 0x8fe   : >> { %1718 = vmatpush.bf16.xpose.msra.mxu2 %v1709_v24 }
 0x900   : >> { %v1678_v26 = vpop.permute.xlu0 %1677 }
 0x901   : >> { %2148 = vmatmul.msk.bf16.vlgmr.msra.gmra.mxu0 %vm756_vm1, %v1626_v58  ;;  %v1683_v27 = vsel %vm756_vm1, %v1678_v26, 0 }
 0x902   : >> { %1692 = vmatpush.bf16.xpose.msra.mxu1 %v1683_v27 }
 0x904   : >> { %v1746_v38 = vpop.permute.xlu1 %1745 }
 0x905   : >> { %2150 = vmatmul.msk.bf16.vlgmr.msra.gmra.mxu2 %vm756_vm1, %v1629_v6  ;;  %v1751_v39 = vsel %vm760_vm0, %v1746_v38, 0 }
 0x906   : >> { %1760 = vmatpush.bf16.msra.mxu3 %v1751_v39 }
 0x909   : >> { %2149 = vmatmul.msk.bf16.vlgmr.msra.gmra.mxu1 %vm756_vm1, %v1627_v62 }
 0x90a   : >> { %1779 = vmatpush.bf16.msrb.mxu3 %v1751_v39 }
 0x97e   : >> { %v1670_v29 = vpop.f32.mrf.mxu0 }
 0x986   : >> { %v1672_v31 = vpop.f32.mrf.mxu0  ;;  %v1694_v32 = vpop.f32.mrf.mxu1 }
 0x987   : >> { %v1724_v33 = vsub.f32 %v1670_v29, %v1694_v32 }
 0x988   : >> { %v1720_v34 = vpop.f32.mrf.mxu2 }
 0x989   : >> { %v1740_v47 = vmul.f32 %v1739_v36, %v1724_v33  ;;  %v1725_v48 = vsub.f32 %v1720_v34, %v1670_v29 }
 0x98b   : >> { %v1741_v45 = vpack.c.bf16 %v1740_v47, %v1740_v47  ;;  %v1726_v50 = vsub.f32 %v1725_v48, %v1694_v32 }
 0x98d   : >> { %2152 = vmatmul.msk.bf16.vlgmr.msra.gmra.mxu3 %vm756_vm1, %v1741_v45  ;;  %v1767_v51 = vmul.f32 %v1739_v36, %v1726_v50 }
 0x98e   : >> { %v1696_v37 = vpop.f32.mrf.mxu1 }
 0x98f   : >> { %v1768_v52 = vpack.c.bf16 %v1767_v51, %v1767_v51 }
 0x990   : >> { %v1722_v49 = vpop.f32.mrf.mxu2 }
 0x99d   : >> { %2153 = vmatmul.msk.bf16.vlgmr.msrb.gmra.mxu3 %vm756_vm1, %v1768_v52 }
 0xa10   : >> { %v1762_v53 = vpop.f32.mrf.mxu3 }
 0xa11   : >> { %v1766_v25 = vadd.f32 %v2769_v13, %v1762_v53  }
 0xa13   : >> { %v3459_v13 = vmov %v1766_v25  ;;  %1787 = vrot.lane.b32.xlu0 (%p1632_p10), %v1766_v25, %s2795_s6 }
 0xa18   : >> { %v1764_v54 = vpop.f32.mrf.mxu3 }
 0xa20   : >> { %v1781_v55 = vpop.f32.mrf.mxu3 }
 0xa21   : >> { %v1785_v56 = vadd.f32 %v2765_v12, %v1781_v55  }
 0xa23   : >> { %v3458_v12 = vmov %v1785_v56  ;;  %1793 = vrot.lane.b32.xlu0 (%p1632_p10), %v1785_v56, %s2795_s6  ;;  %s2563_s6 = sshra.s32 (%p1632_p10), %s1819_s16, 4  ;;  %s2564_s6 = int_to_ptr.hbm [resolvable:$true] %s2563_s6 }
 0xa24   : > { %1635 = sbr.rel (!%p1632_p10) target bundleno = 2173 (0x87d), region = 216  ;;  %s2565_s11 = scalar_lea.hbm (%p1632_p10), %s2564_s6, 8 }
 0xa25   : > { %p2566_p11 = scmp.ne.s32.totalorder (%p1632_p10), %s2564_s6, %s2565_s11  ;;  %p2570_p0 = scmp.lt.s32.totalorder (%p1632_p10), %s2564_s6, %s3429_s7 }
 0xa26   : > { %p2571_p2 = scmp.lt.s32.totalorder (%p1632_p10), %s2569_s5, %s2565_s11 }
 0xa27   : > { %p2567_p12 = pnand (%p1632_p10), %p2566_p11, %p2932_p4 }
 0xa28   : >> { %v1783_v7 = vpop.f32.mrf.mxu3  ;;  %p2572_p5 = por (%p1632_p10), %p2571_p2, %p2570_p0 }
 0xa29   : > { %p2568_p13 = pneg %p2567_p12 }
 0xa2b   : > { %p2573_p8 = pnand %p2572_p5, %p2568_p13 }
 0xa85   : > { %v1788_v8 = vpop.permute.xlu0 %1787 }
 0xa86   : > { %1791 = vst.msk [vmem:[%s3076_s26] sm:$0xff] %vm1790_vm5, %v1788_v8 }
 0xa87   : > { %2576 = shalt.err (!%p2573_p8)
}
 0xa88   : > { %2176 = dma.vmem_to_hbm [thread:$0]  (%p2932_p4), %s1817_s30, 128, %s1819_s16, %s1798_s24  }
 0xa89   : > { %s1831_s26 = sshll.u32 %s3079_s27, 4  ;;  %s1833_s12 = sshll.u32 %s1829_s17, 4  ;;  %s1832_s26 = int_to_ptr.vmem [resolvable:$true] %s1831_s26  ;;  %s1834_s12 = int_to_ptr.hbm [resolvable:$true] %s1833_s12 }
 0xa8a   : > { %s1803_s20 = scalar_lea.sflag [#allocation18], %s2958_s23  ;;  %s2591_s14 = sshra.s32 %s1834_s12, 4  ;;  %s2592_s14 = int_to_ptr.hbm [resolvable:$true] %s2591_s14 }
 0xa8b   : > { %s2593_s21 = scalar_lea.hbm %s2592_s14, 8  ;;  %s2597_s19 = scalar_lea.hbm %s3430_s8, 16 }
 0xa8c   : > { %p2594_p1 = scmp.ne.s32.totalorder %s2592_s14, %s2593_s21  ;;  %p2598_p10 = scmp.lt.s32.totalorder %s2592_s14, %s3430_s8 }
 0xa8d   : > { %p2599_p11 = scmp.lt.s32.totalorder %s2597_s19, %s2593_s21 }
 0xa8e   : > { %p2595_p3 = pnand %p2594_p1, %p2932_p4 }
 0xa8f   : > { %p2600_p12 = por %p2599_p11, %p2598_p10 }
 0xa90   : > { %p2596_p9 = pneg %p2595_p3 }
 0xa92   : > { %p2601_p13 = pnand %p2600_p12, %p2596_p9 }
 0xa95   : > { %v1794_v1 = vpop.permute.xlu0 %1793 }
 0xa96   : > { %1796 = vst.msk [vmem:[%s3079_s27] sm:$0xff] %vm1790_vm5, %v1794_v1 }
 0xa97   : > { %2604 = shalt.err (!%p2601_p13)
}
 0xa98   : > { %2177 = dma.vmem_to_hbm [thread:$0]  (%p2932_p4), %s1832_s26, 128, %s1834_s12, %s1803_s20  }
 0xa99 PF: > { %s1845_s27 = sand.u32 1, %s2705_s9   ;;  %p2198_p0 = pnand %p2080_p6, %p2940_p7 }
 0xa9a   : > { %s1846_s18 = scalar_lea.sflag [#allocation9], %s1845_s27 }
 0xa9b   : > { %p2199_p2 = pneg %p2198_p0 }
 0xa9d   : > { %2696 = dma.done.wait (%p2199_p2), %s1846_s18, 128  }
 0xa9e   : > { %2698 = vsyncadd (%p2199_p2), %s1846_s18, 4294967168  ;;  %s1856_s17 = scalar_lea.sflag [#allocation18], %s1845_s27 }
 0xa9f   : > { %2700 = dma.done.wait (%p2199_p2), %s1856_s17, 128  }
 0xaa0   : > { %2702 = vsyncadd (%p2199_p2), %s1856_s17, 4294967168  ;;  %s40_s13 = sadd.s32 1, %s2725_s13   ;;  %s3461_s25 = sld [smem:[#allocation26_spill]] }
 0xaa1   : > { %p37_p5 = scmp.ge.s32.totalorder %s40_s13, 4   ;;  %s3462_s0 = sld [smem:[#allocation29_spill]] }
 0xaa2   : > { %s3463_s11 = sld [smem:[#allocation27_spill]]  ;;  %s3465_s9 = smov %s2709_s10 }
 0xaa3   : > { %s3464_s12 = sld [smem:[#allocation28_spill]]  ;;  %39 = sbr.rel (!%p37_p5) target bundleno = 19 (0x13), region = 227 }
 0xaa6   : > { %s3466_s10 = smov %s3461_s25 }
 0xaa8   :  { %1862 = vsyncpa [#allocation8], 1 }
 0xaa9   :  { %1864 = vsyncpa [#allocation8 + $0x1], 1 }
 0xaaa   :  { %1865 = vsyncpa [#allocation11], 1 }
 0xaab   :  { %1867 = vsyncpa [#allocation11 + $0x1], 1 }
 0xaac   :  { %1868 = vsyncpa [#allocation14], 1 }
 0xaad   :  { %1869 = vsyncpa [#allocation9], 1 }
 0xaae   :  { %1871 = vsyncpa [#allocation9 + $0x1], 1 }
 0xaaf   :  { %1872 = vsyncpa [#allocation18], 1 }
 0xab0   :  { %1874 = vsyncpa [#allocation18 + $0x1], 1 }

</bundles_post_ra>
